<compile_context>
chip_gen: v5e
topology: v5e:2x2
jax: 0.10.0
libtpu: 0.0.40
codegen_flags: <defaults>
</compile_context>

<pallas_src>
import functools
import math

import numpy as np
import jax
import jax.numpy as jnp
from jax import lax
from jax.experimental import pallas as pl
from jax.experimental.pallas import tpu as pltpu

MODEL_DIM = 256
NUM_HEADS = 4
DPH = MODEL_DIM // NUM_HEADS          # 64
N_CHUNKS = MODEL_DIM // DPH           # 4 (64-lane chunks per 256-wide row)
FFN_DIM = 1024
MAX_SEQ_LEN = 51
NEG_BIG = 1e30                        # additive mask constant (exp underflows to exactly 0)


def _round_up(x, m):
    return ((x + m - 1) // m) * m


# ============================================================================ Pallas kernels
def _encoder_stack_kernel(x0_ref, bias_ref,
                          wqkv_ref, bqkv_ref, wo_ref, bo_ref,
                          ln1g_ref, ln1b_ref, w1_ref, fb1_ref,
                          w2_ref, fb2_ref, ln2g_ref, ln2b_ref,
                          o_ref,
                          kvq_ref, qall_ref, kall_ref, vall_ref, ctx_ref,
                          *, n_rows, scale, eps):
    """One grid step == one encoder layer. The (Mp,256) activation lives in o_ref (constant
    output block => VMEM-resident accumulator carried across layers, written back to HBM once)."""
    D = MODEL_DIM
    Mp = n_rows
    l = pl.program_id(0)

    @pl.when(l == 0)
    def _init():
        o_ref[...] = x0_ref[...]

    x = o_ref[...]                                                     # (Mp, D) f32 carry

    # ---- fused K|V|Q projection: one lane-dense MXU matmul, f32 accumulation -------------
    kvq_ref[...] = jnp.dot(x.astype(jnp.bfloat16), wqkv_ref[0],
                           preferred_element_type=jnp.float32) + bqkv_ref[0]

    # ---- rebuild the reference head layout without minor-dim reshapes --------------------
    # torch .view(B*H,-1,dph): head-position u covers flat elems [u*dph,(u+1)*dph)
    #   -> source row m = u // 4, 64-lane chunk c = u % 4.
    # We stack all head-positions on the sublane axis in chunk-major order w = c*Mp + m
    # (a within-head permutation only; the additive mask below is built in the same order).
    for c in range(N_CHUNKS):
        kall_ref[c * Mp:(c + 1) * Mp, :] = kvq_ref[:, 0 * D + c * DPH: 0 * D + (c + 1) * DPH]
        vall_ref[c * Mp:(c + 1) * Mp, :] = kvq_ref[:, 1 * D + c * DPH: 1 * D + (c + 1) * DPH]
        qall_ref[c * Mp:(c + 1) * Mp, :] = kvq_ref[:, 2 * D + c * DPH: 2 * D + (c + 1) * DPH]

    # ---- all heads at once: one (4M,4M) score matmul + block-diagonal additive mask ------
    q = qall_ref[...].astype(jnp.bfloat16)
    k = kall_ref[...].astype(jnp.bfloat16)
    v = vall_ref[...].astype(jnp.bfloat16)
    s = lax.dot_general(q, k, (((1,), (1,)), ((), ())),
                        preferred_element_type=jnp.float32)
    s = s * scale + bias_ref[...]                                      # 0 / -1e30, pure add
    s_max = jnp.max(s, axis=-1, keepdims=True)
    p = jnp.exp(s - s_max)
    denom = jnp.sum(p, axis=-1, keepdims=True)
    attn = p * pl.reciprocal(denom, approx=True)
    ctx_ref[...] = jnp.dot(attn.astype(jnp.bfloat16), v,
                           preferred_element_type=jnp.float32)         # (4*Mp, 64)

    # ---- out-projection folded over the 4 chunks (== ctx.view(B,-1,D) @ Wo), lane-dense --
    attn_out = bo_ref[0]
    for c in range(N_CHUNKS):
        ctx_c = ctx_ref[c * Mp:(c + 1) * Mp, :].astype(jnp.bfloat16)   # (Mp, 64)
        wo_c = wo_ref[0, c * DPH:(c + 1) * DPH, :]                     # (64, 256) bf16
        attn_out = attn_out + jnp.dot(ctx_c, wo_c, preferred_element_type=jnp.float32)

    # ---- residual + LayerNorm 1 -----------------------------------------------------------
    xr = x + attn_out
    mu = jnp.mean(xr, axis=-1, keepdims=True)
    var = jnp.mean(jnp.square(xr - mu), axis=-1, keepdims=True)
    y1 = (xr - mu) * lax.rsqrt(var + eps) * ln1g_ref[0] + ln1b_ref[0]

    # ---- position-wise FFN (1x1 convs) + residual + LayerNorm 2 ---------------------------
    h = jnp.dot(y1.astype(jnp.bfloat16), w1_ref[0],
                preferred_element_type=jnp.float32) + fb1_ref[0]
    h = jnp.maximum(h, 0.0)
    y2 = jnp.dot(h.astype(jnp.bfloat16), w2_ref[0],
                 preferred_element_type=jnp.float32) + fb2_ref[0]
    z = y1 + y2
    mu2 = jnp.mean(z, axis=-1, keepdims=True)
    var2 = jnp.mean(jnp.square(z - mu2), axis=-1, keepdims=True)
    o_ref[...] = (z - mu2) * lax.rsqrt(var2 + eps) * ln2g_ref[0] + ln2b_ref[0]


def encoder_stack_pallas(x0, attn_bias, enc):
    """Run all encoder layers in one pallas_call. x0: (Mp,256) f32, attn_bias: (4Mp,4Mp) f32."""
    Mp, D = x0.shape
    M4 = attn_bias.shape[0]
    F = FFN_DIM
    L = enc["wqkv"].shape[0]
    scale = float((DPH // NUM_HEADS) ** (-0.5))            # reference quirk (== 0.25)

    kern = functools.partial(_encoder_stack_kernel, n_rows=Mp, scale=scale, eps=1e-5)
    return pl.pallas_call(
        kern,
        out_shape=jax.ShapeDtypeStruct((Mp, D), jnp.float32),
        grid=(L,),
        in_specs=[
            pl.BlockSpec((Mp, D), lambda l: (0, 0)),            # x0 (layer-0 input)
            pl.BlockSpec((M4, M4), lambda l: (0, 0)),           # additive attention bias
            pl.BlockSpec((1, D, 3 * D), lambda l: (l, 0, 0)),   # wqkv (bf16)
            pl.BlockSpec((1, 1, 3 * D), lambda l: (l, 0, 0)),   # bqkv
            pl.BlockSpec((1, D, D), lambda l: (l, 0, 0)),       # wo (bf16)
            pl.BlockSpec((1, 1, D), lambda l: (l, 0, 0)),       # bo
            pl.BlockSpec((1, 1, D), lambda l: (l, 0, 0)),       # ln1 gamma
            pl.BlockSpec((1, 1, D), lambda l: (l, 0, 0)),       # ln1 beta
            pl.BlockSpec((1, D, F), lambda l: (l, 0, 0)),       # ffn w1 (bf16)
            pl.BlockSpec((1, 1, F), lambda l: (l, 0, 0)),       # ffn b1
            pl.BlockSpec((1, F, D), lambda l: (l, 0, 0)),       # ffn w2 (bf16)
            pl.BlockSpec((1, 1, D), lambda l: (l, 0, 0)),       # ffn b2
            pl.BlockSpec((1, 1, D), lambda l: (l, 0, 0)),       # ln2 gamma
            pl.BlockSpec((1, 1, D), lambda l: (l, 0, 0)),       # ln2 beta
        ],
        out_specs=pl.BlockSpec((Mp, D), lambda l: (0, 0)),      # carried across layers
        scratch_shapes=[
            pltpu.VMEM((Mp, 3 * D), jnp.float32),               # kvq
            pltpu.VMEM((M4, DPH), jnp.float32),                 # q (all heads stacked)
            pltpu.VMEM((M4, DPH), jnp.float32),                 # k
            pltpu.VMEM((M4, DPH), jnp.float32),                 # v
            pltpu.VMEM((M4, DPH), jnp.float32),                 # ctx
        ],
        compiler_params=pltpu.CompilerParams(dimension_semantics=("arbitrary",)),
    )(x0, attn_bias, enc["wqkv"], enc["bqkv"], enc["wo"], enc["bo"],
      enc["ln1_g"], enc["ln1_b"], enc["w1"], enc["b1"],
      enc["w2"], enc["b2"], enc["ln2_g"], enc["ln2_b"])


def _lin_tanh_kernel(x_ref, w_ref, b_ref, o_ref):
    y = jnp.dot(x_ref[...].astype(jnp.bfloat16), w_ref[...],
                preferred_element_type=jnp.float32) + b_ref[...]
    o_ref[...] = jnp.tanh(y)


def linear_tanh_pallas(x2d, w_bf16, b_row):
    """tanh(x @ w + b) for the code-selection MLP (bf16 matmul operands, f32 accumulate)."""
    M, K = x2d.shape
    N = w_bf16.shape[1]
    Mp = _round_up(M, 8)
    xp = x2d if Mp == M else jnp.pad(x2d, ((0, Mp - M), (0, 0)))
    out = pl.pallas_call(
        _lin_tanh_kernel,
        out_shape=jax.ShapeDtypeStruct((Mp, N), jnp.float32),
        grid=(1,),
        in_specs=[pl.BlockSpec((Mp, K), lambda i: (0, 0)),
                  pl.BlockSpec((K, N), lambda i: (0, 0)),
                  pl.BlockSpec((1, N), lambda i: (0, 0))],
        out_specs=pl.BlockSpec((Mp, N), lambda i: (0, 0)),
        compiler_params=pltpu.CompilerParams(dimension_semantics=("parallel",)),
    )(xp, w_bf16, b_row)
    return out if Mp == M else out[:M]


# ============================================================================ parameters
def _lin_init(key, fan_in, fan_out):
    kw, kb = jax.random.split(key)
    bound = 1.0 / math.sqrt(fan_in)
    w = jax.random.uniform(kw, (fan_in, fan_out), jnp.float32, -bound, bound)
    b = jax.random.uniform(kb, (fan_out,), jnp.float32, -bound, bound)
    return w, b


def _pos_encoding_table(d_model, max_seq_len):
    pe = np.array([[pos / np.power(10000, 2.0 * (j // 2) / d_model)
                    for j in range(d_model)] for pos in range(max_seq_len)])
    pe[:, 0::2] = np.sin(pe[:, 0::2])
    pe[:, 1::2] = np.cos(pe[:, 1::2])
    pe = np.concatenate([np.zeros((1, d_model)), pe], axis=0).astype(np.float32)
    return jnp.asarray(pe)


def _stack_layers(layers):
    """Stack per-layer weights along a leading layer axis; big matmul weights stored bf16."""
    D, F = MODEL_DIM, FFN_DIM

    def stk(fn, dtype=jnp.float32):
        return jnp.stack([fn(lp) for lp in layers], axis=0).astype(dtype)

    return {
        "wqkv": stk(lambda lp: jnp.concatenate([lp["wk"], lp["wv"], lp["wq"]], axis=1),
                    jnp.bfloat16),                                             # (L, D, 3D)
        "bqkv": stk(lambda lp: jnp.concatenate([lp["bk"], lp["bv"], lp["bq"]]).reshape(1, 3 * D)),
        "wo": stk(lambda lp: lp["wo"], jnp.bfloat16),                          # (L, D, D)
        "bo": stk(lambda lp: lp["bo"].reshape(1, D)),
        "ln1_g": stk(lambda lp: lp["ln1_g"].reshape(1, D)),
        "ln1_b": stk(lambda lp: lp["ln1_b"].reshape(1, D)),
        "w1": stk(lambda lp: lp["ffn_w1"], jnp.bfloat16),                      # (L, D, F)
        "b1": stk(lambda lp: lp["ffn_b1"].reshape(1, F)),
        "w2": stk(lambda lp: lp["ffn_w2"], jnp.bfloat16),                      # (L, F, D)
        "b2": stk(lambda lp: lp["ffn_b2"].reshape(1, D)),
        "ln2_g": stk(lambda lp: lp["ln2_g"].reshape(1, D)),
        "ln2_b": stk(lambda lp: lp["ln2_b"].reshape(1, D)),
    }


def init_params(key, vocab_size, num_layers=1):
    V1 = vocab_size + 1
    nk = iter(list(jax.random.split(key, 64)))
    p = {}
    emb_bound = math.sqrt(3.0 / MODEL_DIM)
    p["pre_emb"] = jax.random.uniform(next(nk), (V1, MODEL_DIM), jnp.float32, -emb_bound, emb_bound)
    p["bias_embedding"] = jax.random.uniform(
        next(nk), (MODEL_DIM,), jnp.float32,
        -1.0 / math.sqrt(vocab_size), 1.0 / math.sqrt(vocab_size))
    p["target_emb"] = jax.random.uniform(next(nk), (1, MODEL_DIM), jnp.float32, -emb_bound, emb_bound)
    emb = jax.random.uniform(next(nk), (V1, MODEL_DIM), jnp.float32, -emb_bound, emb_bound)
    p["emb"] = emb.at[V1 - 1].set(0.0)                       # padding_idx = -1 -> last row zero
    w1, b1 = _lin_init(next(nk), 2 * MODEL_DIM, MODEL_DIM)
    p["code_sel_w1"] = w1.astype(jnp.bfloat16)
    p["code_sel_b1"] = b1
    p["code_sel_w2"], p["code_sel_b2"] = _lin_init(next(nk), MODEL_DIM, 2)
    p["pos_table"] = _pos_encoding_table(MODEL_DIM, MAX_SEQ_LEN)
    p["time_w"], p["time_b"] = _lin_init(next(nk), 64, MODEL_DIM)
    p["sel_w"], p["sel_b"] = _lin_init(next(nk), 1, 64)

    raw_layers = []
    for _ in range(num_layers):
        lp = {}
        lp["wk"], lp["bk"] = _lin_init(next(nk), MODEL_DIM, MODEL_DIM)
        lp["wv"], lp["bv"] = _lin_init(next(nk), MODEL_DIM, MODEL_DIM)
        lp["wq"], lp["bq"] = _lin_init(next(nk), MODEL_DIM, MODEL_DIM)
        lp["wo"], lp["bo"] = _lin_init(next(nk), MODEL_DIM, MODEL_DIM)
        lp["ln1_g"] = jnp.ones((MODEL_DIM,), jnp.float32)
        lp["ln1_b"] = jnp.zeros((MODEL_DIM,), jnp.float32)
        lp["ffn_w1"], lp["ffn_b1"] = _lin_init(next(nk), MODEL_DIM, FFN_DIM)   # Conv1d(256,1024,1)
        lp["ffn_w2"], lp["ffn_b2"] = _lin_init(next(nk), FFN_DIM, MODEL_DIM)   # Conv1d(1024,256,1)
        lp["ln2_g"] = jnp.ones((MODEL_DIM,), jnp.float32)
        lp["ln2_b"] = jnp.zeros((MODEL_DIM,), jnp.float32)
        raw_layers.append(lp)
    p["enc"] = _stack_layers(raw_layers)

    p["self_w"], p["self_b"] = _lin_init(next(nk), MODEL_DIM, 1)
    p["classify_w"], p["classify_b"] = _lin_init(next(nk), MODEL_DIM, 2)
    p["quiry_w"], p["quiry_b"] = _lin_init(next(nk), MODEL_DIM, 64)
    p["quiry_weight_w"], p["quiry_weight_b"] = _lin_init(next(nk), MODEL_DIM, 2)
    p["te_sel_w"], p["te_sel_b"] = _lin_init(next(nk), 1, 64)
    p["te_weight_w"], p["te_weight_b"] = _lin_init(next(nk), 64, 64)
    return p


# ============================================================================ model forward
def build_attn_bias(ind_pos, Mp, S):
    """Additive mask (4Mp,4Mp) in the kernel's chunk-major head-position order w = c*Mp + m.
    0 where query/key belong to the same (reference-style) head AND the key is not padding,
    else -1e30.  Reproduces torch's attn_mask.repeat(num_heads,1,1) batch indexing (head % B)."""
    # TODO(synk): this flattened mask is O((B*S)^2); for production B*S switch to per-head block
    # tiling with a 'parallel' row grid axis (<=~2048-row tiles on v7x's 64 MiB VMEM).
    B = ind_pos.shape[0]
    M = B * S
    pad_key = (ind_pos == 0)                                    # (B,S) True = padded position
    c = jnp.arange(N_CHUNKS, dtype=jnp.int32)[:, None]          # (4,1)
    m = jnp.arange(Mp, dtype=jnp.int32)[None, :]                # (1,Mp)
    u = (N_CHUNKS * m + c).reshape(-1)                          # (4Mp,)  w = c*Mp + m
    head = u // S
    pos = u % S
    kp = pad_key[head % B, pos]                                 # reference repeat() ordering
    kp = kp | (jnp.broadcast_to(m, (N_CHUNKS, Mp)).reshape(-1) >= M)   # mask row-padding keys
    same = head[:, None] == head[None, :]
    valid = same & jnp.logical_not(kp)[None, :]
    return jnp.where(valid, 0.0, -NEG_BIG).astype(jnp.float32)


def encoder_new_forward(params, diagnosis_codes, mask_code_e, seq_time_step, ind_pos, gumbel_key):
    B, S, C = diagnosis_codes.shape
    V1 = params["pre_emb"].shape[0]
    vocab_size = V1 - 1

    # time feature: time_layer(1 - tanh(selection_layer(t/180)^2)) -- tiny linears, plain jnp
    t = (seq_time_step[..., None] / 180.0).astype(jnp.float32)                 # (B,S,1)
    sel = 1.0 - jnp.tanh(jnp.square(t * params["sel_w"].reshape(1, 1, -1) + params["sel_b"]))
    time_feature = sel @ params["time_w"] + params["time_b"]                   # (B,S,256)

    # TODO(synk): embedding gathers + hard gumbel-softmax gating stay in XLA (data-dependent
    # gathers / sampling have no clean small-Pallas equivalent at this size).
    x = jnp.take(params["pre_emb"], diagnosis_codes, axis=0) * mask_code_e     # (B,S,C,256)
    # emb_dropout: eval mode -> identity

    cat_features = jnp.concatenate(
        [params["emb"], jnp.broadcast_to(params["target_emb"], (V1, MODEL_DIM))], axis=-1)
    h = linear_tanh_pallas(cat_features, params["code_sel_w1"],
                           params["code_sel_b1"].reshape(1, -1))
    logits = h @ params["code_sel_w2"] + params["code_sel_b2"]                 # (V1,2) micro-linear
    logp = jax.nn.log_softmax(logits, axis=-1)
    g = jax.random.gumbel(gumbel_key, logp.shape, jnp.float32)
    hard = jax.nn.one_hot(jnp.argmax(logp + g, axis=-1), 2, dtype=jnp.float32)
    p0 = hard[:, 0].at[vocab_size].set(0.0)
    p_mask = p0[diagnosis_codes]                                               # (B,S,C)

    output = (x * p_mask[..., None]).sum(axis=2) + params["bias_embedding"]    # (B,S,256)
    output = output + time_feature
    output = output + jnp.take(params["pos_table"], ind_pos, axis=0)

    # whole encoder stack in one fused pallas_call (grid over layers)
    M = B * S
    Mp = _round_up(M, 8)
    x0 = output.reshape(M, MODEL_DIM)
    if Mp != M:
        x0 = jnp.pad(x0, ((0, Mp - M), (0, 0)))
    attn_bias = build_attn_bias(ind_pos, Mp, S)
    out = encoder_stack_pallas(x0, attn_bias, params["enc"])
    return out[:M].reshape(B, S, MODEL_DIM)


def time_encoder_forward(params, seq_time_step, final_queries, mask_mult):
    t = (seq_time_step[..., None] / 180.0).astype(jnp.float32)
    sel = 1.0 - jnp.tanh(jnp.square(t * params["te_sel_w"].reshape(1, 1, -1) + params["te_sel_b"]))
    sel = jnp.maximum(sel @ params["te_weight_w"] + params["te_weight_b"], 0.0)
    logits = jnp.sum(sel * final_queries, axis=2, keepdims=True) / 8.0
    logits = jnp.where(mask_mult, -NEG_BIG, logits)
    return jax.nn.softmax(logits, axis=1)


def transformer_time_forward(params, diagnosis_codes, seq_time_step, ind_pos,
                             mask, mask_final, mask_code, labels, gumbel_key):
    mask_mult = (1 - mask)[..., None].astype(bool)                 # (B,S,1) True = padded visit
    mask_final_e = mask_final[..., None].astype(jnp.float32)       # (B,S,1)
    mask_code_e = mask_code[..., None].astype(jnp.float32)         # (B,S,C,1)

    features = encoder_new_forward(params, diagnosis_codes, mask_code_e,
                                   seq_time_step, ind_pos, gumbel_key)        # (B,S,256)

    final_statues = (features * mask_final_e).sum(axis=1, keepdims=True)      # (B,1,256)
    quiryes = jnp.maximum(final_statues @ params["quiry_w"] + params["quiry_b"], 0.0)

    # N in {1,2} micro-linears stay in jnp (XLA fuses); large-negative masking avoids NaN
    self_logits = features @ params["self_w"] + params["self_b"]              # (B,S,1)
    self_logits = jnp.where(mask_mult, -NEG_BIG, self_logits)
    self_weight = jax.nn.softmax(self_logits, axis=1)

    time_weight = time_encoder_forward(params, seq_time_step, quiryes, mask_mult)

    attention_weight = jax.nn.softmax(
        final_statues @ params["quiry_weight_w"] + params["quiry_weight_b"], axis=2)   # (B,1,2)

    total_weight = jnp.concatenate([time_weight, self_weight], axis=2)        # (B,S,2)
    total_weight = jnp.sum(total_weight * attention_weight, axis=2, keepdims=True)
    total_weight = total_weight / (jnp.sum(total_weight, axis=1, keepdims=True) + 1e-5)
    averaged_features = jnp.sum(features * total_weight, axis=1)              # (B,256)
    # dropout: eval mode -> identity
    predictions = averaged_features @ params["classify_w"] + params["classify_b"]
    return predictions, labels, self_weight


# ============================================================================ main
if __name__ == "__main__":
    key = jax.random.PRNGKey(0)
    k_params, k_codes, k_time, k_gumbel = jax.random.split(key, 4)

    # small but consistent shapes: B sequences of S visits, C codes per visit
    B, S, C = 2, 8, 4
    n_diagnosis_codes = 20
    vocab_size = n_diagnosis_codes + 1            # EncoderNew(options['n_diagnosis_codes'] + 1, ...)
    num_layers = 1

    params = init_params(k_params, vocab_size, num_layers=num_layers)

    lengths = [8, 5]                              # host-static visit counts (max == S)
    mask_np = np.zeros((B, S), dtype=np.int32)
    mask_final_np = np.zeros((B, S), dtype=np.float32)
    pos_np = np.zeros((B, S), dtype=np.int32)     # PositionalEncoding's host-side index loop
    for b, L in enumerate(lengths):
        mask_np[b, :L] = 1
        mask_final_np[b, L - 1] = 1.0
        for pos_ind in range(1, L + 1):
            pos_np[b, pos_ind - 1] = pos_ind

    codes_np = np.asarray(
        jax.random.randint(k_codes, (B, S, C), 0, vocab_size), dtype=np.int32)
    mask_code_np = np.zeros((B, S, C), dtype=np.float32)
    for b, L in enumerate(lengths):
        mask_code_np[b, :L, :] = 1.0
    codes_np = np.where(mask_code_np > 0, codes_np, vocab_size)   # pad code index = vocab_size

    seq_time_np = np.asarray(
        jax.random.uniform(k_time, (B, S), jnp.float32, 0.0, 365.0)) * mask_np

    labels_np = np.array([0, 1], dtype=np.int32)

    fwd = jax.jit(transformer_time_forward)
    predictions, labels_out, self_weight = fwd(
        params,
        jnp.asarray(codes_np, jnp.int32),
        jnp.asarray(seq_time_np, jnp.float32),
        jnp.asarray(pos_np, jnp.int32),
        jnp.asarray(mask_np, jnp.int32),
        jnp.asarray(mask_final_np, jnp.float32),
        jnp.asarray(mask_code_np, jnp.float32),
        jnp.asarray(labels_np, jnp.int32),
        k_gumbel)

    jax.block_until_ready((predictions, labels_out, self_weight))
    assert predictions.shape == (B, 2)
    assert self_weight.shape == (B, S, 1)
    assert bool(jnp.all(jnp.isfinite(predictions)))
    assert bool(jnp.all(jnp.isfinite(self_weight)))
    print("KERNEL_OK")
</pallas_src>

<mosaic_0001>
module attributes {stable_mosaic.version = 11 : i64} {
  func.func @_lin_tanh_kernel(%arg0: i32, %arg1: memref<24x512xf32, #tpu.memory_space<vmem>>, %arg2: memref<512x256xbf16, #tpu.memory_space<vmem>>, %arg3: memref<1x256xf32, #tpu.memory_space<vmem>>, %arg4: memref<24x256xf32, #tpu.memory_space<vmem>>) attributes {dimension_semantics = [#tpu.dimension_semantics<parallel>], iteration_bounds = array<i64: 1>, scalar_prefetch = 0 : i64, scratch_operands = 0 : i64, tpu.core_type = #tpu.core_type<tc>, window_params = [{pipeline_mode = #tpu.pipeline_mode<synchronous>, transform_indices = @transform_0, window_bounds = array<i64: 24, 512>}, {pipeline_mode = #tpu.pipeline_mode<synchronous>, transform_indices = @transform_1, window_bounds = array<i64: 512, 256>}, {pipeline_mode = #tpu.pipeline_mode<synchronous>, transform_indices = @transform_2, window_bounds = array<i64: 1, 256>}, {pipeline_mode = #tpu.pipeline_mode<synchronous>, transform_indices = @transform_3, window_bounds = array<i64: 24, 256>}]} {
    %c0 = arith.constant 0 : index
    %c0_0 = arith.constant 0 : index
    %0 = vector.load %arg1[%c0, %c0_0] : memref<24x512xf32, #tpu.memory_space<vmem>>, vector<24x512xf32>
    %1 = arith.truncf %0 : vector<24x512xf32> to vector<24x512xbf16>
    %c0_1 = arith.constant 0 : index
    %c0_2 = arith.constant 0 : index
    %2 = vector.load %arg2[%c0_1, %c0_2] : memref<512x256xbf16, #tpu.memory_space<vmem>>, vector<512x256xbf16>
    %cst = arith.constant dense<0.000000e+00> : vector<24x256xf32>
    %3 = tpu.matmul %1, %2, %cst {dimension_numbers = #tpu.dot_dimension_numbers<[1], [0], [0], [1], [0, 0, 1, 1], [], []>} : vector<24x512xbf16>, vector<512x256xbf16>, vector<24x256xf32> -> vector<24x256xf32>
    %c0_3 = arith.constant 0 : index
    %c0_4 = arith.constant 0 : index
    %4 = vector.load %arg3[%c0_3, %c0_4] : memref<1x256xf32, #tpu.memory_space<vmem>>, vector<1x256xf32>
    %5 = vector.broadcast %4 : vector<1x256xf32> to vector<24x256xf32>
    %6 = arith.addf %3, %5 : vector<24x256xf32>
    %7 = math.tanh %6 : vector<24x256xf32>
    %c0_5 = arith.constant 0 : index
    %c0_6 = arith.constant 0 : index
    %8 = vector.load %arg4[%c0_5, %c0_6] : memref<24x256xf32, #tpu.memory_space<vmem>>, vector<24x256xf32>
    tpu.vector_store %arg4[%c0_5, %c0_6], %7 {strides = array<i32>} : memref<24x256xf32, #tpu.memory_space<vmem>>, vector<24x256xf32>,
    return
  }
  func.func @transform_0(%arg0: i32) -> (i32, i32) {
    %c0_i32 = arith.constant 0 : i32
    %c0_i32_0 = arith.constant 0 : i32
    %c0_i32_1 = arith.constant 0 : i32
    return %c0_i32, %c0_i32_0 : i32, i32
  }
  func.func @transform_1(%arg0: i32) -> (i32, i32) {
    %c0_i32 = arith.constant 0 : i32
    %c0_i32_0 = arith.constant 0 : i32
    %c0_i32_1 = arith.constant 0 : i32
    return %c0_i32, %c0_i32_0 : i32, i32
  }
  func.func @transform_2(%arg0: i32) -> (i32, i32) {
    %c0_i32 = arith.constant 0 : i32
    %c0_i32_0 = arith.constant 0 : i32
    %c0_i32_1 = arith.constant 0 : i32
    return %c0_i32, %c0_i32_0 : i32, i32
  }
  func.func @transform_3(%arg0: i32) -> (i32, i32) {
    %c0_i32 = arith.constant 0 : i32
    %c0_i32_0 = arith.constant 0 : i32
    %c0_i32_1 = arith.constant 0 : i32
    return %c0_i32, %c0_i32_0 : i32, i32
  }
}

module attributes {stable_mosaic.version = 11 : i64} {
  func.func @_encoder_stack_kernel(%arg0: i32, %arg1: memref<16x256xf32, #tpu.memory_space<vmem>>, %arg2: memref<64x64xf32, #tpu.memory_space<vmem>>, %arg3: memref<1x256x768xbf16, #tpu.memory_space<vmem>>, %arg4: memref<1x1x768xf32, #tpu.memory_space<vmem>>, %arg5: memref<1x256x256xbf16, #tpu.memory_space<vmem>>, %arg6: memref<1x1x256xf32, #tpu.memory_space<vmem>>, %arg7: memref<1x1x256xf32, #tpu.memory_space<vmem>>, %arg8: memref<1x1x256xf32, #tpu.memory_space<vmem>>, %arg9: memref<1x256x1024xbf16, #tpu.memory_space<vmem>>, %arg10: memref<1x1x1024xf32, #tpu.memory_space<vmem>>, %arg11: memref<1x1024x256xbf16, #tpu.memory_space<vmem>>, %arg12: memref<1x1x256xf32, #tpu.memory_space<vmem>>, %arg13: memref<1x1x256xf32, #tpu.memory_space<vmem>>, %arg14: memref<1x1x256xf32, #tpu.memory_space<vmem>>, %arg15: memref<16x256xf32, #tpu.memory_space<vmem>>, %arg16: memref<16x768xf32, #tpu.memory_space<vmem>>, %arg17: memref<64x64xf32, #tpu.memory_space<vmem>>, %arg18: memref<64x64xf32, #tpu.memory_space<vmem>>, %arg19: memref<64x64xf32, #tpu.memory_space<vmem>>, %arg20: memref<64x64xf32, #tpu.memory_space<vmem>>) attributes {dimension_semantics = [#tpu.dimension_semantics<arbitrary>], iteration_bounds = array<i64: 1>, scalar_prefetch = 0 : i64, scratch_operands = 5 : i64, tpu.core_type = #tpu.core_type<tc>, window_params = [{pipeline_mode = #tpu.pipeline_mode<synchronous>, transform_indices = @transform_0, window_bounds = array<i64: 16, 256>}, {pipeline_mode = #tpu.pipeline_mode<synchronous>, transform_indices = @transform_1, window_bounds = array<i64: 64, 64>}, {transform_indices = @transform_2, window_bounds = array<i64: 1, 256, 768>}, {transform_indices = @transform_3, window_bounds = array<i64: 1, 1, 768>}, {transform_indices = @transform_4, window_bounds = array<i64: 1, 256, 256>}, {transform_indices = @transform_5, window_bounds = array<i64: 1, 1, 256>}, {transform_indices = @transform_6, window_bounds = array<i64: 1, 1, 256>}, {transform_indices = @transform_7, window_bounds = array<i64: 1, 1, 256>}, {transform_indices = @transform_8, window_bounds = array<i64: 1, 256, 1024>}, {transform_indices = @transform_9, window_bounds = array<i64: 1, 1, 1024>}, {transform_indices = @transform_10, window_bounds = array<i64: 1, 1024, 256>}, {transform_indices = @transform_11, window_bounds = array<i64: 1, 1, 256>}, {transform_indices = @transform_12, window_bounds = array<i64: 1, 1, 256>}, {transform_indices = @transform_13, window_bounds = array<i64: 1, 1, 256>}, {pipeline_mode = #tpu.pipeline_mode<synchronous>, transform_indices = @transform_14, window_bounds = array<i64: 16, 256>}]} {
    %c0_i32 = arith.constant 0 : i32
    %0 = arith.cmpi eq, %arg0, %c0_i32 : i32
    %1 = arith.extui %0 : i1 to i32
    %c0_i32_0 = arith.constant 0 : i32
    %2 = arith.cmpi ne, %1, %c0_i32_0 : i32
    scf.if %2 {
      %c0_125 = arith.constant 0 : index
      %c0_126 = arith.constant 0 : index
      %161 = vector.load %arg1[%c0_125, %c0_126] : memref<16x256xf32, #tpu.memory_space<vmem>>, vector<16x256xf32>
      %c0_127 = arith.constant 0 : index
      %c0_128 = arith.constant 0 : index
      %162 = vector.load %arg15[%c0_127, %c0_128] : memref<16x256xf32, #tpu.memory_space<vmem>>, vector<16x256xf32>
      tpu.vector_store %arg15[%c0_127, %c0_128], %161 {strides = array<i32>} : memref<16x256xf32, #tpu.memory_space<vmem>>, vector<16x256xf32>,
    } else {
    }
    %c0 = arith.constant 0 : index
    %c0_1 = arith.constant 0 : index
    %3 = vector.load %arg15[%c0, %c0_1] : memref<16x256xf32, #tpu.memory_space<vmem>>, vector<16x256xf32>
    %4 = arith.truncf %3 : vector<16x256xf32> to vector<16x256xbf16>
    %c0_2 = arith.constant 0 : index
    %c0_3 = arith.constant 0 : index
    %c0_4 = arith.constant 0 : index
    %5 = vector.load %arg3[%c0_2, %c0_3, %c0_4] : memref<1x256x768xbf16, #tpu.memory_space<vmem>>, vector<1x256x768xbf16>
    %6 = vector.shape_cast %5 : vector<1x256x768xbf16> to vector<256x768xbf16>
    %cst = arith.constant dense<0.000000e+00> : vector<16x768xf32>
    %7 = tpu.matmul %4, %6, %cst {dimension_numbers = #tpu.dot_dimension_numbers<[1], [0], [0], [1], [0, 0, 1, 1], [], []>} : vector<16x256xbf16>, vector<256x768xbf16>, vector<16x768xf32> -> vector<16x768xf32>
    %c0_5 = arith.constant 0 : index
    %c0_6 = arith.constant 0 : index
    %c0_7 = arith.constant 0 : index
    %8 = vector.load %arg4[%c0_5, %c0_6, %c0_7] : memref<1x1x768xf32, #tpu.memory_space<vmem>>, vector<1x1x768xf32>
    %9 = vector.shape_cast %8 : vector<1x1x768xf32> to vector<1x768xf32>
    %10 = vector.broadcast %9 : vector<1x768xf32> to vector<16x768xf32>
    %11 = arith.addf %7, %10 : vector<16x768xf32>
    %c0_8 = arith.constant 0 : index
    %c0_9 = arith.constant 0 : index
    %12 = vector.load %arg16[%c0_8, %c0_9] : memref<16x768xf32, #tpu.memory_space<vmem>>, vector<16x768xf32>
    tpu.vector_store %arg16[%c0_8, %c0_9], %11 {strides = array<i32>} : memref<16x768xf32, #tpu.memory_space<vmem>>, vector<16x768xf32>,
    %c0_10 = arith.constant 0 : index
    %c0_11 = arith.constant 0 : index
    %13 = vector.load %arg16[%c0_10, %c0_11] : memref<16x768xf32, #tpu.memory_space<vmem>>, vector<16x64xf32>
    %c0_12 = arith.constant 0 : index
    %c0_13 = arith.constant 0 : index
    %14 = vector.load %arg18[%c0_12, %c0_13] : memref<64x64xf32, #tpu.memory_space<vmem>>, vector<16x64xf32>
    tpu.vector_store %arg18[%c0_12, %c0_13], %13 {strides = array<i32>} : memref<64x64xf32, #tpu.memory_space<vmem>>, vector<16x64xf32>,
    %c0_14 = arith.constant 0 : index
    %c256 = arith.constant 256 : index
    %15 = vector.load %arg16[%c0_14, %c256] : memref<16x768xf32, #tpu.memory_space<vmem>>, vector<16x64xf32>
    %c0_15 = arith.constant 0 : index
    %c0_16 = arith.constant 0 : index
    %16 = vector.load %arg19[%c0_15, %c0_16] : memref<64x64xf32, #tpu.memory_space<vmem>>, vector<16x64xf32>
    tpu.vector_store %arg19[%c0_15, %c0_16], %15 {strides = array<i32>} : memref<64x64xf32, #tpu.memory_space<vmem>>, vector<16x64xf32>,
    %c0_17 = arith.constant 0 : index
    %c512 = arith.constant 512 : index
    %17 = vector.load %arg16[%c0_17, %c512] : memref<16x768xf32, #tpu.memory_space<vmem>>, vector<16x64xf32>
    %c0_18 = arith.constant 0 : index
    %c0_19 = arith.constant 0 : index
    %18 = vector.load %arg17[%c0_18, %c0_19] : memref<64x64xf32, #tpu.memory_space<vmem>>, vector<16x64xf32>
    tpu.vector_store %arg17[%c0_18, %c0_19], %17 {strides = array<i32>} : memref<64x64xf32, #tpu.memory_space<vmem>>, vector<16x64xf32>,
    %c0_20 = arith.constant 0 : index
    %c64 = arith.constant 64 : index
    %19 = vector.load %arg16[%c0_20, %c64] : memref<16x768xf32, #tpu.memory_space<vmem>>, vector<16x64xf32>
    %c16 = arith.constant 16 : index
    %c0_21 = arith.constant 0 : index
    %20 = vector.load %arg18[%c16, %c0_21] : memref<64x64xf32, #tpu.memory_space<vmem>>, vector<16x64xf32>
    tpu.vector_store %arg18[%c16, %c0_21], %19 {strides = array<i32>} : memref<64x64xf32, #tpu.memory_space<vmem>>, vector<16x64xf32>,
    %c0_22 = arith.constant 0 : index
    %c320 = arith.constant 320 : index
    %21 = vector.load %arg16[%c0_22, %c320] : memref<16x768xf32, #tpu.memory_space<vmem>>, vector<16x64xf32>
    %c16_23 = arith.constant 16 : index
    %c0_24 = arith.constant 0 : index
    %22 = vector.load %arg19[%c16_23, %c0_24] : memref<64x64xf32, #tpu.memory_space<vmem>>, vector<16x64xf32>
    tpu.vector_store %arg19[%c16_23, %c0_24], %21 {strides = array<i32>} : memref<64x64xf32, #tpu.memory_space<vmem>>, vector<16x64xf32>,
    %c0_25 = arith.constant 0 : index
    %c576 = arith.constant 576 : index
    %23 = vector.load %arg16[%c0_25, %c576] : memref<16x768xf32, #tpu.memory_space<vmem>>, vector<16x64xf32>
    %c16_26 = arith.constant 16 : index
    %c0_27 = arith.constant 0 : index
    %24 = vector.load %arg17[%c16_26, %c0_27] : memref<64x64xf32, #tpu.memory_space<vmem>>, vector<16x64xf32>
    tpu.vector_store %arg17[%c16_26, %c0_27], %23 {strides = array<i32>} : memref<64x64xf32, #tpu.memory_space<vmem>>, vector<16x64xf32>,
    %c0_28 = arith.constant 0 : index
    %c128 = arith.constant 128 : index
    %25 = vector.load %arg16[%c0_28, %c128] : memref<16x768xf32, #tpu.memory_space<vmem>>, vector<16x64xf32>
    %c32 = arith.constant 32 : index
    %c0_29 = arith.constant 0 : index
    %26 = vector.load %arg18[%c32, %c0_29] : memref<64x64xf32, #tpu.memory_space<vmem>>, vector<16x64xf32>
    tpu.vector_store %arg18[%c32, %c0_29], %25 {strides = array<i32>} : memref<64x64xf32, #tpu.memory_space<vmem>>, vector<16x64xf32>,
    %c0_30 = arith.constant 0 : index
    %c384 = arith.constant 384 : index
    %27 = vector.load %arg16[%c0_30, %c384] : memref<16x768xf32, #tpu.memory_space<vmem>>, vector<16x64xf32>
    %c32_31 = arith.constant 32 : index
    %c0_32 = arith.constant 0 : index
    %28 = vector.load %arg19[%c32_31, %c0_32] : memref<64x64xf32, #tpu.memory_space<vmem>>, vector<16x64xf32>
    tpu.vector_store %arg19[%c32_31, %c0_32], %27 {strides = array<i32>} : memref<64x64xf32, #tpu.memory_space<vmem>>, vector<16x64xf32>,
    %c0_33 = arith.constant 0 : index
    %c640 = arith.constant 640 : index
    %29 = vector.load %arg16[%c0_33, %c640] : memref<16x768xf32, #tpu.memory_space<vmem>>, vector<16x64xf32>
    %c32_34 = arith.constant 32 : index
    %c0_35 = arith.constant 0 : index
    %30 = vector.load %arg17[%c32_34, %c0_35] : memref<64x64xf32, #tpu.memory_space<vmem>>, vector<16x64xf32>
    tpu.vector_store %arg17[%c32_34, %c0_35], %29 {strides = array<i32>} : memref<64x64xf32, #tpu.memory_space<vmem>>, vector<16x64xf32>,
    %c0_36 = arith.constant 0 : index
    %c192 = arith.constant 192 : index
    %31 = vector.load %arg16[%c0_36, %c192] : memref<16x768xf32, #tpu.memory_space<vmem>>, vector<16x64xf32>
    %c48 = arith.constant 48 : index
    %c0_37 = arith.constant 0 : index
    %32 = vector.load %arg18[%c48, %c0_37] : memref<64x64xf32, #tpu.memory_space<vmem>>, vector<16x64xf32>
    tpu.vector_store %arg18[%c48, %c0_37], %31 {strides = array<i32>} : memref<64x64xf32, #tpu.memory_space<vmem>>, vector<16x64xf32>,
    %c0_38 = arith.constant 0 : index
    %c448 = arith.constant 448 : index
    %33 = vector.load %arg16[%c0_38, %c448] : memref<16x768xf32, #tpu.memory_space<vmem>>, vector<16x64xf32>
    %c48_39 = arith.constant 48 : index
    %c0_40 = arith.constant 0 : index
    %34 = vector.load %arg19[%c48_39, %c0_40] : memref<64x64xf32, #tpu.memory_space<vmem>>, vector<16x64xf32>
    tpu.vector_store %arg19[%c48_39, %c0_40], %33 {strides = array<i32>} : memref<64x64xf32, #tpu.memory_space<vmem>>, vector<16x64xf32>,
    %c0_41 = arith.constant 0 : index
    %c704 = arith.constant 704 : index
    %35 = vector.load %arg16[%c0_41, %c704] : memref<16x768xf32, #tpu.memory_space<vmem>>, vector<16x64xf32>
    %c48_42 = arith.constant 48 : index
    %c0_43 = arith.constant 0 : index
    %36 = vector.load %arg17[%c48_42, %c0_43] : memref<64x64xf32, #tpu.memory_space<vmem>>, vector<16x64xf32>
    tpu.vector_store %arg17[%c48_42, %c0_43], %35 {strides = array<i32>} : memref<64x64xf32, #tpu.memory_space<vmem>>, vector<16x64xf32>,
    %c0_44 = arith.constant 0 : index
    %c0_45 = arith.constant 0 : index
    %37 = vector.load %arg17[%c0_44, %c0_45] : memref<64x64xf32, #tpu.memory_space<vmem>>, vector<64x64xf32>
    %38 = arith.truncf %37 : vector<64x64xf32> to vector<64x64xbf16>
    %c0_46 = arith.constant 0 : index
    %c0_47 = arith.constant 0 : index
    %39 = vector.load %arg18[%c0_46, %c0_47] : memref<64x64xf32, #tpu.memory_space<vmem>>, vector<64x64xf32>
    %40 = arith.truncf %39 : vector<64x64xf32> to vector<64x64xbf16>
    %c0_48 = arith.constant 0 : index
    %c0_49 = arith.constant 0 : index
    %41 = vector.load %arg19[%c0_48, %c0_49] : memref<64x64xf32, #tpu.memory_space<vmem>>, vector<64x64xf32>
    %42 = arith.truncf %41 : vector<64x64xf32> to vector<64x64xbf16>
    %cst_50 = arith.constant dense<0.000000e+00> : vector<64x64xf32>
    %43 = tpu.matmul %38, %40, %cst_50 {dimension_numbers = #tpu.dot_dimension_numbers<[1], [1], [0], [0], [0, 0, 1, 0], [], []>} : vector<64x64xbf16>, vector<64x64xbf16>, vector<64x64xf32> -> vector<64x64xf32>
    %cst_51 = arith.constant 2.500000e-01 : f32
    %44 = vector.broadcast %cst_51 : f32 to vector<64x64xf32>
    %45 = arith.mulf %43, %44 : vector<64x64xf32>
    %c0_52 = arith.constant 0 : index
    %c0_53 = arith.constant 0 : index
    %46 = vector.load %arg2[%c0_52, %c0_53] : memref<64x64xf32, #tpu.memory_space<vmem>>, vector<64x64xf32>
    %47 = arith.addf %45, %46 : vector<64x64xf32>
    %cst_54 = arith.constant dense<0xFF800000> : vector<64xf32>
    %48 = vector.multi_reduction <maximumf>, %47, %cst_54 [1] : vector<64x64xf32> to vector<64xf32>
    %49 = vector.shape_cast %48 : vector<64xf32> to vector<64x1xf32>
    %50 = vector.broadcast %49 : vector<64x1xf32> to vector<64x64xf32>
    %51 = arith.subf %47, %50 : vector<64x64xf32>
    %52 = math.exp %51 : vector<64x64xf32>
    %cst_55 = arith.constant dense<0.000000e+00> : vector<64xf32>
    %53 = vector.multi_reduction <add>, %52, %cst_55 [1] : vector<64x64xf32> to vector<64xf32>
    %54 = vector.shape_cast %53 : vector<64xf32> to vector<64x1xf32>
    %55 = tpu.reciprocal %54 {approx = true} : vector<64x1xf32> -> vector<64x1xf32>
    %56 = vector.broadcast %55 : vector<64x1xf32> to vector<64x64xf32>
    %57 = arith.mulf %52, %56 : vector<64x64xf32>
    %58 = arith.truncf %57 : vector<64x64xf32> to vector<64x64xbf16>
    %cst_56 = arith.constant dense<0.000000e+00> : vector<64x64xf32>
    %59 = tpu.matmul %58, %42, %cst_56 {dimension_numbers = #tpu.dot_dimension_numbers<[1], [0], [0], [1], [0, 0, 1, 1], [], []>} : vector<64x64xbf16>, vector<64x64xbf16>, vector<64x64xf32> -> vector<64x64xf32>
    %c0_57 = arith.constant 0 : index
    %c0_58 = arith.constant 0 : index
    %60 = vector.load %arg20[%c0_57, %c0_58] : memref<64x64xf32, #tpu.memory_space<vmem>>, vector<64x64xf32>
    tpu.vector_store %arg20[%c0_57, %c0_58], %59 {strides = array<i32>} : memref<64x64xf32, #tpu.memory_space<vmem>>, vector<64x64xf32>,
    %c0_59 = arith.constant 0 : index
    %c0_60 = arith.constant 0 : index
    %c0_61 = arith.constant 0 : index
    %61 = vector.load %arg6[%c0_59, %c0_60, %c0_61] : memref<1x1x256xf32, #tpu.memory_space<vmem>>, vector<1x1x256xf32>
    %62 = vector.shape_cast %61 : vector<1x1x256xf32> to vector<1x256xf32>
    %c0_62 = arith.constant 0 : index
    %c0_63 = arith.constant 0 : index
    %63 = vector.load %arg20[%c0_62, %c0_63] : memref<64x64xf32, #tpu.memory_space<vmem>>, vector<16x64xf32>
    %64 = arith.truncf %63 : vector<16x64xf32> to vector<16x64xbf16>
    %c0_64 = arith.constant 0 : index
    %c0_65 = arith.constant 0 : index
    %c0_66 = arith.constant 0 : index
    %65 = vector.load %arg5[%c0_64, %c0_65, %c0_66] : memref<1x256x256xbf16, #tpu.memory_space<vmem>>, vector<1x64x256xbf16>
    %66 = vector.shape_cast %65 : vector<1x64x256xbf16> to vector<64x256xbf16>
    %cst_67 = arith.constant dense<0.000000e+00> : vector<16x256xf32>
    %67 = tpu.matmul %64, %66, %cst_67 {dimension_numbers = #tpu.dot_dimension_numbers<[1], [0], [0], [1], [0, 0, 1, 1], [], []>} : vector<16x64xbf16>, vector<64x256xbf16>, vector<16x256xf32> -> vector<16x256xf32>
    %68 = vector.broadcast %62 : vector<1x256xf32> to vector<16x256xf32>
    %69 = arith.addf %68, %67 : vector<16x256xf32>
    %c16_68 = arith.constant 16 : index
    %c0_69 = arith.constant 0 : index
    %70 = vector.load %arg20[%c16_68, %c0_69] : memref<64x64xf32, #tpu.memory_space<vmem>>, vector<16x64xf32>
    %71 = arith.truncf %70 : vector<16x64xf32> to vector<16x64xbf16>
    %c0_70 = arith.constant 0 : index
    %c64_71 = arith.constant 64 : index
    %c0_72 = arith.constant 0 : index
    %72 = vector.load %arg5[%c0_70, %c64_71, %c0_72] : memref<1x256x256xbf16, #tpu.memory_space<vmem>>, vector<1x64x256xbf16>
    %73 = vector.shape_cast %72 : vector<1x64x256xbf16> to vector<64x256xbf16>
    %cst_73 = arith.constant dense<0.000000e+00> : vector<16x256xf32>
    %74 = tpu.matmul %71, %73, %cst_73 {dimension_numbers = #tpu.dot_dimension_numbers<[1], [0], [0], [1], [0, 0, 1, 1], [], []>} : vector<16x64xbf16>, vector<64x256xbf16>, vector<16x256xf32> -> vector<16x256xf32>
    %75 = arith.addf %69, %74 : vector<16x256xf32>
    %c32_74 = arith.constant 32 : index
    %c0_75 = arith.constant 0 : index
    %76 = vector.load %arg20[%c32_74, %c0_75] : memref<64x64xf32, #tpu.memory_space<vmem>>, vector<16x64xf32>
    %77 = arith.truncf %76 : vector<16x64xf32> to vector<16x64xbf16>
    %c0_76 = arith.constant 0 : index
    %c128_77 = arith.constant 128 : index
    %c0_78 = arith.constant 0 : index
    %78 = vector.load %arg5[%c0_76, %c128_77, %c0_78] : memref<1x256x256xbf16, #tpu.memory_space<vmem>>, vector<1x64x256xbf16>
    %79 = vector.shape_cast %78 : vector<1x64x256xbf16> to vector<64x256xbf16>
    %cst_79 = arith.constant dense<0.000000e+00> : vector<16x256xf32>
    %80 = tpu.matmul %77, %79, %cst_79 {dimension_numbers = #tpu.dot_dimension_numbers<[1], [0], [0], [1], [0, 0, 1, 1], [], []>} : vector<16x64xbf16>, vector<64x256xbf16>, vector<16x256xf32> -> vector<16x256xf32>
    %81 = arith.addf %75, %80 : vector<16x256xf32>
    %c48_80 = arith.constant 48 : index
    %c0_81 = arith.constant 0 : index
    %82 = vector.load %arg20[%c48_80, %c0_81] : memref<64x64xf32, #tpu.memory_space<vmem>>, vector<16x64xf32>
    %83 = arith.truncf %82 : vector<16x64xf32> to vector<16x64xbf16>
    %c0_82 = arith.constant 0 : index
    %c192_83 = arith.constant 192 : index
    %c0_84 = arith.constant 0 : index
    %84 = vector.load %arg5[%c0_82, %c192_83, %c0_84] : memref<1x256x256xbf16, #tpu.memory_space<vmem>>, vector<1x64x256xbf16>
    %85 = vector.shape_cast %84 : vector<1x64x256xbf16> to vector<64x256xbf16>
    %cst_85 = arith.constant dense<0.000000e+00> : vector<16x256xf32>
    %86 = tpu.matmul %83, %85, %cst_85 {dimension_numbers = #tpu.dot_dimension_numbers<[1], [0], [0], [1], [0, 0, 1, 1], [], []>} : vector<16x64xbf16>, vector<64x256xbf16>, vector<16x256xf32> -> vector<16x256xf32>
    %87 = arith.addf %81, %86 : vector<16x256xf32>
    %88 = arith.addf %3, %87 : vector<16x256xf32>
    %cst_86 = arith.constant dense<0.000000e+00> : vector<16xf32>
    %89 = vector.multi_reduction <add>, %88, %cst_86 [1] : vector<16x256xf32> to vector<16xf32>
    %90 = vector.shape_cast %89 : vector<16xf32> to vector<16x1xf32>
    %cst_87 = arith.constant 2.560000e+02 : f32
    %91 = vector.broadcast %cst_87 : f32 to vector<16x1xf32>
    %92 = arith.divf %90, %91 : vector<16x1xf32>
    %93 = vector.broadcast %92 : vector<16x1xf32> to vector<16x256xf32>
    %94 = arith.subf %88, %93 : vector<16x256xf32>
    %95 = arith.mulf %94, %94 : vector<16x256xf32>
    %cst_88 = arith.constant dense<0.000000e+00> : vector<16xf32>
    %96 = vector.multi_reduction <add>, %95, %cst_88 [1] : vector<16x256xf32> to vector<16xf32>
    %97 = vector.shape_cast %96 : vector<16xf32> to vector<16x1xf32>
    %cst_89 = arith.constant 2.560000e+02 : f32
    %98 = vector.broadcast %cst_89 : f32 to vector<16x1xf32>
    %99 = arith.divf %97, %98 : vector<16x1xf32>
    %100 = vector.broadcast %92 : vector<16x1xf32> to vector<16x256xf32>
    %101 = arith.subf %88, %100 : vector<16x256xf32>
    %cst_90 = arith.constant 9.99999974E-6 : f32
    %102 = vector.broadcast %cst_90 : f32 to vector<16x1xf32>
    %103 = arith.addf %99, %102 : vector<16x1xf32>
    %104 = math.rsqrt %103 : vector<16x1xf32>
    %105 = vector.broadcast %104 : vector<16x1xf32> to vector<16x256xf32>
    %106 = arith.mulf %101, %105 : vector<16x256xf32>
    %c0_91 = arith.constant 0 : index
    %c0_92 = arith.constant 0 : index
    %c0_93 = arith.constant 0 : index
    %107 = vector.load %arg7[%c0_91, %c0_92, %c0_93] : memref<1x1x256xf32, #tpu.memory_space<vmem>>, vector<1x1x256xf32>
    %108 = vector.shape_cast %107 : vector<1x1x256xf32> to vector<1x256xf32>
    %109 = vector.broadcast %108 : vector<1x256xf32> to vector<16x256xf32>
    %110 = arith.mulf %106, %109 : vector<16x256xf32>
    %c0_94 = arith.constant 0 : index
    %c0_95 = arith.constant 0 : index
    %c0_96 = arith.constant 0 : index
    %111 = vector.load %arg8[%c0_94, %c0_95, %c0_96] : memref<1x1x256xf32, #tpu.memory_space<vmem>>, vector<1x1x256xf32>
    %112 = vector.shape_cast %111 : vector<1x1x256xf32> to vector<1x256xf32>
    %113 = vector.broadcast %112 : vector<1x256xf32> to vector<16x256xf32>
    %114 = arith.addf %110, %113 : vector<16x256xf32>
    %115 = arith.truncf %114 : vector<16x256xf32> to vector<16x256xbf16>
    %c0_97 = arith.constant 0 : index
    %c0_98 = arith.constant 0 : index
    %c0_99 = arith.constant 0 : index
    %116 = vector.load %arg9[%c0_97, %c0_98, %c0_99] : memref<1x256x1024xbf16, #tpu.memory_space<vmem>>, vector<1x256x1024xbf16>
    %117 = vector.shape_cast %116 : vector<1x256x1024xbf16> to vector<256x1024xbf16>
    %cst_100 = arith.constant dense<0.000000e+00> : vector<16x1024xf32>
    %118 = tpu.matmul %115, %117, %cst_100 {dimension_numbers = #tpu.dot_dimension_numbers<[1], [0], [0], [1], [0, 0, 1, 1], [], []>} : vector<16x256xbf16>, vector<256x1024xbf16>, vector<16x1024xf32> -> vector<16x1024xf32>
    %c0_101 = arith.constant 0 : index
    %c0_102 = arith.constant 0 : index
    %c0_103 = arith.constant 0 : index
    %119 = vector.load %arg10[%c0_101, %c0_102, %c0_103] : memref<1x1x1024xf32, #tpu.memory_space<vmem>>, vector<1x1x1024xf32>
    %120 = vector.shape_cast %119 : vector<1x1x1024xf32> to vector<1x1024xf32>
    %121 = vector.broadcast %120 : vector<1x1024xf32> to vector<16x1024xf32>
    %122 = arith.addf %118, %121 : vector<16x1024xf32>
    %cst_104 = arith.constant 0.000000e+00 : f32
    %123 = vector.broadcast %cst_104 : f32 to vector<16x1024xf32>
    %124 = arith.maximumf %122, %123 : vector<16x1024xf32>
    %125 = arith.truncf %124 : vector<16x1024xf32> to vector<16x1024xbf16>
    %c0_105 = arith.constant 0 : index
    %c0_106 = arith.constant 0 : index
    %c0_107 = arith.constant 0 : index
    %126 = vector.load %arg11[%c0_105, %c0_106, %c0_107] : memref<1x1024x256xbf16, #tpu.memory_space<vmem>>, vector<1x1024x256xbf16>
    %127 = vector.shape_cast %126 : vector<1x1024x256xbf16> to vector<1024x256xbf16>
    %cst_108 = arith.constant dense<0.000000e+00> : vector<16x256xf32>
    %128 = tpu.matmul %125, %127, %cst_108 {dimension_numbers = #tpu.dot_dimension_numbers<[1], [0], [0], [1], [0, 0, 1, 1], [], []>} : vector<16x1024xbf16>, vector<1024x256xbf16>, vector<16x256xf32> -> vector<16x256xf32>
    %c0_109 = arith.constant 0 : index
    %c0_110 = arith.constant 0 : index
    %c0_111 = arith.constant 0 : index
    %129 = vector.load %arg12[%c0_109, %c0_110, %c0_111] : memref<1x1x256xf32, #tpu.memory_space<vmem>>, vector<1x1x256xf32>
    %130 = vector.shape_cast %129 : vector<1x1x256xf32> to vector<1x256xf32>
    %131 = vector.broadcast %130 : vector<1x256xf32> to vector<16x256xf32>
    %132 = arith.addf %128, %131 : vector<16x256xf32>
    %133 = arith.addf %114, %132 : vector<16x256xf32>
    %cst_112 = arith.constant dense<0.000000e+00> : vector<16xf32>
    %134 = vector.multi_reduction <add>, %133, %cst_112 [1] : vector<16x256xf32> to vector<16xf32>
    %135 = vector.shape_cast %134 : vector<16xf32> to vector<16x1xf32>
    %cst_113 = arith.constant 2.560000e+02 : f32
    %136 = vector.broadcast %cst_113 : f32 to vector<16x1xf32>
    %137 = arith.divf %135, %136 : vector<16x1xf32>
    %138 = vector.broadcast %137 : vector<16x1xf32> to vector<16x256xf32>
    %139 = arith.subf %133, %138 : vector<16x256xf32>
    %140 = arith.mulf %139, %139 : vector<16x256xf32>
    %cst_114 = arith.constant dense<0.000000e+00> : vector<16xf32>
    %141 = vector.multi_reduction <add>, %140, %cst_114 [1] : vector<16x256xf32> to vector<16xf32>
    %142 = vector.shape_cast %141 : vector<16xf32> to vector<16x1xf32>
    %cst_115 = arith.constant 2.560000e+02 : f32
    %143 = vector.broadcast %cst_115 : f32 to vector<16x1xf32>
    %144 = arith.divf %142, %143 : vector<16x1xf32>
    %145 = vector.broadcast %137 : vector<16x1xf32> to vector<16x256xf32>
    %146 = arith.subf %133, %145 : vector<16x256xf32>
    %cst_116 = arith.constant 9.99999974E-6 : f32
    %147 = vector.broadcast %cst_116 : f32 to vector<16x1xf32>
    %148 = arith.addf %144, %147 : vector<16x1xf32>
    %149 = math.rsqrt %148 : vector<16x1xf32>
    %150 = vector.broadcast %149 : vector<16x1xf32> to vector<16x256xf32>
    %151 = arith.mulf %146, %150 : vector<16x256xf32>
    %c0_117 = arith.constant 0 : index
    %c0_118 = arith.constant 0 : index
    %c0_119 = arith.constant 0 : index
    %152 = vector.load %arg13[%c0_117, %c0_118, %c0_119] : memref<1x1x256xf32, #tpu.memory_space<vmem>>, vector<1x1x256xf32>
    %153 = vector.shape_cast %152 : vector<1x1x256xf32> to vector<1x256xf32>
    %154 = vector.broadcast %153 : vector<1x256xf32> to vector<16x256xf32>
    %155 = arith.mulf %151, %154 : vector<16x256xf32>
    %c0_120 = arith.constant 0 : index
    %c0_121 = arith.constant 0 : index
    %c0_122 = arith.constant 0 : index
    %156 = vector.load %arg14[%c0_120, %c0_121, %c0_122] : memref<1x1x256xf32, #tpu.memory_space<vmem>>, vector<1x1x256xf32>
    %157 = vector.shape_cast %156 : vector<1x1x256xf32> to vector<1x256xf32>
    %158 = vector.broadcast %157 : vector<1x256xf32> to vector<16x256xf32>
    %159 = arith.addf %155, %158 : vector<16x256xf32>
    %c0_123 = arith.constant 0 : index
    %c0_124 = arith.constant 0 : index
    %160 = vector.load %arg15[%c0_123, %c0_124] : memref<16x256xf32, #tpu.memory_space<vmem>>, vector<16x256xf32>
    tpu.vector_store %arg15[%c0_123, %c0_124], %159 {strides = array<i32>} : memref<16x256xf32, #tpu.memory_space<vmem>>, vector<16x256xf32>,
    return
  }
  func.func @transform_0(%arg0: i32) -> (i32, i32) {
    %c0_i32 = arith.constant 0 : i32
    %c0_i32_0 = arith.constant 0 : i32
    %c0_i32_1 = arith.constant 0 : i32
    return %c0_i32, %c0_i32_0 : i32, i32
  }
  func.func @transform_1(%arg0: i32) -> (i32, i32) {
    %c0_i32 = arith.constant 0 : i32
    %c0_i32_0 = arith.constant 0 : i32
    %c0_i32_1 = arith.constant 0 : i32
    return %c0_i32, %c0_i32_0 : i32, i32
  }
  func.func @transform_2(%arg0: i32) -> (i32, i32, i32) {
    %c0_i32 = arith.constant 0 : i32
    %c0_i32_0 = arith.constant 0 : i32
    %c0_i32_1 = arith.constant 0 : i32
    return %arg0, %c0_i32, %c0_i32_0 : i32, i32, i32
  }
  func.func @transform_3(%arg0: i32) -> (i32, i32, i32) {
    %c0_i32 = arith.constant 0 : i32
    %c0_i32_0 = arith.constant 0 : i32
    %c0_i32_1 = arith.constant 0 : i32
    return %arg0, %c0_i32, %c0_i32_0 : i32, i32, i32
  }
  func.func @transform_4(%arg0: i32) -> (i32, i32, i32) {
    %c0_i32 = arith.constant 0 : i32
    %c0_i32_0 = arith.constant 0 : i32
    %c0_i32_1 = arith.constant 0 : i32
    return %arg0, %c0_i32, %c0_i32_0 : i32, i32, i32
  }
  func.func @transform_5(%arg0: i32) -> (i32, i32, i32) {
    %c0_i32 = arith.constant 0 : i32
    %c0_i32_0 = arith.constant 0 : i32
    %c0_i32_1 = arith.constant 0 : i32
    return %arg0, %c0_i32, %c0_i32_0 : i32, i32, i32
  }
  func.func @transform_6(%arg0: i32) -> (i32, i32, i32) {
    %c0_i32 = arith.constant 0 : i32
    %c0_i32_0 = arith.constant 0 : i32
    %c0_i32_1 = arith.constant 0 : i32
    return %arg0, %c0_i32, %c0_i32_0 : i32, i32, i32
  }
  func.func @transform_7(%arg0: i32) -> (i32, i32, i32) {
    %c0_i32 = arith.constant 0 : i32
    %c0_i32_0 = arith.constant 0 : i32
    %c0_i32_1 = arith.constant 0 : i32
    return %arg0, %c0_i32, %c0_i32_0 : i32, i32, i32
  }
  func.func @transform_8(%arg0: i32) -> (i32, i32, i32) {
    %c0_i32 = arith.constant 0 : i32
    %c0_i32_0 = arith.constant 0 : i32
    %c0_i32_1 = arith.constant 0 : i32
    return %arg0, %c0_i32, %c0_i32_0 : i32, i32, i32
  }
  func.func @transform_9(%arg0: i32) -> (i32, i32, i32) {
    %c0_i32 = arith.constant 0 : i32
    %c0_i32_0 = arith.constant 0 : i32
    %c0_i32_1 = arith.constant 0 : i32
    return %arg0, %c0_i32, %c0_i32_0 : i32, i32, i32
  }
  func.func @transform_10(%arg0: i32) -> (i32, i32, i32) {
    %c0_i32 = arith.constant 0 : i32
    %c0_i32_0 = arith.constant 0 : i32
    %c0_i32_1 = arith.constant 0 : i32
    return %arg0, %c0_i32, %c0_i32_0 : i32, i32, i32
  }
  func.func @transform_11(%arg0: i32) -> (i32, i32, i32) {
    %c0_i32 = arith.constant 0 : i32
    %c0_i32_0 = arith.constant 0 : i32
    %c0_i32_1 = arith.constant 0 : i32
    return %arg0, %c0_i32, %c0_i32_0 : i32, i32, i32
  }
  func.func @transform_12(%arg0: i32) -> (i32, i32, i32) {
    %c0_i32 = arith.constant 0 : i32
    %c0_i32_0 = arith.constant 0 : i32
    %c0_i32_1 = arith.constant 0 : i32
    return %arg0, %c0_i32, %c0_i32_0 : i32, i32, i32
  }
  func.func @transform_13(%arg0: i32) -> (i32, i32, i32) {
    %c0_i32 = arith.constant 0 : i32
    %c0_i32_0 = arith.constant 0 : i32
    %c0_i32_1 = arith.constant 0 : i32
    return %arg0, %c0_i32, %c0_i32_0 : i32, i32, i32
  }
  func.func @transform_14(%arg0: i32) -> (i32, i32) {
    %c0_i32 = arith.constant 0 : i32
    %c0_i32_0 = arith.constant 0 : i32
    %c0_i32_1 = arith.constant 0 : i32
    return %c0_i32, %c0_i32_0 : i32, i32
  }
}

</mosaic_0001>

<bundles_post_ra>
// kernel: transformer_time_forward.2
= control target key start
LH: loop header
LB: loop body
LE: loop exit
PB: predicated region body
PF: predicated region fallthrough
CT: control target
= control target key end

     0   :  { %8 = vsyncpa [#allocation3], 0  ;;  %s962_s15 = smov [#allocation2]   ;;  %s963_s17 = smov 128   ;;  %s1073_s0 = inlined_call_operand.vmem [shape: f32[24,512], index: 0, kind: input, shape index: {}]   ;;  %s1074_s1 = inlined_call_operand.hbm [shape: bf16[512,256], index: 1, kind: input, shape index: {}]   ;;  %s1075_s2 = inlined_call_operand.vmem [shape: f32[1,256], index: 2, kind: input, shape index: {}]   ;;  %s1076_s3 = inlined_call_operand.vmem [shape: f32[24,256], index: 3, kind: output, shape index: {}]  }
   0x1   :  { %s15_s14 = sshll.u32 %s1074_s1, 4  ;;  %s17_s16 = sshll.u32 %s962_s15, 4  ;;  %s16_s14 = int_to_ptr.hbm [resolvable:$true] %s15_s14  ;;  %s18_s16 = int_to_ptr.vmem [resolvable:$true] %s17_s16 }
   0x2   :  { %s964_s18 = smov 8  }
   0x3   :  { %23 = dma.hbm_to_vmem [thread:$0]  %s16_s14, 8192, %s18_s16, [#allocation3], %s963_s17, %s963_s17, %s964_s18  }
   0x4   :  { %960 = dma.done.wait [#allocation3], 8192  }
   0x5   :  { %961 = vsyncadd [#allocation3], 4294959104  ;;  %v659_v0 = vld [vmem:[#allocation2 + $0x70] sm:$0xf]  ;;  %v872_v1 = vld [vmem:[#allocation2 + $0x74] sm:$0xf0] }
   0x6   :  { %v723_v2 = vld [vmem:[#allocation2 + $0xf0] sm:$0xf]  ;;  %v660_v3 = vor.u32 %v872_v1, %v659_v0  ;;  %v888_v4 = vld [vmem:[#allocation2 + $0xf4] sm:$0xf0]  ;;  %v651_v11 = vld [vmem:[#allocation2 + $0x60] sm:$0xf] }
   0x7   :  { %v787_v5 = vld [vmem:[#allocation2 + $0x170] sm:$0xf]  ;;  %v904_v6 = vld [vmem:[#allocation2 + $0x174] sm:$0xf0]  ;;  %v724_v7 = vor.u32 %v888_v4, %v723_v2  ;;  %v870_v13 = vld [vmem:[#allocation2 + $0x64] sm:$0xf0] }
   0x8   :  { %v788_v8 = vor.u32 %v904_v6, %v787_v5  ;;  %v851_v9 = vld [vmem:[#allocation2 + $0x1f0] sm:$0xf]  ;;  %v920_v10 = vld [vmem:[#allocation2 + $0x1f4] sm:$0xf0]  ;;  %440 = vmatpush.bf16.msra.mxu0 %v660_v3  ;;  %v715_v14 = vld [vmem:[#allocation2 + $0xe0] sm:$0xf]  ;;  %v652_v16 = vor.u32 %v870_v13, %v651_v11 }
   0x9   :  { %v852_v12 = vor.u32 %v920_v10, %v851_v9  ;;  %v886_v15 = vld [vmem:[#allocation2 + $0xe4] sm:$0xf0]  ;;  %458 = vmatpush.bf16.msra.mxu1 %v724_v7  ;;  %v779_v18 = vld [vmem:[#allocation2 + $0x160] sm:$0xf]  ;;  %v643_v23 = vld [vmem:[#allocation2 + $0x50] sm:$0xf] }
   0xa   :  { %476 = vmatpush.bf16.msra.mxu2 %v788_v8  ;;  %v716_v17 = vor.u32 %v886_v15, %v715_v14  ;;  %v902_v19 = vld [vmem:[#allocation2 + $0x164] sm:$0xf0]  ;;  %v843_v20 = vld [vmem:[#allocation2 + $0x1e0] sm:$0xf]  ;;  %v868_v24 = vld [vmem:[#allocation2 + $0x54] sm:$0xf0] }
   0xb   :  { %494 = vmatpush.bf16.msra.mxu3 %v852_v12  ;;  %v780_v21 = vor.u32 %v902_v19, %v779_v18  ;;  %v918_v22 = vld [vmem:[#allocation2 + $0x1e4] sm:$0xf0]  ;;  %v707_v26 = vld [vmem:[#allocation2 + $0xd0] sm:$0xf]  ;;  %v884_v27 = vld [vmem:[#allocation2 + $0xd4] sm:$0xf0]  ;;  %v644_v29 = vor.u32 %v868_v24, %v643_v23 }
   0xc   :  { %v844_v25 = vor.u32 %v918_v22, %v843_v20  ;;  %v771_v28 = vld [vmem:[#allocation2 + $0x150] sm:$0xf]  ;;  %441 = vmatpush.bf16.msra.mxu0 %v652_v16  ;;  %v900_v30 = vld [vmem:[#allocation2 + $0x154] sm:$0xf0]  ;;  %v708_v33 = vor.u32 %v884_v27, %v707_v26  ;;  %v635_v35 = vld [vmem:[#allocation2 + $0x40] sm:$0xf] }
   0xd   :  { %v835_v31 = vld [vmem:[#allocation2 + $0x1d0] sm:$0xf]  ;;  %v916_v32 = vld [vmem:[#allocation2 + $0x1d4] sm:$0xf0]  ;;  %459 = vmatpush.bf16.msra.mxu1 %v716_v17  ;;  %v772_v34 = vor.u32 %v900_v30, %v771_v28  ;;  %v866_v36 = vld [vmem:[#allocation2 + $0x44] sm:$0xf0] }
   0xe   :  { %477 = vmatpush.bf16.msra.mxu2 %v780_v21  ;;  %v699_v37 = vld [vmem:[#allocation2 + $0xc0] sm:$0xf]  ;;  %v836_v38 = vor.u32 %v916_v32, %v835_v31  ;;  %v882_v39 = vld [vmem:[#allocation2 + $0xc4] sm:$0xf0]  ;;  %v636_v44 = vor.u32 %v866_v36, %v635_v35  ;;  %v627_v47 = vld [vmem:[#allocation2 + $0x30] sm:$0xf] }
   0xf   :  { %495 = vmatpush.bf16.msra.mxu3 %v844_v25  ;;  %v763_v40 = vld [vmem:[#allocation2 + $0x140] sm:$0xf]  ;;  %v898_v41 = vld [vmem:[#allocation2 + $0x144] sm:$0xf0]  ;;  %v700_v45 = vor.u32 %v882_v39, %v699_v37  ;;  %v864_v48 = vld [vmem:[#allocation2 + $0x34] sm:$0xf0] }
  0x10   :  { %v827_v42 = vld [vmem:[#allocation2 + $0x1c0] sm:$0xf]  ;;  %v914_v43 = vld [vmem:[#allocation2 + $0x1c4] sm:$0xf0]  ;;  %442 = vmatpush.bf16.msra.mxu0 %v644_v29  ;;  %v764_v46 = vor.u32 %v898_v41, %v763_v40  ;;  %v691_v49 = vld [vmem:[#allocation2 + $0xb0] sm:$0xf]  ;;  %v628_v56 = vor.u32 %v864_v48, %v627_v47 }
  0x11   :  { %460 = vmatpush.bf16.msra.mxu1 %v708_v33  ;;  %v828_v50 = vor.u32 %v914_v43, %v827_v42  ;;  %v880_v51 = vld [vmem:[#allocation2 + $0xb4] sm:$0xf0]  ;;  %v755_v52 = vld [vmem:[#allocation2 + $0x130] sm:$0xf]  ;;  %v619_v59 = vld [vmem:[#allocation2 + $0x20] sm:$0xf] }
  0x12   :  { %478 = vmatpush.bf16.msra.mxu2 %v772_v34  ;;  %v896_v53 = vld [vmem:[#allocation2 + $0x134] sm:$0xf0]  ;;  %v819_v54 = vld [vmem:[#allocation2 + $0x1b0] sm:$0xf]  ;;  %v692_v57 = vor.u32 %v880_v51, %v691_v49  ;;  %v862_v60 = vld [vmem:[#allocation2 + $0x24] sm:$0xf0] }
  0x13   :  { %496 = vmatpush.bf16.msra.mxu3 %v836_v38  ;;  %v912_v55 = vld [vmem:[#allocation2 + $0x1b4] sm:$0xf0]  ;;  %v756_v58 = vor.u32 %v896_v53, %v755_v52  ;;  %v683_v61 = vld [vmem:[#allocation2 + $0xa0] sm:$0xf]  ;;  %v878_v63 = vld [vmem:[#allocation2 + $0xa4] sm:$0xf0]  ;;  %v620_v4 = vor.u32 %v862_v60, %v619_v59 }
  0x14   :  { %443 = vmatpush.bf16.msra.mxu0 %v636_v44  ;;  %v820_v62 = vor.u32 %v912_v55, %v819_v54  ;;  %v747_v0 = vld [vmem:[#allocation2 + $0x120] sm:$0xf]  ;;  %v894_v1 = vld [vmem:[#allocation2 + $0x124] sm:$0xf0]  ;;  %v684_v5 = vor.u32 %v878_v63, %v683_v61  ;;  %v611_v7 = vld [vmem:[#allocation2 + $0x10] sm:$0xf] }
  0x15   :  { %461 = vmatpush.bf16.msra.mxu1 %v700_v45  ;;  %v811_v2 = vld [vmem:[#allocation2 + $0x1a0] sm:$0xf]  ;;  %v910_v3 = vld [vmem:[#allocation2 + $0x1a4] sm:$0xf0]  ;;  %v748_v6 = vor.u32 %v894_v1, %v747_v0  ;;  %v860_v8 = vld [vmem:[#allocation2 + $0x14] sm:$0xf0] }
  0x16   :  { %479 = vmatpush.bf16.msra.mxu2 %v764_v46  ;;  %v675_v9 = vld [vmem:[#allocation2 + $0x90] sm:$0xf]  ;;  %v812_v10 = vor.u32 %v910_v3, %v811_v2  ;;  %v876_v11 = vld [vmem:[#allocation2 + $0x94] sm:$0xf0]  ;;  %v603_v16 = vld [vmem:[#allocation2] sm:$0xf]  ;;  %v612_v17 = vor.u32 %v860_v8, %v611_v7 }
  0x17   :  { %497 = vmatpush.bf16.msra.mxu3 %v828_v50  ;;  %v739_v12 = vld [vmem:[#allocation2 + $0x110] sm:$0xf]  ;;  %v892_v13 = vld [vmem:[#allocation2 + $0x114] sm:$0xf0]  ;;  %v858_v18 = vld [vmem:[#allocation2 + $0x4] sm:$0xf0]  ;;  %v676_v21 = vor.u32 %v876_v11, %v675_v9 }
  0x18   :  { %444 = vmatpush.bf16.msra.mxu0 %v628_v56  ;;  %v803_v14 = vld [vmem:[#allocation2 + $0x190] sm:$0xf]  ;;  %v908_v15 = vld [vmem:[#allocation2 + $0x194] sm:$0xf0]  ;;  %v667_v19 = vld [vmem:[#allocation2 + $0x80] sm:$0xf]  ;;  %v740_v22 = vor.u32 %v892_v13, %v739_v12  ;;  %v604_v34 = vor.u32 %v858_v18, %v603_v16 }
  0x19   :  { %462 = vmatpush.bf16.msra.mxu1 %v692_v57  ;;  %v874_v20 = vld [vmem:[#allocation2 + $0x84] sm:$0xf0]  ;;  %v731_v23 = vld [vmem:[#allocation2 + $0x100] sm:$0xf]  ;;  %v804_v26 = vor.u32 %v908_v15, %v803_v14  ;;  %v903_v32 = vld [vmem:[#allocation2 + $0x174] sm:$0xf] }
  0x1a   :  { %480 = vmatpush.bf16.msra.mxu2 %v756_v58  ;;  %v890_v24 = vld [vmem:[#allocation2 + $0x104] sm:$0xf0]  ;;  %v795_v25 = vld [vmem:[#allocation2 + $0x180] sm:$0xf]  ;;  %v789_v33 = vld [vmem:[#allocation2 + $0x178] sm:$0xf0]  ;;  %v668_v38 = vor.u32 %v874_v20, %v667_v19 }
  0x1b   :  { %498 = vmatpush.bf16.msra.mxu3 %v820_v62  ;;  %v906_v27 = vld [vmem:[#allocation2 + $0x184] sm:$0xf0]  ;;  %v30_v28 = vld [vmem:[%s1073_s0] sm:$0xff]  ;;  %v32_v35 = vld [vmem:[%s1073_s0 + $0x10] sm:$0xff]  ;;  %v732_v39 = vor.u32 %v890_v24, %v731_v23  ;;  %v792_v44 = vor.u32 %v903_v32, %v789_v33 }
  0x1c   :  { %445 = vmatpush.bf16.msra.mxu0 %v620_v4  ;;  %v34_v29 = vld [vmem:[%s1073_s0 + $0x20] sm:$0xff]  ;;  %v31_v30 = vld [vmem:[%s1073_s0 + $0x8] sm:$0xff]  ;;  %v887_v36 = vld [vmem:[#allocation2 + $0xf4] sm:$0xf]  ;;  %v796_v43 = vor.u32 %v906_v27, %v795_v25 }
  0x1d   :  { %463 = vmatpush.bf16.msra.mxu1 %v684_v5  ;;  %v35_v31 = vld [vmem:[%s1073_s0 + $0x28] sm:$0xff]  ;;  %v725_v37 = vld [vmem:[#allocation2 + $0xf8] sm:$0xf0]  ;;  %v36_v40 = vld [vmem:[%s1073_s0 + $0x30] sm:$0xff]  ;;  %v1012_v48 = vpack.c.bf16 %v34_v29, %v30_v28 }
  0x1e   :  { %481 = vmatpush.bf16.msra.mxu2 %v748_v6  ;;  %v33_v41 = vld [vmem:[%s1073_s0 + $0x18] sm:$0xff]  ;;  %v871_v45 = vld [vmem:[#allocation2 + $0x74] sm:$0xf]  ;;  %v728_v49 = vor.u32 %v887_v36, %v725_v37  ;;  %v901_v51 = vld [vmem:[#allocation2 + $0x164] sm:$0xf]  ;;  %v1014_v53 = vpack.c.bf16 %v35_v31, %v31_v30  ;;  %v1016_v54 = vpack.c.bf16 %v36_v40, %v32_v35 }
  0x1f   :  { %499 = vmatpush.bf16.msra.mxu3 %v812_v10  ;;  %v37_v42 = vld [vmem:[%s1073_s0 + $0x38] sm:$0xff]  ;;  %v919_v47 = vld [vmem:[#allocation2 + $0x1f4] sm:$0xf]  ;;  %v781_v52 = vld [vmem:[#allocation2 + $0x168] sm:$0xf0] }
  0x20   :  { %446 = vmatpush.bf16.msra.mxu0 %v612_v17  ;;  %v661_v46 = vld [vmem:[#allocation2 + $0x78] sm:$0xf0]  ;;  %v885_v55 = vld [vmem:[#allocation2 + $0xe4] sm:$0xf]  ;;  %v717_v56 = vld [vmem:[#allocation2 + $0xe8] sm:$0xf0]  ;;  %v1018_v57 = vpack.c.bf16 %v37_v42, %v33_v41  ;;  %v784_v60 = vor.u32 %v901_v51, %v781_v52 }
  0x21   :  { %464 = vmatpush.bf16.msra.mxu1 %v676_v21  ;;  %v853_v50 = vld [vmem:[#allocation2 + $0x1f8] sm:$0xf0]  ;;  %v664_v58 = vor.u32 %v871_v45, %v661_v46  ;;  %v869_v61 = vld [vmem:[#allocation2 + $0x64] sm:$0xf]  ;;  %v653_v62 = vld [vmem:[#allocation2 + $0x68] sm:$0xf0]  ;;  %v720_v0 = vor.u32 %v885_v55, %v717_v56 }
  0x22   :  { %482 = vmatpush.bf16.msra.mxu2 %v740_v22  ;;  %v856_v59 = vor.u32 %v919_v47, %v853_v50  ;;  %v917_v63 = vld [vmem:[#allocation2 + $0x1e4] sm:$0xf]  ;;  %v845_v1 = vld [vmem:[#allocation2 + $0x1e8] sm:$0xf0]  ;;  %v899_v2 = vld [vmem:[#allocation2 + $0x154] sm:$0xf]  ;;  %v656_v6 = vor.u32 %v869_v61, %v653_v62 }
  0x23   :  { %500 = vmatpush.bf16.msra.mxu3 %v804_v26  ;;  %v773_v3 = vld [vmem:[#allocation2 + $0x158] sm:$0xf0]  ;;  %v883_v4 = vld [vmem:[#allocation2 + $0xd4] sm:$0xf]  ;;  %v848_v7 = vor.u32 %v917_v63, %v845_v1  ;;  %v897_v14 = vld [vmem:[#allocation2 + $0x144] sm:$0xf] }
  0x24   :  { %447 = vmatpush.bf16.msra.mxu0 %v604_v34  ;;  %v709_v5 = vld [vmem:[#allocation2 + $0xd8] sm:$0xf0]  ;;  %v776_v8 = vor.u32 %v899_v2, %v773_v3  ;;  %v867_v9 = vld [vmem:[#allocation2 + $0x54] sm:$0xf]  ;;  %v765_v15 = vld [vmem:[#allocation2 + $0x148] sm:$0xf0] }
  0x25   :  { %465 = vmatpush.bf16.msra.mxu1 %v668_v38  ;;  %v645_v10 = vld [vmem:[#allocation2 + $0x58] sm:$0xf0]  ;;  %v915_v11 = vld [vmem:[#allocation2 + $0x1d4] sm:$0xf]  ;;  %v712_v12 = vor.u32 %v883_v4, %v709_v5  ;;  %v881_v16 = vld [vmem:[#allocation2 + $0xc4] sm:$0xf]  ;;  %v768_v20 = vor.u32 %v897_v14, %v765_v15 }
  0x26   :  { %483 = vmatpush.bf16.msra.mxu2 %v732_v39  ;;  %v837_v13 = vld [vmem:[#allocation2 + $0x1d8] sm:$0xf0]  ;;  %v701_v17 = vld [vmem:[#allocation2 + $0xc8] sm:$0xf0]  ;;  %v648_v18 = vor.u32 %v867_v9, %v645_v10  ;;  %v865_v21 = vld [vmem:[#allocation2 + $0x44] sm:$0xf] }
  0x27   :  { %501 = vmatpush.bf16.msra.mxu3 %v796_v43  ;;  %448 = vmatmul.bf16.vlgmr.msra.gmra.mxu0 %v1012_v48  ;;  %v840_v19 = vor.u32 %v915_v11, %v837_v13  ;;  %v637_v22 = vld [vmem:[#allocation2 + $0x48] sm:$0xf0]  ;;  %v913_v23 = vld [vmem:[#allocation2 + $0x1c4] sm:$0xf]  ;;  %v704_v24 = vor.u32 %v881_v16, %v701_v17  ;;  %v895_v26 = vld [vmem:[#allocation2 + $0x134] sm:$0xf] }
  0x28   :  { %466 = vmatmul.bf16.vlgmr.msra.gmra.mxu1 %v1014_v53  ;;  %512 = vmatpush.bf16.msrb.mxu0 %v664_v58  ;;  %v829_v25 = vld [vmem:[#allocation2 + $0x1c8] sm:$0xf0]  ;;  %v757_v27 = vld [vmem:[#allocation2 + $0x138] sm:$0xf0]  ;;  %v38_v28 = vld [vmem:[%s1073_s0 + $0x40] sm:$0xff]  ;;  %v640_v31 = vor.u32 %v865_v21, %v637_v22 }
  0x29   :  { %530 = vmatpush.bf16.msrb.mxu1 %v728_v49  ;;  %484 = vmatmul.bf16.vlgmr.msra.gmra.mxu2 %v1016_v54  ;;  %v879_v29 = vld [vmem:[#allocation2 + $0xb4] sm:$0xf]  ;;  %v693_v30 = vld [vmem:[#allocation2 + $0xb8] sm:$0xf0]  ;;  %v39_v32 = vld [vmem:[%s1073_s0 + $0x48] sm:$0xff]  ;;  %v832_v35 = vor.u32 %v913_v23, %v829_v25  ;;  %v760_v36 = vor.u32 %v895_v26, %v757_v27  ;;  %v1036_v40 = vpack.c.bf16 %v38_v28, %v38_v28 }
  0x2a   :  { %548 = vmatpush.bf16.msrb.mxu2 %v792_v44  ;;  %502 = vmatmul.bf16.vlgmr.msra.gmra.mxu3 %v1018_v57  ;;  %v40_v33 = vld [vmem:[%s1073_s0 + $0x50] sm:$0xff]  ;;  %v41_v34 = vld [vmem:[%s1073_s0 + $0x58] sm:$0xff]  ;;  %v696_v41 = vor.u32 %v879_v29, %v693_v30  ;;  %v893_v43 = vld [vmem:[#allocation2 + $0x124] sm:$0xf]  ;;  %v1038_v45 = vpack.c.bf16 %v39_v32, %v39_v32 }
  0x2b   :  { %566 = vmatpush.bf16.msrb.mxu3 %v856_v59  ;;  %v863_v37 = vld [vmem:[#allocation2 + $0x34] sm:$0xf]  ;;  %v629_v38 = vld [vmem:[#allocation2 + $0x38] sm:$0xf0]  ;;  %v749_v44 = vld [vmem:[#allocation2 + $0x128] sm:$0xf0]  ;;  %v1040_v46 = vpack.c.bf16 %v40_v33, %v40_v33  ;;  %v49_v50 = vpack.c.bf16 %v41_v34, %v41_v34 }
  0x2c   :  { %513 = vmatpush.bf16.msrb.mxu0 %v656_v6  ;;  %v911_v39 = vld [vmem:[#allocation2 + $0x1b4] sm:$0xf]  ;;  %v821_v42 = vld [vmem:[#allocation2 + $0x1b8] sm:$0xf0]  ;;  %v877_v47 = vld [vmem:[#allocation2 + $0xa4] sm:$0xf]  ;;  %v632_v51 = vor.u32 %v863_v37, %v629_v38  ;;  %v752_v55 = vor.u32 %v893_v43, %v749_v44 }
  0x2d   :  { %531 = vmatpush.bf16.msrb.mxu1 %v720_v0  ;;  %v685_v49 = vld [vmem:[#allocation2 + $0xa8] sm:$0xf0]  ;;  %v824_v52 = vor.u32 %v911_v39, %v821_v42  ;;  %v861_v56 = vld [vmem:[#allocation2 + $0x24] sm:$0xf]  ;;  %v891_v62 = vld [vmem:[#allocation2 + $0x114] sm:$0xf] }
  0x2e   :  { %549 = vmatpush.bf16.msrb.mxu2 %v784_v60  ;;  %v621_v58 = vld [vmem:[#allocation2 + $0x28] sm:$0xf0]  ;;  %v909_v59 = vld [vmem:[#allocation2 + $0x1a4] sm:$0xf]  ;;  %v688_v60 = vor.u32 %v877_v47, %v685_v49  ;;  %v741_v63 = vld [vmem:[#allocation2 + $0x118] sm:$0xf0] }
  0x2f   :  { %567 = vmatpush.bf16.msrb.mxu3 %v848_v7  ;;  %v813_v61 = vld [vmem:[#allocation2 + $0x1a8] sm:$0xf0]  ;;  %v875_v0 = vld [vmem:[#allocation2 + $0x94] sm:$0xf]  ;;  %v677_v1 = vld [vmem:[#allocation2 + $0x98] sm:$0xf0]  ;;  %v624_v2 = vor.u32 %v861_v56, %v621_v58  ;;  %v744_v4 = vor.u32 %v891_v62, %v741_v63 }
  0x30   :  { %514 = vmatpush.bf16.msrb.mxu0 %v648_v18  ;;  %v816_v3 = vor.u32 %v909_v59, %v813_v61  ;;  %v859_v5 = vld [vmem:[#allocation2 + $0x14] sm:$0xf]  ;;  %v613_v6 = vld [vmem:[#allocation2 + $0x18] sm:$0xf0]  ;;  %v889_v10 = vld [vmem:[#allocation2 + $0x104] sm:$0xf] }
  0x31   :  { %532 = vmatpush.bf16.msrb.mxu1 %v712_v12  ;;  %v907_v7 = vld [vmem:[#allocation2 + $0x194] sm:$0xf]  ;;  %v805_v9 = vld [vmem:[#allocation2 + $0x198] sm:$0xf0]  ;;  %v733_v11 = vld [vmem:[#allocation2 + $0x108] sm:$0xf0]  ;;  %v616_v14 = vor.u32 %v859_v5, %v613_v6 }
  0x32   :  { %550 = vmatpush.bf16.msrb.mxu2 %v776_v8  ;;  %v680_v8 = vor.u32 %v875_v0, %v677_v1  ;;  %v873_v12 = vld [vmem:[#allocation2 + $0x84] sm:$0xf]  ;;  %v669_v13 = vld [vmem:[#allocation2 + $0x88] sm:$0xf0]  ;;  %v808_v15 = vor.u32 %v907_v7, %v805_v9  ;;  %v736_v16 = vor.u32 %v889_v10, %v733_v11 }
  0x33   :  { %568 = vmatpush.bf16.msrb.mxu3 %v840_v19  ;;  %v857_v17 = vld [vmem:[#allocation2 + $0x4] sm:$0xf]  ;;  %v605_v18 = vld [vmem:[#allocation2 + $0x8] sm:$0xf0]  ;;  %v672_v19 = vor.u32 %v873_v12, %v669_v13 }
  0x34   :  { %515 = vmatpush.bf16.msrb.mxu0 %v640_v31  ;;  %v797_v21 = vld [vmem:[#allocation2 + $0x188] sm:$0xf0]  ;;  %v608_v22 = vor.u32 %v857_v17, %v605_v18 }
  0x35   :  { %533 = vmatpush.bf16.msrb.mxu1 %v704_v24  ;;  %v114_v24 = vld [vmem:[%s1075_s2] sm:$0x3] }
  0x36   :  { %551 = vmatpush.bf16.msrb.mxu2 %v768_v20  ;;  %v905_v20 = vld [vmem:[#allocation2 + $0x184] sm:$0xf]  ;;  %v116_v25 = vperm.slane %v114_v24, 0 }
  0x37   :  { %569 = vmatpush.bf16.msrb.mxu3 %v832_v35  ;;  %453 = vmatmul.bf16.gmra.mxu0 %v1036_v40  ;;  %v800_v23 = vor.u32 %v905_v20, %v797_v21 }
  0x38   :  { %471 = vmatmul.bf16.gmra.mxu1 %v1038_v45  ;;  %516 = vmatpush.bf16.msrb.mxu0 %v632_v51  ;;  %v117_v51 = vperm.slane %v114_v24, 1 }
  0x39   :  { %534 = vmatpush.bf16.msrb.mxu1 %v696_v41  ;;  %489 = vmatmul.bf16.gmra.mxu2 %v1040_v46 }
  0x3a   :  { %552 = vmatpush.bf16.msrb.mxu2 %v760_v36  ;;  %507 = vmatmul.bf16.gmra.mxu3 %v49_v50 }
  0x3b   :  { %570 = vmatpush.bf16.msrb.mxu3 %v824_v52 }
  0x3c   :  { %517 = vmatpush.bf16.msrb.mxu0 %v624_v2 }
  0x3d   :  { %535 = vmatpush.bf16.msrb.mxu1 %v688_v60 }
  0x3e   :  { %553 = vmatpush.bf16.msrb.mxu2 %v752_v55 }
  0x3f   :  { %571 = vmatpush.bf16.msrb.mxu3 %v816_v3 }
  0x40   :  { %518 = vmatpush.bf16.msrb.mxu0 %v616_v14 }
  0x41   :  { %536 = vmatpush.bf16.msrb.mxu1 %v680_v8 }
  0x42   :  { %554 = vmatpush.bf16.msrb.mxu2 %v744_v4 }
  0x43   :  { %572 = vmatpush.bf16.msrb.mxu3 %v808_v15 }
  0x44   :  { %519 = vmatpush.bf16.msrb.mxu0 %v608_v22 }
  0x45   :  { %537 = vmatpush.bf16.msrb.mxu1 %v672_v19 }
  0x46   :  { %555 = vmatpush.bf16.msrb.mxu2 %v736_v16 }
  0x47   :  { %573 = vmatpush.bf16.msrb.mxu3 %v800_v23  ;;  %520 = vmatmul.bf16.vlgmr.msrb.gmra.mxu0 %v1012_v48 }
  0x48   :  { %538 = vmatmul.bf16.vlgmr.msrb.gmra.mxu1 %v1014_v53 }
  0x49   :  { %556 = vmatmul.bf16.vlgmr.msrb.gmra.mxu2 %v1016_v54 }
  0x4a   :  { %574 = vmatmul.bf16.vlgmr.msrb.gmra.mxu3 %v1018_v57 }
  0x57   :  { %525 = vmatmul.bf16.gmra.mxu0 %v1036_v40 }
  0x58   :  { %543 = vmatmul.bf16.gmra.mxu1 %v1038_v45 }
  0x59   :  { %561 = vmatmul.bf16.gmra.mxu2 %v1040_v46 }
  0x5a   :  { %579 = vmatmul.bf16.gmra.mxu3 %v49_v50 }
  0xa4   :  { %v449_v26 = vpop.f32.mrf.mxu0 }
  0xa5   :  { %v450_v48 = vadd.f32 %v449_v26, %v116_v25  ;;  %v467_v27 = vpop.f32.mrf.mxu1 }
  0xa7   :  { %v468_v53 = vadd.f32 %v467_v27, %v450_v48 }
  0xac   :  { %v485_v28 = vpop.f32.mrf.mxu2  ;;  %v451_v57 = vpop.f32.mrf.mxu0 }
  0xad   :  { %v486_v54 = vadd.f32 %v485_v28, %v468_v53  ;;  %v503_v29 = vpop.f32.mrf.mxu3  ;;  %v469_v30 = vpop.f32.mrf.mxu1  ;;  %v452_v32 = vadd.f32 %v451_v57, %v116_v25 }
  0xaf   :  { %v504_v31 = vadd.f32 %v503_v29, %v486_v54  ;;  %v470_v33 = vadd.f32 %v469_v30, %v452_v32 }
  0xb1   :  { %924 = vtanh.f32 %v504_v31 }
  0xb4   :  { %v487_v34 = vpop.f32.mrf.mxu2  ;;  %v454_v37 = vpop.f32.mrf.mxu0 }
  0xb5   :  { %v488_v35 = vadd.f32 %v487_v34, %v470_v33  ;;  %v505_v36 = vpop.f32.mrf.mxu3  ;;  %v455_v38 = vadd.f32 %v454_v37, %v116_v25  ;;  %v472_v39 = vpop.f32.mrf.mxu1 }
  0xb7   :  { %v925_v40 = vpop.eup %924  ;;  %v506_v41 = vadd.f32 %v505_v36, %v488_v35  ;;  %v473_v42 = vadd.f32 %v472_v39, %v455_v38 }
  0xb8   :  { %590 = vst [vmem:[%s1076_s3] sm:$0xff] %v925_v40 }
  0xb9   :  { %926 = vtanh.f32 %v506_v41 }
  0xbc   :  { %v490_v43 = vpop.f32.mrf.mxu2  ;;  %v456_v46 = vpop.f32.mrf.mxu0 }
  0xbd   :  { %v491_v44 = vadd.f32 %v490_v43, %v473_v42  ;;  %v508_v45 = vpop.f32.mrf.mxu3  ;;  %v474_v47 = vpop.f32.mrf.mxu1 }
  0xbf   :  { %v927_v49 = vpop.eup %926  ;;  %v509_v50 = vadd.f32 %v508_v45, %v491_v44 }
  0xc0   :  { %592 = vst [vmem:[%s1076_s3 + $0x10] sm:$0xff] %v927_v49 }
  0xc1   :  { %928 = vtanh.f32 %v509_v50 }
  0xc4   :  { %v492_v52 = vpop.f32.mrf.mxu2  ;;  %v521_v56 = vpop.f32.mrf.mxu0 }
  0xc5   :  { %v510_v55 = vpop.f32.mrf.mxu3  ;;  %v539_v58 = vpop.f32.mrf.mxu1  ;;  %v522_v60 = vadd.f32 %v521_v56, %v117_v51 }
  0xc7   :  { %v929_v59 = vpop.eup %928  ;;  %v540_v61 = vadd.f32 %v539_v58, %v522_v60 }
  0xc8   :  { %594 = vst [vmem:[%s1076_s3 + $0x20] sm:$0xff] %v929_v59 }
  0xcc   :  { %v557_v62 = vpop.f32.mrf.mxu2  ;;  %v523_v1 = vpop.f32.mrf.mxu0 }
  0xcd   :  { %v575_v63 = vpop.f32.mrf.mxu3  ;;  %v558_v0 = vadd.f32 %v557_v62, %v540_v61  ;;  %v541_v2 = vpop.f32.mrf.mxu1  ;;  %v524_v4 = vadd.f32 %v523_v1, %v117_v51 }
  0xcf   :  { %v576_v3 = vadd.f32 %v575_v63, %v558_v0  ;;  %v542_v5 = vadd.f32 %v541_v2, %v524_v4 }
  0xd1   :  { %930 = vtanh.f32 %v576_v3 }
  0xd4   :  { %v559_v6 = vpop.f32.mrf.mxu2  ;;  %v526_v9 = vpop.f32.mrf.mxu0 }
  0xd5   :  { %v577_v7 = vpop.f32.mrf.mxu3  ;;  %v560_v8 = vadd.f32 %v559_v6, %v542_v5  ;;  %v544_v10 = vpop.f32.mrf.mxu1  ;;  %v527_v11 = vadd.f32 %v526_v9, %v117_v51 }
  0xd7   :  { %v931_v12 = vpop.eup %930  ;;  %v578_v13 = vadd.f32 %v577_v7, %v560_v8  ;;  %v545_v14 = vadd.f32 %v544_v10, %v527_v11 }
  0xd8   :  { %591 = vst [vmem:[%s1076_s3 + $0x8] sm:$0xff] %v931_v12 }
  0xd9   :  { %932 = vtanh.f32 %v578_v13 }
  0xdc   :  { %v562_v15 = vpop.f32.mrf.mxu2  ;;  %v528_v18 = vpop.f32.mrf.mxu0 }
  0xdd   :  { %v580_v16 = vpop.f32.mrf.mxu3  ;;  %v563_v17 = vadd.f32 %v562_v15, %v545_v14  ;;  %v546_v19 = vpop.f32.mrf.mxu1 }
  0xdf   :  { %v933_v20 = vpop.eup %932  ;;  %v581_v21 = vadd.f32 %v580_v16, %v563_v17 }
  0xe0   :  { %593 = vst [vmem:[%s1076_s3 + $0x18] sm:$0xff] %v933_v20 }
  0xe1   :  { %934 = vtanh.f32 %v581_v21 }
  0xe4   :  { %v564_v22 = vpop.f32.mrf.mxu2 }
  0xe5   :  { %v582_v23 = vpop.f32.mrf.mxu3 }
  0xe7   :  { %v935_v24 = vpop.eup %934 }
  0xe8   :  { %595 = vst [vmem:[%s1076_s3 + $0x28] sm:$0xff] %v935_v24 }
  0xe9   :  { %600 = vsyncpa [#allocation3], 1 }

// kernel: transformer_time_forward.3
= control target key start
LH: loop header
LB: loop body
LE: loop exit
PB: predicated region body
PF: predicated region fallthrough
CT: control target
= control target key end

     0   :  { %vm838_vm0 = vcmask 523264   ;;  %s8454_s2 = inlined_call_operand.vmem [shape: bf16[1,256,768], index: 2, kind: input, shape index: {}]   ;;  %s8455_s0 = inlined_call_operand.vmem [shape: f32[16,256], index: 0, kind: input, shape index: {}]   ;;  %s8456_s3 = inlined_call_operand.vmem [shape: f32[1,1,768], index: 3, kind: input, shape index: {}]   ;;  %s8457_s1 = inlined_call_operand.vmem [shape: f32[64,64], index: 1, kind: input, shape index: {}]   ;;  %s8458_s4 = inlined_call_operand.vmem [shape: bf16[1,256,256], index: 4, kind: input, shape index: {}]   ;;  %s8459_s5 = inlined_call_operand.vmem [shape: f32[1,1,256], index: 5, kind: input, shape index: {}]   ;;  %s8460_s8 = inlined_call_operand.vmem [shape: bf16[1,256,1024], index: 8, kind: input, shape index: {}]   ;;  %s8461_s6 = inlined_call_operand.vmem [shape: f32[1,1,256], index: 6, kind: input, shape index: {}]   ;;  %s8462_s7 = inlined_call_operand.vmem [shape: f32[1,1,256], index: 7, kind: input, shape index: {}]   ;;  %s8463_s10 = inlined_call_operand.vmem [shape: bf16[1,1024,256], index: 10, kind: input, shape index: {}]   ;;  %s8464_s9 = inlined_call_operand.vmem [shape: f32[1,1,1024], index: 9, kind: input, shape index: {}]   ;;  %s8465_s11 = inlined_call_operand.vmem [shape: f32[1,1,256], index: 11, kind: input, shape index: {}]   ;;  %s8466_s12 = inlined_call_operand.vmem [shape: f32[1,1,256], index: 12, kind: input, shape index: {}]   ;;  %s8467_s13 = inlined_call_operand.vmem [shape: f32[1,1,256], index: 13, kind: input, shape index: {}]   ;;  %s8468_s14 = inlined_call_operand.vmem [shape: f32[16,256], index: 14, kind: output, shape index: {}]  }
   0x1   :  { %v5328_v0 = vld [vmem:[%s8454_s2 + $0x154] sm:$0xf]  ;;  %v3906_v1 = vld [vmem:[%s8454_s2 + $0x168] sm:$0xf0]  ;;  %v5322_v5 = vld [vmem:[%s8454_s2 + $0x124] sm:$0xf] }
   0x2   :  { %v5376_v2 = vld [vmem:[%s8454_s2 + $0x2d4] sm:$0xf]  ;;  %v3909_v3 = vor.u32 %v5328_v0, %v3906_v1  ;;  %v4098_v4 = vld [vmem:[%s8454_s2 + $0x2e8] sm:$0xf0]  ;;  %v3882_v6 = vld [vmem:[%s8454_s2 + $0x138] sm:$0xf0] }
   0x3   :  { %v4101_v7 = vor.u32 %v5376_v2, %v4098_v4  ;;  %v5370_v8 = vld [vmem:[%s8454_s2 + $0x2a4] sm:$0xf]  ;;  %v4074_v9 = vld [vmem:[%s8454_s2 + $0x2b8] sm:$0xf0]  ;;  %v3885_v10 = vor.u32 %v5322_v5, %v3882_v6  ;;  %v5316_v11 = vld [vmem:[%s8454_s2 + $0xf4] sm:$0xf] }
   0x4   :  { %684 = vmatpush.bf16.msra.mxu2 %v3909_v3  ;;  %v4077_v12 = vor.u32 %v5370_v8, %v4074_v9  ;;  %v3858_v13 = vld [vmem:[%s8454_s2 + $0x108] sm:$0xf0]  ;;  %v3904_v14 = vld [vmem:[%s8454_s2 + $0x150] sm:$0xf]  ;;  %v5331_v15 = vld [vmem:[%s8454_s2 + $0x164] sm:$0xf0] }
   0x5   :  { %698 = vmatpush.bf16.msra.mxu3 %v4101_v7  ;;  %v5364_v16 = vld [vmem:[%s8454_s2 + $0x274] sm:$0xf]  ;;  %v4050_v17 = vld [vmem:[%s8454_s2 + $0x288] sm:$0xf0]  ;;  %v3905_v18 = vor.u32 %v5331_v15, %v3904_v14  ;;  %v4096_v19 = vld [vmem:[%s8454_s2 + $0x2d0] sm:$0xf]  ;;  %v3861_v22 = vor.u32 %v5316_v11, %v3858_v13 }
   0x6   :  { %v5379_v20 = vld [vmem:[%s8454_s2 + $0x2e4] sm:$0xf0]  ;;  %v3880_v21 = vld [vmem:[%s8454_s2 + $0x120] sm:$0xf]  ;;  %v5310_v23 = vld [vmem:[%s8454_s2 + $0xc4] sm:$0xf]  ;;  %v4053_v27 = vor.u32 %v5364_v16, %v4050_v17 }
   0x7   :  { %656 = vmatpush.bf16.msra.mxu0 %v3905_v18  ;;  %v3834_v24 = vld [vmem:[%s8454_s2 + $0xd8] sm:$0xf0]  ;;  %v4097_v25 = vor.u32 %v5379_v20, %v4096_v19  ;;  %v5325_v26 = vld [vmem:[%s8454_s2 + $0x134] sm:$0xf0]  ;;  %v5358_v28 = vld [vmem:[%s8454_s2 + $0x244] sm:$0xf] }
   0x8   :  { %685 = vmatpush.bf16.msra.mxu2 %v3885_v10  ;;  %v4026_v29 = vld [vmem:[%s8454_s2 + $0x258] sm:$0xf0]  ;;  %v3881_v30 = vor.u32 %v5325_v26, %v3880_v21  ;;  %v4072_v31 = vld [vmem:[%s8454_s2 + $0x2a0] sm:$0xf]  ;;  %v5373_v32 = vld [vmem:[%s8454_s2 + $0x2b4] sm:$0xf0]  ;;  %v3837_v36 = vor.u32 %v5310_v23, %v3834_v24 }
   0x9   :  { %699 = vmatpush.bf16.msra.mxu3 %v4077_v12  ;;  %670 = vmatpush.bf16.msra.mxu1 %v4097_v25  ;;  %v3856_v33 = vld [vmem:[%s8454_s2 + $0xf0] sm:$0xf]  ;;  %v5319_v34 = vld [vmem:[%s8454_s2 + $0x104] sm:$0xf0]  ;;  %v4073_v35 = vor.u32 %v5373_v32, %v4072_v31  ;;  %v5304_v37 = vld [vmem:[%s8454_s2 + $0x94] sm:$0xf]  ;;  %v4029_v41 = vor.u32 %v5358_v28, %v4026_v29 }
   0xa   :  { %v3857_v38 = vor.u32 %v5319_v34, %v3856_v33  ;;  %v4048_v39 = vld [vmem:[%s8454_s2 + $0x270] sm:$0xf]  ;;  %v5367_v40 = vld [vmem:[%s8454_s2 + $0x284] sm:$0xf0]  ;;  %v3810_v42 = vld [vmem:[%s8454_s2 + $0xa8] sm:$0xf0] }
   0xb   :  { %657 = vmatpush.bf16.msra.mxu0 %v3881_v30  ;;  %v3832_v43 = vld [vmem:[%s8454_s2 + $0xc0] sm:$0xf]  ;;  %v5313_v44 = vld [vmem:[%s8454_s2 + $0xd4] sm:$0xf0]  ;;  %v5352_v45 = vld [vmem:[%s8454_s2 + $0x214] sm:$0xf]  ;;  %v4049_v47 = vor.u32 %v5367_v40, %v4048_v39  ;;  %v3813_v50 = vor.u32 %v5304_v37, %v3810_v42 }
   0xc   :  { %686 = vmatpush.bf16.msra.mxu2 %v3861_v22  ;;  %v4002_v46 = vld [vmem:[%s8454_s2 + $0x228] sm:$0xf0]  ;;  %v4024_v48 = vld [vmem:[%s8454_s2 + $0x240] sm:$0xf]  ;;  %v5361_v49 = vld [vmem:[%s8454_s2 + $0x254] sm:$0xf0]  ;;  %v3833_v52 = vor.u32 %v5313_v44, %v3832_v43 }
   0xd   :  { %700 = vmatpush.bf16.msra.mxu3 %v4053_v27  ;;  %671 = vmatpush.bf16.msra.mxu1 %v4073_v35  ;;  %v5298_v51 = vld [vmem:[%s8454_s2 + $0x64] sm:$0xf]  ;;  %v4005_v53 = vor.u32 %v5352_v45, %v4002_v46  ;;  %v3786_v54 = vld [vmem:[%s8454_s2 + $0x78] sm:$0xf0]  ;;  %v3808_v55 = vld [vmem:[%s8454_s2 + $0x90] sm:$0xf]  ;;  %v4025_v59 = vor.u32 %v5361_v49, %v4024_v48 }
   0xe   :  { %v5307_v56 = vld [vmem:[%s8454_s2 + $0xa4] sm:$0xf0]  ;;  %v5346_v57 = vld [vmem:[%s8454_s2 + $0x1e4] sm:$0xf]  ;;  %v3978_v58 = vld [vmem:[%s8454_s2 + $0x1f8] sm:$0xf0]  ;;  %v3789_v62 = vor.u32 %v5298_v51, %v3786_v54 }
   0xf   :  { %658 = vmatpush.bf16.msra.mxu0 %v3857_v38  ;;  %v4000_v60 = vld [vmem:[%s8454_s2 + $0x210] sm:$0xf]  ;;  %v5355_v61 = vld [vmem:[%s8454_s2 + $0x224] sm:$0xf0]  ;;  %v5292_v63 = vld [vmem:[%s8454_s2 + $0x34] sm:$0xf]  ;;  %v3809_v0 = vor.u32 %v5307_v56, %v3808_v55  ;;  %v3981_v1 = vor.u32 %v5346_v57, %v3978_v58 }
  0x10   :  { %687 = vmatpush.bf16.msra.mxu2 %v3837_v36  ;;  %v3762_v2 = vld [vmem:[%s8454_s2 + $0x48] sm:$0xf0]  ;;  %v3784_v3 = vld [vmem:[%s8454_s2 + $0x60] sm:$0xf]  ;;  %v5301_v4 = vld [vmem:[%s8454_s2 + $0x74] sm:$0xf0]  ;;  %v4001_v7 = vor.u32 %v5355_v61, %v4000_v60 }
  0x11   :  { %701 = vmatpush.bf16.msra.mxu3 %v4029_v41  ;;  %672 = vmatpush.bf16.msra.mxu1 %v4049_v47  ;;  %v5340_v5 = vld [vmem:[%s8454_s2 + $0x1b4] sm:$0xf]  ;;  %v3954_v6 = vld [vmem:[%s8454_s2 + $0x1c8] sm:$0xf0]  ;;  %v3976_v8 = vld [vmem:[%s8454_s2 + $0x1e0] sm:$0xf]  ;;  %v3765_v10 = vor.u32 %v5292_v63, %v3762_v2  ;;  %v3785_v12 = vor.u32 %v5301_v4, %v3784_v3 }
  0x12   :  { %v5349_v9 = vld [vmem:[%s8454_s2 + $0x1f4] sm:$0xf0]  ;;  %v5286_v11 = vld [vmem:[%s8454_s2 + $0x4] sm:$0xf]  ;;  %v3957_v13 = vor.u32 %v5340_v5, %v3954_v6  ;;  %v3738_v14 = vld [vmem:[%s8454_s2 + $0x18] sm:$0xf0] }
  0x13   :  { %659 = vmatpush.bf16.msra.mxu0 %v3833_v52  ;;  %v3760_v15 = vld [vmem:[%s8454_s2 + $0x30] sm:$0xf]  ;;  %v5295_v16 = vld [vmem:[%s8454_s2 + $0x44] sm:$0xf0]  ;;  %v5334_v17 = vld [vmem:[%s8454_s2 + $0x184] sm:$0xf]  ;;  %v3977_v19 = vor.u32 %v5349_v9, %v3976_v8  ;;  %v3741_v22 = vor.u32 %v5286_v11, %v3738_v14 }
  0x14   :  { %688 = vmatpush.bf16.msra.mxu2 %v3813_v50  ;;  %v3930_v18 = vld [vmem:[%s8454_s2 + $0x198] sm:$0xf0]  ;;  %v3952_v20 = vld [vmem:[%s8454_s2 + $0x1b0] sm:$0xf]  ;;  %v5343_v21 = vld [vmem:[%s8454_s2 + $0x1c4] sm:$0xf0]  ;;  %v3761_v26 = vor.u32 %v5295_v16, %v3760_v15 }
  0x15   :  { %702 = vmatpush.bf16.msra.mxu3 %v4005_v53  ;;  %673 = vmatpush.bf16.msra.mxu1 %v4025_v59  ;;  %v52_v23 = vld [vmem:[%s8455_s0] sm:$0xff]  ;;  %v54_v24 = vld [vmem:[%s8455_s0 + $0x10] sm:$0xff]  ;;  %v53_v25 = vld [vmem:[%s8455_s0 + $0x8] sm:$0xff]  ;;  %v3933_v27 = vor.u32 %v5334_v17, %v3930_v18  ;;  %v3953_v31 = vor.u32 %v5343_v21, %v3952_v20 }
  0x16   :  { %v55_v28 = vld [vmem:[%s8455_s0 + $0x18] sm:$0xff]  ;;  %v3736_v29 = vld [vmem:[%s8454_s2] sm:$0xf]  ;;  %v5332_v33 = vld [vmem:[%s8454_s2 + $0x16c] sm:$0xf0]  ;;  %v5999_v34 = vpack.c.bf16 %v54_v24, %v52_v23 }
  0x17   :  { %660 = vmatpush.bf16.msra.mxu0 %v3809_v0  ;;  %v5289_v30 = vld [vmem:[%s8454_s2 + $0x14] sm:$0xf0]  ;;  %v3928_v35 = vld [vmem:[%s8454_s2 + $0x180] sm:$0xf]  ;;  %v6010_v38 = vpack.c.bf16 %v55_v28, %v53_v25  ;;  %v5380_v40 = vld [vmem:[%s8454_s2 + $0x2ec] sm:$0xf0] }
  0x18   :  { %689 = vmatpush.bf16.msra.mxu2 %v3789_v62  ;;  %v3912_v32 = vld [vmem:[%s8454_s2 + $0x158] sm:$0xf]  ;;  %v3737_v39 = vor.u32 %v5289_v30, %v3736_v29  ;;  %v5329_v41 = vld [vmem:[%s8454_s2 + $0x15c] sm:$0xf]  ;;  %v3914_v42 = vld [vmem:[%s8454_s2 + $0x170] sm:$0xf0] }
  0x19   :  { %703 = vmatpush.bf16.msra.mxu3 %v3981_v1  ;;  %674 = vmatpush.bf16.msra.mxu1 %v4001_v7  ;;  %v5337_v36 = vld [vmem:[%s8454_s2 + $0x194] sm:$0xf0]  ;;  %v3913_v43 = vor.u32 %v5332_v33, %v3912_v32  ;;  %v3917_v44 = vor.u32 %v5329_v41, %v3914_v42  ;;  %v5377_v45 = vld [vmem:[%s8454_s2 + $0x2dc] sm:$0xf]  ;;  %v3888_v47 = vld [vmem:[%s8454_s2 + $0x128] sm:$0xf] }
  0x1a   :  { %v4104_v37 = vld [vmem:[%s8454_s2 + $0x2d8] sm:$0xf]  ;;  %v3929_v46 = vor.u32 %v5337_v36, %v3928_v35  ;;  %v5326_v48 = vld [vmem:[%s8454_s2 + $0x13c] sm:$0xf0]  ;;  %v4106_v49 = vld [vmem:[%s8454_s2 + $0x2f0] sm:$0xf0] }
  0x1b   :  { %661 = vmatpush.bf16.msra.mxu0 %v3785_v12  ;;  %v4105_v50 = vor.u32 %v5380_v40, %v4104_v37  ;;  %v4109_v51 = vor.u32 %v5377_v45, %v4106_v49  ;;  %v5323_v52 = vld [vmem:[%s8454_s2 + $0x12c] sm:$0xf]  ;;  %v3890_v53 = vld [vmem:[%s8454_s2 + $0x140] sm:$0xf0]  ;;  %v4080_v54 = vld [vmem:[%s8454_s2 + $0x2a8] sm:$0xf]  ;;  %v3889_v56 = vor.u32 %v5326_v48, %v3888_v47 }
  0x1c   :  { %690 = vmatpush.bf16.msra.mxu2 %v3765_v10  ;;  %v5374_v55 = vld [vmem:[%s8454_s2 + $0x2bc] sm:$0xf0]  ;;  %v5371_v57 = vld [vmem:[%s8454_s2 + $0x2ac] sm:$0xf]  ;;  %v4082_v58 = vld [vmem:[%s8454_s2 + $0x2c0] sm:$0xf0]  ;;  %v3893_v61 = vor.u32 %v5323_v52, %v3890_v53 }
  0x1d   :  { %704 = vmatpush.bf16.msra.mxu3 %v3957_v13  ;;  %675 = vmatpush.bf16.msra.mxu1 %v3977_v19  ;;  %v3864_v59 = vld [vmem:[%s8454_s2 + $0xf8] sm:$0xf]  ;;  %v5320_v60 = vld [vmem:[%s8454_s2 + $0x10c] sm:$0xf0]  ;;  %v4085_v62 = vor.u32 %v5371_v57, %v4082_v58  ;;  %v4081_v63 = vor.u32 %v5374_v55, %v4080_v54  ;;  %v5317_v0 = vld [vmem:[%s8454_s2 + $0xfc] sm:$0xf] }
  0x1e   :  { %v3866_v1 = vld [vmem:[%s8454_s2 + $0x110] sm:$0xf0]  ;;  %v5365_v2 = vld [vmem:[%s8454_s2 + $0x27c] sm:$0xf]  ;;  %v4056_v3 = vld [vmem:[%s8454_s2 + $0x278] sm:$0xf]  ;;  %v3865_v6 = vor.u32 %v5320_v60, %v3864_v59 }
  0x1f   :  { %662 = vmatpush.bf16.msra.mxu0 %v3761_v26  ;;  %v5368_v4 = vld [vmem:[%s8454_s2 + $0x28c] sm:$0xf0]  ;;  %v4058_v5 = vld [vmem:[%s8454_s2 + $0x290] sm:$0xf0]  ;;  %v3840_v7 = vld [vmem:[%s8454_s2 + $0xc8] sm:$0xf]  ;;  %v3869_v9 = vor.u32 %v5317_v0, %v3866_v1 }
  0x20   :  { %691 = vmatpush.bf16.msra.mxu2 %v3741_v22  ;;  %v5314_v8 = vld [vmem:[%s8454_s2 + $0xdc] sm:$0xf0]  ;;  %v4061_v10 = vor.u32 %v5365_v2, %v4058_v5  ;;  %v5311_v11 = vld [vmem:[%s8454_s2 + $0xcc] sm:$0xf]  ;;  %v4057_v12 = vor.u32 %v5368_v4, %v4056_v3  ;;  %v3842_v13 = vld [vmem:[%s8454_s2 + $0xe0] sm:$0xf0] }
  0x21   :  { %705 = vmatpush.bf16.msra.mxu3 %v3933_v27  ;;  %676 = vmatpush.bf16.msra.mxu1 %v3953_v31  ;;  %v5359_v14 = vld [vmem:[%s8454_s2 + $0x24c] sm:$0xf]  ;;  %v4034_v15 = vld [vmem:[%s8454_s2 + $0x260] sm:$0xf0]  ;;  %v4032_v16 = vld [vmem:[%s8454_s2 + $0x248] sm:$0xf]  ;;  %v3841_v18 = vor.u32 %v5314_v8, %v3840_v7  ;;  %v3845_v21 = vor.u32 %v5311_v11, %v3842_v13 }
  0x22   :  { %v5362_v17 = vld [vmem:[%s8454_s2 + $0x25c] sm:$0xf0]  ;;  %v3816_v19 = vld [vmem:[%s8454_s2 + $0x98] sm:$0xf]  ;;  %v5308_v20 = vld [vmem:[%s8454_s2 + $0xac] sm:$0xf0]  ;;  %v4037_v22 = vor.u32 %v5359_v14, %v4034_v15 }
  0x23   :  { %692 = vmatmul.bf16.vlgmr.msra.gmra.mxu2 %v5999_v34  ;;  %663 = vmatpush.bf16.msra.mxu0 %v3737_v39  ;;  %v5305_v23 = vld [vmem:[%s8454_s2 + $0x9c] sm:$0xf]  ;;  %v4033_v24 = vor.u32 %v5362_v17, %v4032_v16  ;;  %v3818_v25 = vld [vmem:[%s8454_s2 + $0xb0] sm:$0xf0]  ;;  %v4008_v28 = vld [vmem:[%s8454_s2 + $0x218] sm:$0xf]  ;;  %v3817_v30 = vor.u32 %v5308_v20, %v3816_v19 }
  0x24   :  { %706 = vmatmul.bf16.vlgmr.msra.gmra.mxu3 %v6010_v38  ;;  %740 = vmatpush.bf16.msrb.mxu2 %v3917_v44  ;;  %v5353_v26 = vld [vmem:[%s8454_s2 + $0x21c] sm:$0xf]  ;;  %v4010_v27 = vld [vmem:[%s8454_s2 + $0x230] sm:$0xf0]  ;;  %v5356_v29 = vld [vmem:[%s8454_s2 + $0x22c] sm:$0xf0]  ;;  %v3821_v33 = vor.u32 %v5305_v23, %v3818_v25 }
  0x25   :  { %677 = vmatpush.bf16.msra.mxu1 %v3929_v46  ;;  %754 = vmatpush.bf16.msrb.mxu3 %v4109_v51  ;;  %v3792_v31 = vld [vmem:[%s8454_s2 + $0x68] sm:$0xf]  ;;  %v5302_v32 = vld [vmem:[%s8454_s2 + $0x7c] sm:$0xf0]  ;;  %v4013_v35 = vor.u32 %v5353_v26, %v4010_v27  ;;  %v5299_v36 = vld [vmem:[%s8454_s2 + $0x6c] sm:$0xf]  ;;  %v4009_v37 = vor.u32 %v5356_v29, %v4008_v28 }
  0x26   :  { %664 = vmatmul.bf16.vlgmr.msra.gmra.mxu0 %v5999_v34  ;;  %v3794_v39 = vld [vmem:[%s8454_s2 + $0x80] sm:$0xf0]  ;;  %v5347_v40 = vld [vmem:[%s8454_s2 + $0x1ec] sm:$0xf]  ;;  %v3984_v42 = vld [vmem:[%s8454_s2 + $0x1e8] sm:$0xf]  ;;  %v3793_v44 = vor.u32 %v5302_v32, %v3792_v31 }
  0x27   :  { %712 = vmatpush.bf16.msrb.mxu0 %v3913_v43  ;;  %v3986_v41 = vld [vmem:[%s8454_s2 + $0x200] sm:$0xf0]  ;;  %v5350_v43 = vld [vmem:[%s8454_s2 + $0x1fc] sm:$0xf0]  ;;  %v3768_v45 = vld [vmem:[%s8454_s2 + $0x38] sm:$0xf]  ;;  %v3797_v47 = vor.u32 %v5299_v36, %v3794_v39 }
  0x28   :  { %678 = vmatmul.bf16.vlgmr.msra.gmra.mxu1 %v6010_v38  ;;  %741 = vmatpush.bf16.msrb.mxu2 %v3893_v61  ;;  %v5296_v46 = vld [vmem:[%s8454_s2 + $0x4c] sm:$0xf0]  ;;  %v3989_v48 = vor.u32 %v5347_v40, %v3986_v41  ;;  %v5293_v49 = vld [vmem:[%s8454_s2 + $0x3c] sm:$0xf]  ;;  %v3770_v51 = vld [vmem:[%s8454_s2 + $0x50] sm:$0xf0] }
  0x29   :  { %726 = vmatpush.bf16.msrb.mxu1 %v4105_v50  ;;  %755 = vmatpush.bf16.msrb.mxu3 %v4085_v62  ;;  %v3985_v50 = vor.u32 %v5350_v43, %v3984_v42  ;;  %v5341_v52 = vld [vmem:[%s8454_s2 + $0x1bc] sm:$0xf]  ;;  %v3962_v53 = vld [vmem:[%s8454_s2 + $0x1d0] sm:$0xf0]  ;;  %v3960_v54 = vld [vmem:[%s8454_s2 + $0x1b8] sm:$0xf]  ;;  %v3773_v61 = vor.u32 %v5293_v49, %v3770_v51 }
  0x2a   :  { %v5344_v55 = vld [vmem:[%s8454_s2 + $0x1cc] sm:$0xf0]  ;;  %v3744_v57 = vld [vmem:[%s8454_s2 + $0x8] sm:$0xf]  ;;  %v5290_v58 = vld [vmem:[%s8454_s2 + $0x1c] sm:$0xf0]  ;;  %v3965_v62 = vor.u32 %v5341_v52, %v3962_v53 }
  0x2b   :  { %713 = vmatpush.bf16.msrb.mxu0 %v3889_v56  ;;  %v3769_v56 = vor.u32 %v5296_v46, %v3768_v45  ;;  %v3920_v59 = vld [vmem:[%s8454_s2 + $0x160] sm:$0xf]  ;;  %v5333_v60 = vld [vmem:[%s8454_s2 + $0x174] sm:$0xf0]  ;;  %v3936_v0 = vld [vmem:[%s8454_s2 + $0x188] sm:$0xf] }
  0x2c   :  { %742 = vmatpush.bf16.msrb.mxu2 %v3869_v9  ;;  %v5287_v1 = vld [vmem:[%s8454_s2 + $0xc] sm:$0xf]  ;;  %v3746_v2 = vld [vmem:[%s8454_s2 + $0x20] sm:$0xf0]  ;;  %v5338_v3 = vld [vmem:[%s8454_s2 + $0x19c] sm:$0xf0]  ;;  %v3921_v9 = vor.u32 %v5333_v60, %v3920_v59 }
  0x2d   :  { %727 = vmatpush.bf16.msrb.mxu1 %v4081_v63  ;;  %756 = vmatpush.bf16.msrb.mxu3 %v4061_v10  ;;  %v3961_v63 = vor.u32 %v5344_v55, %v3960_v54  ;;  %v5330_v4 = vld [vmem:[%s8454_s2 + $0x164] sm:$0xf]  ;;  %v3922_v5 = vld [vmem:[%s8454_s2 + $0x178] sm:$0xf0]  ;;  %v4112_v7 = vld [vmem:[%s8454_s2 + $0x2e0] sm:$0xf]  ;;  %v3749_v10 = vor.u32 %v5287_v1, %v3746_v2  ;;  %v3937_v13 = vor.u32 %v5338_v3, %v3936_v0 }
  0x2e   :  { %v5381_v8 = vld [vmem:[%s8454_s2 + $0x2f4] sm:$0xf0]  ;;  %v5335_v11 = vld [vmem:[%s8454_s2 + $0x18c] sm:$0xf]  ;;  %v3896_v14 = vld [vmem:[%s8454_s2 + $0x130] sm:$0xf]  ;;  %v3925_v16 = vor.u32 %v5330_v4, %v3922_v5 }
  0x2f   :  { %714 = vmatpush.bf16.msrb.mxu0 %v3865_v6  ;;  %v3745_v6 = vor.u32 %v5290_v58, %v3744_v57  ;;  %v5327_v15 = vld [vmem:[%s8454_s2 + $0x144] sm:$0xf0]  ;;  %v5378_v17 = vld [vmem:[%s8454_s2 + $0x2e4] sm:$0xf]  ;;  %v4114_v19 = vld [vmem:[%s8454_s2 + $0x2f8] sm:$0xf0] }
  0x30   :  { %743 = vmatpush.bf16.msrb.mxu2 %v3845_v21  ;;  %v5324_v20 = vld [vmem:[%s8454_s2 + $0x134] sm:$0xf]  ;;  %v3898_v21 = vld [vmem:[%s8454_s2 + $0x148] sm:$0xf0]  ;;  %v5375_v23 = vld [vmem:[%s8454_s2 + $0x2c4] sm:$0xf0]  ;;  %v3897_v25 = vor.u32 %v5327_v15, %v3896_v14  ;;  %v4117_v28 = vor.u32 %v5378_v17, %v4114_v19 }
  0x31   :  { %728 = vmatpush.bf16.msrb.mxu1 %v4057_v12  ;;  %757 = vmatpush.bf16.msrb.mxu3 %v4037_v22  ;;  %v3938_v12 = vld [vmem:[%s8454_s2 + $0x1a0] sm:$0xf0]  ;;  %v4088_v22 = vld [vmem:[%s8454_s2 + $0x2b0] sm:$0xf]  ;;  %v3872_v26 = vld [vmem:[%s8454_s2 + $0x100] sm:$0xf]  ;;  %v3901_v29 = vor.u32 %v5324_v20, %v3898_v21 }
  0x32   :  { %v5321_v27 = vld [vmem:[%s8454_s2 + $0x114] sm:$0xf0]  ;;  %v4089_v31 = vor.u32 %v5375_v23, %v4088_v22  ;;  %v4090_v32 = vld [vmem:[%s8454_s2 + $0x2c8] sm:$0xf0]  ;;  %v4064_v36 = vld [vmem:[%s8454_s2 + $0x280] sm:$0xf] }
  0x33   :  { %715 = vmatpush.bf16.msrb.mxu0 %v3841_v18  ;;  %v4113_v18 = vor.u32 %v5381_v8, %v4112_v7  ;;  %v3873_v39 = vor.u32 %v5321_v27, %v3872_v26  ;;  %v3848_v40 = vld [vmem:[%s8454_s2 + $0xd0] sm:$0xf]  ;;  %v5315_v41 = vld [vmem:[%s8454_s2 + $0xe4] sm:$0xf0]  ;;  %v4066_v46 = vld [vmem:[%s8454_s2 + $0x298] sm:$0xf0] }
  0x34   :  { %744 = vmatpush.bf16.msrb.mxu2 %v3821_v33  ;;  %v5318_v33 = vld [vmem:[%s8454_s2 + $0x104] sm:$0xf]  ;;  %v4040_v49 = vld [vmem:[%s8454_s2 + $0x250] sm:$0xf]  ;;  %v3849_v51 = vor.u32 %v5315_v41, %v3848_v40  ;;  %v3824_v52 = vld [vmem:[%s8454_s2 + $0xa0] sm:$0xf] }
  0x35   :  { %729 = vmatpush.bf16.msrb.mxu1 %v4033_v24  ;;  %758 = vmatpush.bf16.msrb.mxu3 %v4013_v35  ;;  %v3941_v24 = vor.u32 %v5335_v11, %v3938_v12  ;;  %v3874_v35 = vld [vmem:[%s8454_s2 + $0x118] sm:$0xf0]  ;;  %v5309_v53 = vld [vmem:[%s8454_s2 + $0xb4] sm:$0xf0]  ;;  %v4042_v58 = vld [vmem:[%s8454_s2 + $0x268] sm:$0xf0] }
  0x36   :  { %v3877_v43 = vor.u32 %v5318_v33, %v3874_v35  ;;  %v5306_v59 = vld [vmem:[%s8454_s2 + $0xa4] sm:$0xf]  ;;  %v3826_v60 = vld [vmem:[%s8454_s2 + $0xb8] sm:$0xf0]  ;;  %v3800_v0 = vld [vmem:[%s8454_s2 + $0x70] sm:$0xf] }
  0x37   :  { %716 = vmatpush.bf16.msrb.mxu0 %v3817_v30  ;;  %v5372_v30 = vld [vmem:[%s8454_s2 + $0x2b4] sm:$0xf]  ;;  %v5303_v1 = vld [vmem:[%s8454_s2 + $0x84] sm:$0xf0]  ;;  %v3829_v3 = vor.u32 %v5306_v59, %v3826_v60  ;;  %v5354_v4 = vld [vmem:[%s8454_s2 + $0x224] sm:$0xf] }
  0x38   :  { %745 = vmatpush.bf16.msrb.mxu2 %v3797_v47  ;;  %v4093_v42 = vor.u32 %v5372_v30, %v4090_v32  ;;  %v5312_v47 = vld [vmem:[%s8454_s2 + $0xd4] sm:$0xf]  ;;  %v3802_v8 = vld [vmem:[%s8454_s2 + $0x88] sm:$0xf0]  ;;  %v3801_v11 = vor.u32 %v5303_v1, %v3800_v0  ;;  %v3776_v12 = vld [vmem:[%s8454_s2 + $0x40] sm:$0xf] }
  0x39   :  { %730 = vmatpush.bf16.msrb.mxu1 %v4009_v37  ;;  %759 = vmatpush.bf16.msrb.mxu3 %v3989_v48  ;;  %v5369_v37 = vld [vmem:[%s8454_s2 + $0x294] sm:$0xf0]  ;;  %v3850_v48 = vld [vmem:[%s8454_s2 + $0xe8] sm:$0xf0]  ;;  %v5300_v7 = vld [vmem:[%s8454_s2 + $0x74] sm:$0xf] }
  0x3a   :  { %v4065_v45 = vor.u32 %v5369_v37, %v4064_v36  ;;  %v3853_v55 = vor.u32 %v5312_v47, %v3850_v48  ;;  %v3805_v15 = vor.u32 %v5300_v7, %v3802_v8  ;;  %v5294_v19 = vld [vmem:[%s8454_s2 + $0x44] sm:$0xf]  ;;  %v3778_v20 = vld [vmem:[%s8454_s2 + $0x58] sm:$0xf0]  ;;  %v3968_v21 = vld [vmem:[%s8454_s2 + $0x1c0] sm:$0xf] }
  0x3b   :  { %717 = vmatpush.bf16.msrb.mxu0 %v3793_v44  ;;  %v5366_v44 = vld [vmem:[%s8454_s2 + $0x284] sm:$0xf]  ;;  %v5345_v22 = vld [vmem:[%s8454_s2 + $0x1d4] sm:$0xf0]  ;;  %v3781_v27 = vor.u32 %v5294_v19, %v3778_v20  ;;  %v3970_v30 = vld [vmem:[%s8454_s2 + $0x1d8] sm:$0xf0] }
  0x3c   :  { %746 = vmatpush.bf16.msrb.mxu2 %v3773_v61  ;;  %v4069_v54 = vor.u32 %v5366_v44, %v4066_v46  ;;  %v4016_v61 = vld [vmem:[%s8454_s2 + $0x220] sm:$0xf]  ;;  %v3754_v32 = vld [vmem:[%s8454_s2 + $0x28] sm:$0xf0]  ;;  %v3944_v33 = vld [vmem:[%s8454_s2 + $0x190] sm:$0xf] }
  0x3d   :  { %731 = vmatpush.bf16.msrb.mxu1 %v3985_v50  ;;  %760 = vmatpush.bf16.msrb.mxu3 %v3965_v62  ;;  %v5363_v50 = vld [vmem:[%s8454_s2 + $0x264] sm:$0xf0]  ;;  %v5357_v62 = vld [vmem:[%s8454_s2 + $0x234] sm:$0xf0]  ;;  %v5336_v41 = vld [vmem:[%s8454_s2 + $0x194] sm:$0xf] }
  0x3e   :  { %v4041_v57 = vor.u32 %v5363_v50, %v4040_v49  ;;  %v4017_v5 = vor.u32 %v5357_v62, %v4016_v61  ;;  %v5339_v35 = vld [vmem:[%s8454_s2 + $0x1a4] sm:$0xf0]  ;;  %v6402_v44 = vld [vmem:[%s8456_s3] sm:$0x3f] }
  0x3f   :  { %718 = vmatpush.bf16.msrb.mxu0 %v3769_v56  ;;  %v5360_v56 = vld [vmem:[%s8454_s2 + $0x254] sm:$0xf]  ;;  %v3945_v40 = vor.u32 %v5339_v35, %v3944_v33  ;;  %v165_v46 = vperm.slane %v6402_v44, 1  ;;  %v166_v61 = vperm.slane %v6402_v44, 2  ;;  %v169_v20 = vperm.slane %v6402_v44, 5 }
  0x40   :  { %747 = vmatpush.bf16.msrb.mxu2 %v3749_v10  ;;  %v4045_v2 = vor.u32 %v5360_v56, %v4042_v58  ;;  %v5351_v10 = vld [vmem:[%s8454_s2 + $0x204] sm:$0xf0] }
  0x41   :  { %732 = vmatpush.bf16.msrb.mxu1 %v3961_v63  ;;  %761 = vmatpush.bf16.msrb.mxu3 %v3941_v24  ;;  %v3825_v63 = vor.u32 %v5309_v53, %v3824_v52  ;;  %v3752_v24 = vld [vmem:[%s8454_s2 + $0x10] sm:$0xf] }
  0x43   :  { %719 = vmatpush.bf16.msrb.mxu0 %v3745_v6  ;;  %748 = vmatmul.bf16.vlgmr.msrb.gmra.mxu2 %v5999_v34  ;;  %v4018_v6 = vld [vmem:[%s8454_s2 + $0x238] sm:$0xf0] }
  0x44   :  { %796 = vmatpush.bf16.msra.mxu2 %v3925_v16  ;;  %762 = vmatmul.bf16.vlgmr.msrb.gmra.mxu3 %v6010_v38  ;;  %v4021_v14 = vor.u32 %v5354_v4, %v4018_v6  ;;  %v5348_v16 = vld [vmem:[%s8454_s2 + $0x1f4] sm:$0xf] }
  0x45   :  { %733 = vmatpush.bf16.msrb.mxu1 %v3937_v13  ;;  %810 = vmatpush.bf16.msra.mxu3 %v4117_v28  ;;  %v5297_v13 = vld [vmem:[%s8454_s2 + $0x54] sm:$0xf0]  ;;  %v5342_v28 = vld [vmem:[%s8454_s2 + $0x1c4] sm:$0xf] }
  0x46   :  { %720 = vmatmul.bf16.vlgmr.msrb.gmra.mxu0 %v5999_v34  ;;  %v3777_v23 = vor.u32 %v5297_v13, %v3776_v12  ;;  %v3973_v37 = vor.u32 %v5342_v28, %v3970_v30 }
  0x47   :  { %768 = vmatpush.bf16.msra.mxu0 %v3921_v9  ;;  %v3992_v9 = vld [vmem:[%s8454_s2 + $0x1f0] sm:$0xf] }
  0x48   :  { %734 = vmatmul.bf16.vlgmr.msrb.gmra.mxu1 %v6010_v38  ;;  %797 = vmatpush.bf16.msra.mxu2 %v3901_v29  ;;  %v3993_v17 = vor.u32 %v5351_v10, %v3992_v9  ;;  %v3969_v29 = vor.u32 %v5345_v22, %v3968_v21 }
  0x49   :  { %782 = vmatpush.bf16.msra.mxu1 %v4113_v18  ;;  %811 = vmatpush.bf16.msra.mxu3 %v4093_v42  ;;  %v3994_v18 = vld [vmem:[%s8454_s2 + $0x208] sm:$0xf0] }
  0x4a   :  { %v3997_v26 = vor.u32 %v5348_v16, %v3994_v18  ;;  %v3946_v42 = vld [vmem:[%s8454_s2 + $0x1a8] sm:$0xf0] }
  0x4b   :  { %769 = vmatpush.bf16.msra.mxu0 %v3897_v25  ;;  %v5291_v25 = vld [vmem:[%s8454_s2 + $0x24] sm:$0xf0] }
  0x4c   :  { %798 = vmatpush.bf16.msra.mxu2 %v3877_v43  ;;  %v3753_v36 = vor.u32 %v5291_v25, %v3752_v24  ;;  %v3949_v43 = vor.u32 %v5336_v41, %v3946_v42 }
  0x4d   :  { %783 = vmatpush.bf16.msra.mxu1 %v4089_v31  ;;  %812 = vmatpush.bf16.msra.mxu3 %v4069_v54  ;;  %v5288_v31 = vld [vmem:[%s8454_s2 + $0x14] sm:$0xf]  ;;  %s5718_s2 = smov 64  }
  0x4f   :  { %770 = vmatpush.bf16.msra.mxu0 %v3873_v39  ;;  %v3757_v39 = vor.u32 %v5288_v31, %v3754_v32 }
  0x50   :  { %799 = vmatpush.bf16.msra.mxu2 %v3853_v55 }
  0x51   :  { %784 = vmatpush.bf16.msra.mxu1 %v4065_v45  ;;  %813 = vmatpush.bf16.msra.mxu3 %v4045_v2  ;;  %v164_v45 = vperm.slane %v6402_v44, 0 }
  0x53   :  { %771 = vmatpush.bf16.msra.mxu0 %v3849_v51 }
  0x54   :  { %800 = vmatpush.bf16.msra.mxu2 %v3829_v3 }
  0x55   :  { %785 = vmatpush.bf16.msra.mxu1 %v4041_v57  ;;  %814 = vmatpush.bf16.msra.mxu3 %v4021_v14 }
  0x57   :  { %772 = vmatpush.bf16.msra.mxu0 %v3825_v63 }
  0x58   :  { %801 = vmatpush.bf16.msra.mxu2 %v3805_v15  ;;  %v168_v15 = vperm.slane %v6402_v44, 4 }
  0x59   :  { %786 = vmatpush.bf16.msra.mxu1 %v4017_v5  ;;  %815 = vmatpush.bf16.msra.mxu3 %v3997_v26  ;;  %v167_v5 = vperm.slane %v6402_v44, 3 }
  0x5b   :  { %773 = vmatpush.bf16.msra.mxu0 %v3801_v11 }
  0x5c   :  { %802 = vmatpush.bf16.msra.mxu2 %v3781_v27 }
  0x5d   :  { %787 = vmatpush.bf16.msra.mxu1 %v3993_v17  ;;  %816 = vmatpush.bf16.msra.mxu3 %v3973_v37 }
  0x5f   :  { %774 = vmatpush.bf16.msra.mxu0 %v3777_v23 }
  0x60   :  { %803 = vmatpush.bf16.msra.mxu2 %v3757_v39 }
  0x61   :  { %788 = vmatpush.bf16.msra.mxu1 %v3969_v29  ;;  %817 = vmatpush.bf16.msra.mxu3 %v3949_v43 }
  0x63   :  { %775 = vmatpush.bf16.msra.mxu0 %v3753_v36  ;;  %804 = vmatmul.bf16.vlgmr.msra.gmra.mxu2 %v5999_v34 }
  0x64   :  { %818 = vmatmul.bf16.vlgmr.msra.gmra.mxu3 %v6010_v38 }
  0x65   :  { %789 = vmatpush.bf16.msra.mxu1 %v3945_v40 }
  0x66   :  { %776 = vmatmul.bf16.vlgmr.msra.gmra.mxu0 %v5999_v34 }
  0x68   :  { %790 = vmatmul.bf16.vlgmr.msra.gmra.mxu1 %v6010_v38 }
  0xa3   :  { %v665_v47 = vpop.f32.mrf.mxu0 }
  0xa4   :  { %v666_v48 = vadd.f32 %v665_v47, %v164_v45 }
  0xa5   :  { %v679_v50 = vpop.f32.mrf.mxu1 }
  0xa6   :  { %v693_v49 = vpop.f32.mrf.mxu2  ;;  %v680_v52 = vadd.f32 %v679_v50, %v666_v48 }
  0xa7   :  { %v694_v51 = vadd.f32 %v693_v49, %v165_v46  ;;  %v707_v34 = vpop.f32.mrf.mxu3 }
  0xa8   :  { %839 = vst.msk [vmem:[#allocation4] sm:$0xff] %vm838_vm0, %v680_v52  ;;  %853 = vrot.lane.b32.xlu1 %v680_v52, %s5718_s2 }
  0xa9   :  { %v708_v53 = vadd.f32 %v707_v34, %v694_v51 }
  0xab   :  { %887 = vst.msk [vmem:[#allocation4 + $0x20] sm:$0xff] %vm838_vm0, %v708_v53  ;;  %901 = vrot.lane.b32.xlu0 %v708_v53, %s5718_s2  ;;  %v667_v38 = vpop.f32.mrf.mxu0 }
  0xac   :  { %v668_v54 = vadd.f32 %v667_v38, %v164_v45 }
  0xad   :  { %v681_v56 = vpop.f32.mrf.mxu1 }
  0xae   :  { %v695_v55 = vpop.f32.mrf.mxu2  ;;  %v682_v58 = vadd.f32 %v681_v56, %v668_v54 }
  0xaf   :  { %v696_v57 = vadd.f32 %v695_v55, %v165_v46  ;;  %v709_v59 = vpop.f32.mrf.mxu3  ;;  %v945_v34 = vld [vmem:[#allocation4] sm:$0xff] }
  0xb0   :  { %840 = vst.msk [vmem:[#allocation4 + $0x8] sm:$0xff] %vm838_vm0, %v682_v58  ;;  %855 = vrot.lane.b32.xlu1 %v682_v58, %s5718_s2 }
  0xb1   :  { %v710_v60 = vadd.f32 %v709_v59, %v696_v57 }
  0xb2   :  { %v949_v44 = vld [vmem:[#allocation4 + $0x20] sm:$0xff] }
  0xb3   :  { %888 = vst.msk [vmem:[#allocation4 + $0x28] sm:$0xff] %vm838_vm0, %v710_v60  ;;  %903 = vrot.lane.b32.xlu0 %v710_v60, %s5718_s2 }
  0xb7   :  { %v946_v52 = vld [vmem:[#allocation4 + $0x8] sm:$0xff] }
  0xb8   :  { %v953_v53 = vpack.c.bf16 %v946_v52, %v945_v34 }
  0xba   :  { %v950_v43 = vld [vmem:[#allocation4 + $0x28] sm:$0xff]  ;;  %v982_v54 = vsel %vm838_vm0, %v953_v53, 0 }
  0xbb   :  { %v955_v45 = vpack.c.bf16 %v950_v43, %v949_v44  ;;  %v1037_v44 = vld [vmem:[%s8457_s1 + $0x38] sm:$0xff] }
  0xbd   :  { %v988_v46 = vsel %vm838_vm0, %v955_v45, 0 }
  0xc3   :  { %v721_v62 = vpop.f32.mrf.mxu0 }
  0xc4   :  { %v722_v63 = vadd.f32 %v721_v62, %v166_v61 }
  0xc5   :  { %v735_v0 = vpop.f32.mrf.mxu1 }
  0xc6   :  { %v6415_v1 = vadd.f32 %v735_v0, %v722_v63  ;;  %v749_v6 = vpop.f32.mrf.mxu2 }
  0xc7   :  { %v763_v8 = vpop.f32.mrf.mxu3  ;;  %v750_v9 = vadd.f32 %v749_v6, %v167_v5 }
  0xc8   :  { %843 = vst.msk [vmem:[#allocation5] sm:$0xff] %vm838_vm0, %v6415_v1 }
  0xc9   :  { %v764_v10 = vadd.f32 %v763_v8, %v750_v9  ;;  %v1030_v9 = vld [vmem:[%s8457_s1] sm:$0xff] }
  0xcb   :  { %v723_v2 = vpop.f32.mrf.mxu0  ;;  %891 = vst.msk [vmem:[#allocation5 + $0x20] sm:$0xff] %vm838_vm0, %v764_v10 }
  0xcc   :  { %v724_v3 = vadd.f32 %v723_v2, %v166_v61 }
  0xcd   :  { %v737_v4 = vpop.f32.mrf.mxu1 }
  0xce   :  { %v6420_v7 = vadd.f32 %v737_v4, %v724_v3  ;;  %v751_v11 = vpop.f32.mrf.mxu2 }
  0xcf   :  { %v752_v12 = vadd.f32 %v751_v11, %v167_v5  ;;  %v765_v13 = vpop.f32.mrf.mxu3 }
  0xd0   :  { %844 = vst.msk [vmem:[#allocation5 + $0x8] sm:$0xff] %vm838_vm0, %v6420_v7 }
  0xd1   :  { %v6425_v14 = vadd.f32 %v765_v13, %v752_v12 }
  0xd3   :  { %892 = vst.msk [vmem:[#allocation5 + $0x28] sm:$0xff] %vm838_vm0, %v6425_v14 }
  0xe3   :  { %v777_v16 = vpop.f32.mrf.mxu0 }
  0xe4   :  { %v778_v17 = vadd.f32 %v777_v16, %v168_v15 }
  0xe5   :  { %v791_v18 = vpop.f32.mrf.mxu1 }
  0xe6   :  { %v792_v19 = vadd.f32 %v791_v18, %v778_v17  ;;  %v805_v21 = vpop.f32.mrf.mxu2 }
  0xe7   :  { %v806_v23 = vadd.f32 %v805_v21, %v169_v20  ;;  %v819_v27 = vpop.f32.mrf.mxu3 }
  0xe8   :  { %847 = vst.msk [vmem:[#allocation3] sm:$0xff] %vm838_vm0, %v792_v19  ;;  %877 = vrot.lane.b32.xlu2 %v792_v19, %s5718_s2 }
  0xe9   :  { %v820_v28 = vadd.f32 %v819_v27, %v806_v23 }
  0xeb   :  { %v779_v22 = vpop.f32.mrf.mxu0  ;;  %895 = vst.msk [vmem:[#allocation3 + $0x20] sm:$0xff] %vm838_vm0, %v820_v28  ;;  %925 = vrot.lane.b32.xlu0 %v820_v28, %s5718_s2 }
  0xec   :  { %v780_v24 = vadd.f32 %v779_v22, %v168_v15  ;;  %v1031_v15 = vld [vmem:[%s8457_s1 + $0x8] sm:$0xff] }
  0xed   :  { %v793_v25 = vpop.f32.mrf.mxu1 }
  0xee   :  { %v794_v26 = vadd.f32 %v793_v25, %v780_v24  ;;  %v807_v29 = vpop.f32.mrf.mxu2  ;;  %v1033_v25 = vld [vmem:[%s8457_s1 + $0x18] sm:$0xff] }
  0xef   :  { %v808_v30 = vadd.f32 %v807_v29, %v169_v20  ;;  %v821_v31 = vpop.f32.mrf.mxu3  ;;  %v933_v55 = vld [vmem:[#allocation3] sm:$0xff]  ;;  %v1032_v20 = vld [vmem:[%s8457_s1 + $0x10] sm:$0xff] }
  0xf0   :  { %848 = vst.msk [vmem:[#allocation3 + $0x8] sm:$0xff] %vm838_vm0, %v794_v26  ;;  %879 = vrot.lane.b32.xlu2 %v794_v26, %s5718_s2 }
  0xf1   :  { %v822_v32 = vadd.f32 %v821_v31, %v808_v30  ;;  %v1034_v30 = vld [vmem:[%s8457_s1 + $0x20] sm:$0xff] }
  0xf2   :  { %v937_v63 = vld [vmem:[#allocation3 + $0x20] sm:$0xff] }
  0xf3   :  { %896 = vst.msk [vmem:[#allocation3 + $0x28] sm:$0xff] %vm838_vm0, %v822_v32  ;;  %927 = vrot.lane.b32.xlu1 %v822_v32, %s5718_s2 }
  0xf7   :  { %v934_v56 = vld [vmem:[#allocation3 + $0x8] sm:$0xff] }
  0xf8   :  { %v941_v57 = vpack.c.bf16 %v934_v56, %v933_v55 }
  0xfa   :  { %v938_v0 = vld [vmem:[#allocation3 + $0x28] sm:$0xff] }
  0xfb   :  { %913 = vrot.lane.b32.xlu1 %v764_v10, %s5718_s2  ;;  %v943_v2 = vpack.c.bf16 %v938_v0, %v937_v63 }
 0x11a   :  { %v854_v33 = vpop.permute.xlu1 %853 }
 0x11b   :  { %859 = vst.msk [vmem:[#allocation4 + $0x10] sm:$0xff] %vm838_vm0, %v854_v33 }
 0x11d   :  { %v902_v35 = vpop.permute.xlu0 %901 }
 0x11e   :  { %907 = vst.msk [vmem:[#allocation4 + $0x30] sm:$0xff] %vm838_vm0, %v902_v35 }
 0x122   :  { %v856_v36 = vpop.permute.xlu1 %855  ;;  %v947_v47 = vld [vmem:[#allocation4 + $0x10] sm:$0xff] }
 0x123   :  { %860 = vst.msk [vmem:[#allocation4 + $0x18] sm:$0xff] %vm838_vm0, %v856_v36  ;;  %v1035_v36 = vld [vmem:[%s8457_s1 + $0x28] sm:$0xff] }
 0x125   :  { %v904_v37 = vpop.permute.xlu0 %903  ;;  %v951_v39 = vld [vmem:[#allocation4 + $0x30] sm:$0xff] }
 0x126   :  { %908 = vst.msk [vmem:[#allocation4 + $0x38] sm:$0xff] %vm838_vm0, %v904_v37 }
 0x12a   :  { %v948_v48 = vld [vmem:[#allocation4 + $0x18] sm:$0xff] }
 0x12b   :  { %v954_v49 = vpack.c.bf16 %v948_v48, %v947_v47 }
 0x12d   :  { %v952_v40 = vld [vmem:[#allocation4 + $0x38] sm:$0xff]  ;;  %v985_v51 = vsel %vm838_vm0, %v954_v49, 0 }
 0x12e   :  { %v956_v41 = vpack.c.bf16 %v952_v40, %v951_v39 }
 0x130   :  { %v991_v42 = vsel %vm838_vm0, %v956_v41, 0 }
 0x131   :  { %997 = vmatpush.bf16.xpose.msrb.mxu0 %v991_v42 }
 0x139   :  { %998 = vmatpush.bf16.xpose.msrb.mxu0 %v988_v46 }
 0x141   :  { %999 = vmatpush.bf16.xpose.msrb.mxu0 %v985_v51 }
 0x142   :  { %v878_v50 = vpop.permute.xlu2 %877 }
 0x143   :  { %883 = vst.msk [vmem:[#allocation3 + $0x10] sm:$0xff] %vm838_vm0, %v878_v50 }
 0x149   :  { %1000 = vmatpush.bf16.xpose.msrb.mxu0 %v982_v54 }
 0x14a   :  { %v880_v38 = vpop.permute.xlu2 %879  ;;  %v935_v58 = vld [vmem:[#allocation3 + $0x10] sm:$0xff] }
 0x14b   :  { %884 = vst.msk [vmem:[#allocation3 + $0x18] sm:$0xff] %vm838_vm0, %v880_v38 }
 0x150   :  { %4118 = vmatmul.msk.bf16.vlgmr.msrb.gmra.mxu0 %vm838_vm0, %v941_v57 }
 0x152   :  { %v936_v59 = vld [vmem:[#allocation3 + $0x18] sm:$0xff] }
 0x153   :  { %v942_v60 = vpack.c.bf16 %v936_v59, %v935_v58 }
 0x15d   :  { %v926_v61 = vpop.permute.xlu0 %925 }
 0x15e   :  { %931 = vst.msk [vmem:[#allocation3 + $0x30] sm:$0xff] %vm838_vm0, %v926_v61 }
 0x160   :  { %4119 = vmatmul.msk.bf16.gmra.mxu0 %vm838_vm0, %v942_v60 }
 0x165   :  { %v928_v62 = vpop.permute.xlu1 %927  ;;  %v939_v4 = vld [vmem:[#allocation3 + $0x30] sm:$0xff] }
 0x166   :  { %932 = vst.msk [vmem:[#allocation3 + $0x38] sm:$0xff] %vm838_vm0, %v928_v62 }
 0x16d   :  { %v914_v3 = vpop.permute.xlu1 %913  ;;  %v940_v5 = vld [vmem:[#allocation3 + $0x38] sm:$0xff] }
 0x16e   :  { %919 = vst.msk [vmem:[#allocation5 + $0x30] sm:$0xff] %vm838_vm0, %v914_v3  ;;  %v944_v6 = vpack.c.bf16 %v940_v5, %v939_v4 }
 0x170   :  { %4120 = vmatmul.msk.bf16.gmra.mxu0 %vm838_vm0, %v943_v2 }
 0x180   :  { %4121 = vmatmul.msk.bf16.gmra.mxu0 %vm838_vm0, %v944_v6 }
 0x1cd   :  { %v1002_v8 = vpop.f32.mrf.mxu0 }
 0x1ce   :  { %v1022_v10 = vmul.f32 0.25, %v1002_v8 }
 0x1d0   :  { %v1038_v11 = vadd.f32 %v1030_v9, %v1022_v10 }
 0x1d2   :  { %v1046_v12 = vsel %vm838_vm0, %v1038_v11, -inf }
 0x1d3   :  { %1047 = vmax.xlane.f32.xlu2 %v1046_v12 }
 0x1d5   :  { %v1004_v13 = vpop.f32.mrf.mxu0 }
 0x1d6   :  { %v1023_v16 = vmul.f32 0.25, %v1004_v13 }
 0x1d8   :  { %v1039_v17 = vadd.f32 %v1031_v15, %v1023_v16  ;;  %v963_v15 = vld [vmem:[#allocation5 + $0x30] sm:$0xff] }
 0x1da   :  { %v1049_v18 = vsel %vm838_vm0, %v1039_v17, -inf }
 0x1db   :  { %1050 = vmax.xlane.f32.xlu0 %v1049_v18  ;;  %v961_v18 = vld [vmem:[#allocation5 + $0x20] sm:$0xff] }
 0x1dd   :  { %v1007_v19 = vpop.f32.mrf.mxu0 }
 0x1de   :  { %v1024_v21 = vmul.f32 0.25, %v1007_v19  ;;  %v962_v19 = vld [vmem:[#allocation5 + $0x28] sm:$0xff] }
 0x1e0   :  { %v1040_v22 = vadd.f32 %v1032_v20, %v1024_v21 }
 0x1e2   :  { %v1052_v23 = vsel %vm838_vm0, %v1040_v22, -inf }
 0x1e3   :  { %1053 = vmax.xlane.f32.xlu1 %v1052_v23 }
 0x1e5   :  { %v1009_v24 = vpop.f32.mrf.mxu0 }
 0x1e6   :  { %v1025_v26 = vmul.f32 0.25, %v1009_v24 }
 0x1e8   :  { %v1041_v27 = vadd.f32 %v1033_v25, %v1025_v26 }
 0x1ea   :  { %v1055_v28 = vsel %vm838_vm0, %v1041_v27, -inf }
 0x1eb   :  { %1056 = vmax.xlane.f32.xlu2 %v1055_v28  ;;  %v958_v28 = vld [vmem:[#allocation5 + $0x8] sm:$0xff] }
 0x1ed   :  { %v1012_v29 = vpop.f32.mrf.mxu0 }
 0x1ee   :  { %v1026_v31 = vmul.f32 0.25, %v1012_v29 }
 0x1f0   :  { %v1042_v32 = vadd.f32 %v1034_v30, %v1026_v31 }
 0x1f2   :  { %v1058_v33 = vsel %vm838_vm0, %v1042_v32, -inf }
 0x1f3   :  { %1059 = vmax.xlane.f32.xlu2 %v1058_v33 }
 0x1f5   :  { %v1014_v35 = vpop.f32.mrf.mxu0 }
 0x1f6   :  { %v1027_v37 = vmul.f32 0.25, %v1014_v35 }
 0x1f8   :  { %v1043_v39 = vadd.f32 %v1035_v36, %v1027_v37 }
 0x1fa   :  { %v1061_v40 = vsel %vm838_vm0, %v1043_v39, -inf }
 0x1fb   :  { %1062 = vmax.xlane.f32.xlu0 %v1061_v40 }
 0x1fc   :  { %867 = vrot.lane.b32.xlu1 %v6420_v7, %s5718_s2  ;;  %v1036_v7 = vld [vmem:[%s8457_s1 + $0x30] sm:$0xff] }
 0x1fd   :  { %v1017_v41 = vpop.f32.mrf.mxu0 }
 0x1fe   :  { %v1028_v46 = vmul.f32 0.25, %v1017_v41 }
 0x200   :  { %v6497_v47 = vadd.f32 %v1036_v7, %v1028_v46 }
 0x205   :  { %v1019_v42 = vpop.f32.mrf.mxu0 }
 0x206   :  { %v1029_v43 = vmul.f32 0.25, %v1019_v42 }
 0x208   :  { %v6490_v45 = vadd.f32 %v1037_v44, %v1029_v43 }
 0x20b   :  { %915 = vrot.lane.b32.xlu2 %v6425_v14, %s5718_s2  ;;  %v1067_v14 = vsel %vm838_vm0, %v6490_v45, -inf }
 0x20f   :  { %865 = vrot.lane.b32.xlu0 %v6415_v1, %s5718_s2  ;;  %v1064_v1 = vsel %vm838_vm0, %v6497_v47, -inf }
 0x234   :  { %1068 = vmax.xlane.f32.xlu2 %v1067_v14 }
 0x239   :  { %1065 = vmax.xlane.f32.xlu0 %v1064_v1 }
 0x246   :  { %v1048_v48 = vpop.xlane.xlu2 %1047 }
 0x247   :  { %v1070_v49 = vsub.f32 %v1038_v11, %v1048_v48 }
 0x249   :  { %v1078_v50 = vmul.f32 1.442695, %v1070_v49 }
 0x24b   :  { %5672 = vpow2.f32 %v1078_v50 }
 0x24e   :  { %v1051_v51 = vpop.xlane.xlu0 %1050 }
 0x24f   :  { %v1071_v34 = vsub.f32 %v1039_v17, %v1051_v51 }
 0x251   :  { %v6501_v52 = vpop.eup %5672  ;;  %v1080_v53 = vmul.f32 1.442695, %v1071_v34 }
 0x252   :  { %v1094_v38 = vsel %vm838_vm0, %v6501_v52, 0.0 }
 0x253   :  { %5674 = vpow2.f32 %v1080_v53  ;;  %1095 = vadd.xlane.f32.xlu1 %v1094_v38 }
 0x256   :  { %v1054_v54 = vpop.xlane.xlu1 %1053 }
 0x257   :  { %v1072_v55 = vsub.f32 %v1040_v22, %v1054_v54  ;;  %v967_v22 = vpack.c.bf16 %v962_v19, %v961_v18  ;;  %v5384_v18 = vld [vmem:[%s8458_s4 + $0x14] sm:$0xf] }
 0x259   :  { %v6505_v56 = vpop.eup %5674  ;;  %v1082_v57 = vmul.f32 1.442695, %v1072_v55 }
 0x25a   :  { %v1097_v58 = vsel %vm838_vm0, %v6505_v56, 0.0 }
 0x25b   :  { %5676 = vpow2.f32 %v1082_v57  ;;  %1098 = vadd.xlane.f32.xlu0 %v1097_v58 }
 0x25e   :  { %v1057_v59 = vpop.xlane.xlu2 %1056 }
 0x25f   :  { %v1073_v60 = vsub.f32 %v1041_v27, %v1057_v59  ;;  %v957_v27 = vld [vmem:[#allocation5] sm:$0xff] }
 0x260   :  { %v965_v29 = vpack.c.bf16 %v958_v28, %v957_v27  ;;  %v4186_v28 = vld [vmem:[%s8458_s4 + $0x70] sm:$0xf] }
 0x261   :  { %v6509_v61 = vpop.eup %5676  ;;  %v1084_v62 = vmul.f32 1.442695, %v1073_v60 }
 0x262   :  { %v1100_v63 = vsel %vm838_vm0, %v6509_v61, 0.0 }
 0x263   :  { %5678 = vpow2.f32 %v1084_v62  ;;  %1101 = vadd.xlane.f32.xlu2 %v1100_v63 }
 0x266   :  { %v1060_v0 = vpop.xlane.xlu2 %1059 }
 0x267   :  { %v1074_v2 = vsub.f32 %v1042_v32, %v1060_v0 }
 0x269   :  { %v6513_v3 = vpop.eup %5678  ;;  %v1086_v4 = vmul.f32 1.442695, %v1074_v2  ;;  %v4152_v2 = vld [vmem:[%s8458_s4 + $0x30] sm:$0xf] }
 0x26a   :  { %v1103_v5 = vsel %vm838_vm0, %v6513_v3, 0.0 }
 0x26b   :  { %5680 = vpow2.f32 %v1086_v4  ;;  %1104 = vadd.xlane.f32.xlu1 %v1103_v5  ;;  %v5388_v4 = vld [vmem:[%s8458_s4 + $0x34] sm:$0xf] }
 0x26e   :  { %v868_v6 = vpop.permute.xlu1 %867  ;;  %v916_v8 = vpop.permute.xlu2 %915 }
 0x26f   :  { %872 = vst.msk [vmem:[#allocation5 + $0x18] sm:$0xff] %vm838_vm0, %v868_v6  ;;  %v1063_v9 = vpop.xlane.xlu0 %1062  ;;  %v4154_v6 = vld [vmem:[%s8458_s4 + $0x38] sm:$0xf0] }
 0x270   :  { %920 = vst.msk [vmem:[#allocation5 + $0x38] sm:$0xff] %vm838_vm0, %v916_v8  ;;  %v1075_v10 = vsub.f32 %v1043_v39, %v1063_v9  ;;  %v4157_v8 = vor.u32 %v5388_v4, %v4154_v6  ;;  %v4144_v9 = vld [vmem:[%s8458_s4 + $0x20] sm:$0xf]  ;;  %v4204_v4 = vld [vmem:[%s8458_s4 + $0x90] sm:$0xf] }
 0x271   :  { %v6519_v11 = vpop.eup %5680  ;;  %v5400_v6 = vld [vmem:[%s8458_s4 + $0x94] sm:$0xf] }
 0x272   :  { %v1088_v12 = vmul.f32 1.442695, %v1075_v10  ;;  %v1106_v13 = vsel %vm838_vm0, %v6519_v11, 0.0  ;;  %1260 = vmatpush.bf16.msrb.mxu3 %v4157_v8  ;;  %v5387_v10 = vld [vmem:[%s8458_s4 + $0x24] sm:$0xf0] }
 0x273   :  { %1107 = vadd.xlane.f32.xlu0 %v1106_v13  ;;  %v4146_v13 = vld [vmem:[%s8458_s4 + $0x28] sm:$0xf0]  ;;  %v4206_v8 = vld [vmem:[%s8458_s4 + $0x98] sm:$0xf0] }
 0x274   :  { %5682 = vpow2.f32 %v1088_v12  ;;  %v4145_v12 = vor.u32 %v5387_v10, %v4144_v9 }
 0x276   :  { %v960_v25 = vld [vmem:[#allocation5 + $0x18] sm:$0xff] }
 0x277   :  { %v964_v16 = vld [vmem:[#allocation5 + $0x38] sm:$0xff] }
 0x278   :  { %v968_v17 = vpack.c.bf16 %v964_v16, %v963_v15  ;;  %v4136_v16 = vld [vmem:[%s8458_s4 + $0x10] sm:$0xf] }
 0x27a   :  { %v5683_v20 = vpop.eup %5682  ;;  %1154 = vmatpush.bf16.msrb.mxu1 %v968_v17  ;;  %v5385_v17 = vld [vmem:[%s8458_s4 + $0x14] sm:$0xf0] }
 0x27b   :  { %v1109_v21 = vsel %vm838_vm0, %v5683_v20, 0.0  ;;  %v4137_v19 = vor.u32 %v5385_v17, %v4136_v16  ;;  %v4198_v16 = vld [vmem:[%s8458_s4 + $0x88] sm:$0xf0] }
 0x27c   :  { %1110 = vadd.xlane.f32.xlu2 %v1109_v21 }
 0x27e   :  { %1155 = vmatpush.bf16.msrb.mxu1 %v967_v22  ;;  %v4128_v22 = vld [vmem:[%s8458_s4] sm:$0xf] }
 0x281   :  { %v866_v23 = vpop.permute.xlu0 %865 }
 0x282   :  { %871 = vst.msk [vmem:[#allocation5 + $0x10] sm:$0xff] %vm838_vm0, %v866_v23  ;;  %v5383_v23 = vld [vmem:[%s8458_s4 + $0x4] sm:$0xf0] }
 0x289   :  { %v959_v24 = vld [vmem:[#allocation5 + $0x10] sm:$0xff] }
 0x28a   :  { %v966_v26 = vpack.c.bf16 %v960_v25, %v959_v24  ;;  %v5382_v24 = vld [vmem:[%s8458_s4 + $0x4] sm:$0xf]  ;;  %v4129_v25 = vor.u32 %v5383_v23, %v4128_v22 }
 0x28c   :  { %1156 = vmatpush.bf16.msrb.mxu1 %v966_v26  ;;  %v4130_v26 = vld [vmem:[%s8458_s4 + $0x8] sm:$0xf0] }
 0x28d   :  { %v4133_v27 = vor.u32 %v5382_v24, %v4130_v26 }
 0x290   :  { %1157 = vmatpush.bf16.msrb.mxu1 %v965_v29  ;;  %v5397_v29 = vld [vmem:[%s8458_s4 + $0x74] sm:$0xf0] }
 0x2a7   :  { %v1069_v30 = vpop.xlane.xlu2 %1068 }
 0x2a8   :  { %v1077_v31 = vsub.f32 %v6490_v45, %v1069_v30  ;;  %v5396_v30 = vld [vmem:[%s8458_s4 + $0x74] sm:$0xf] }
 0x2aa   :  { %v1092_v32 = vmul.f32 1.442695, %v1077_v31  ;;  %v4187_v31 = vor.u32 %v5397_v29, %v4186_v28  ;;  %v5413_v28 = vld [vmem:[%s8458_s4 + $0xf4] sm:$0xf0]  ;;  %v5412_v29 = vld [vmem:[%s8458_s4 + $0xf4] sm:$0xf] }
 0x2ac   :  { %5684 = vpow2.f32 %v1092_v32  ;;  %v1066_v33 = vpop.xlane.xlu0 %1065  ;;  %v4188_v32 = vld [vmem:[%s8458_s4 + $0x78] sm:$0xf0] }
 0x2ad   :  { %v1076_v35 = vsub.f32 %v6497_v47, %v1066_v33  ;;  %v4191_v33 = vor.u32 %v5396_v30, %v4188_v32 }
 0x2af   :  { %v1090_v36 = vmul.f32 1.442695, %v1076_v35  ;;  %v4178_v35 = vld [vmem:[%s8458_s4 + $0x60] sm:$0xf] }
 0x2b1   :  { %5686 = vpow2.f32 %v1090_v36  ;;  %v5395_v36 = vld [vmem:[%s8458_s4 + $0x64] sm:$0xf0] }
 0x2b2   :  { %v5685_v37 = vpop.eup %5684 }
 0x2b3   :  { %v1115_v39 = vsel %vm838_vm0, %v5685_v37, 0.0 }
 0x2b4   :  { %1116 = vadd.xlane.f32.xlu0 %v1115_v39  ;;  %v4179_v39 = vor.u32 %v5395_v36, %v4178_v35  ;;  %v5411_v35 = vld [vmem:[%s8458_s4 + $0xe4] sm:$0xf0]  ;;  %v5410_v36 = vld [vmem:[%s8458_s4 + $0xe4] sm:$0xf] }
 0x2b7   :  { %v5687_v40 = vpop.eup %5686 }
 0x2b8   :  { %v1112_v41 = vsel %vm838_vm0, %v5687_v40, 0.0 }
 0x2b9   :  { %1113 = vadd.xlane.f32.xlu1 %v1112_v41 }
 0x2c6   :  { %v1096_v42 = vpop.xlane.xlu1 %1095 }
 0x2c7   :  { %5688 = vrcp.f32 %v1096_v42  ;;  %v4170_v42 = vld [vmem:[%s8458_s4 + $0x50] sm:$0xf] }
 0x2cd   :  { %v5689_v44 = vpop.eup %5688 }
 0x2ce   :  { %v1099_v43 = vpop.xlane.xlu0 %1098  ;;  %v1126_v46 = vmul.f32 %v5689_v44, %v6501_v52  ;;  %v5392_v44 = vld [vmem:[%s8458_s4 + $0x54] sm:$0xf] }
 0x2cf   :  { %5690 = vrcp.f32 %v1099_v43  ;;  %v5393_v43 = vld [vmem:[%s8458_s4 + $0x54] sm:$0xf0] }
 0x2d5   :  { %v5691_v45 = vpop.eup %5690 }
 0x2d6   :  { %v1127_v7 = vmul.f32 %v5691_v45, %v6505_v56  ;;  %v1102_v47 = vpop.xlane.xlu2 %1101  ;;  %v4171_v45 = vor.u32 %v5393_v43, %v4170_v42  ;;  %v5409_v42 = vld [vmem:[%s8458_s4 + $0xd4] sm:$0xf0]  ;;  %v5408_v43 = vld [vmem:[%s8458_s4 + $0xd4] sm:$0xf] }
 0x2d7   :  { %5692 = vrcp.f32 %v1102_v47  ;;  %v5391_v47 = vld [vmem:[%s8458_s4 + $0x44] sm:$0xf0] }
 0x2d8   :  { %v1134_v14 = vpack.c.bf16 %v1127_v7, %v1126_v46  ;;  %v4172_v46 = vld [vmem:[%s8458_s4 + $0x58] sm:$0xf0] }
 0x2d9   :  { %v4175_v7 = vor.u32 %v5392_v44, %v4172_v46  ;;  %v4230_v46 = vld [vmem:[%s8458_s4 + $0xc0] sm:$0xf] }
 0x2da   :  { %4122 = vmatmul.msk.bf16.vlgmr.msrb.gmra.mxu1 %vm838_vm0, %v1134_v14  ;;  %v4162_v14 = vld [vmem:[%s8458_s4 + $0x40] sm:$0xf] }
 0x2dd   :  { %v5693_v48 = vpop.eup %5692 }
 0x2de   :  { %v1105_v1 = vpop.xlane.xlu1 %1104  ;;  %v1128_v50 = vmul.f32 %v5693_v48, %v6509_v61  ;;  %v4163_v48 = vor.u32 %v5391_v47, %v4162_v14  ;;  %v5406_v47 = vld [vmem:[%s8458_s4 + $0xc4] sm:$0xf] }
 0x2df   :  { %5694 = vrcp.f32 %v1105_v1  ;;  %v5390_v1 = vld [vmem:[%s8458_s4 + $0x44] sm:$0xf] }
 0x2e5   :  { %v5695_v49 = vpop.eup %5694 }
 0x2e6   :  { %v1129_v51 = vmul.f32 %v5695_v49, %v6513_v3  ;;  %v1108_v53 = vpop.xlane.xlu0 %1107  ;;  %v5389_v3 = vld [vmem:[%s8458_s4 + $0x34] sm:$0xf0]  ;;  %v4164_v49 = vld [vmem:[%s8458_s4 + $0x48] sm:$0xf0] }
 0x2e7   :  { %5696 = vrcp.f32 %v1108_v53  ;;  %v4153_v5 = vor.u32 %v5389_v3, %v4152_v2  ;;  %v4220_v53 = vld [vmem:[%s8458_s4 + $0xb0] sm:$0xf] }
 0x2e8   :  { %v1135_v34 = vpack.c.bf16 %v1129_v51, %v1128_v50  ;;  %v4167_v51 = vor.u32 %v5390_v1, %v4164_v49  ;;  %v4232_v1 = vld [vmem:[%s8458_s4 + $0xc8] sm:$0xf0] }
 0x2e9   :  { %1246 = vmatpush.bf16.msrb.mxu2 %v4153_v5  ;;  %v5401_v5 = vld [vmem:[%s8458_s4 + $0x94] sm:$0xf0]  ;;  %v4235_v49 = vor.u32 %v5406_v47, %v4232_v1  ;;  %v4490_v47 = vld [vmem:[%s8460_s8 + $0x1e0] sm:$0xf0] }
 0x2ea   :  { %4123 = vmatmul.msk.bf16.gmra.mxu1 %vm838_vm0, %v1135_v34  ;;  %v4205_v10 = vor.u32 %v5401_v5, %v4204_v4 }
 0x2ed   :  { %v5697_v38 = vpop.eup %5696  ;;  %1247 = vmatpush.bf16.msrb.mxu2 %v4145_v12  ;;  %v4196_v12 = vld [vmem:[%s8458_s4 + $0x80] sm:$0xf] }
 0x2ee   :  { %v1130_v55 = vmul.f32 %v5697_v38, %v6519_v11  ;;  %v5386_v11 = vld [vmem:[%s8458_s4 + $0x24] sm:$0xf]  ;;  %v5404_v38 = vld [vmem:[%s8458_s4 + $0xb4] sm:$0xf] }
 0x2ef   :  { %v1111_v52 = vpop.xlane.xlu2 %1110  ;;  %v4149_v15 = vor.u32 %v5386_v11, %v4146_v13  ;;  %v4209_v11 = vor.u32 %v5400_v6, %v4206_v8  ;;  %v5399_v13 = vld [vmem:[%s8458_s4 + $0x84] sm:$0xf0] }
 0x2f0   :  { %5698 = vrcp.f32 %v1111_v52  ;;  %v5405_v52 = vld [vmem:[%s8458_s4 + $0xb4] sm:$0xf0]  ;;  %v4197_v17 = vor.u32 %v5399_v13, %v4196_v12 }
 0x2f1   :  { %1261 = vmatpush.bf16.msrb.mxu3 %v4149_v15  ;;  %1248 = vmatpush.bf16.msrb.mxu2 %v4137_v19  ;;  %v5398_v15 = vld [vmem:[%s8458_s4 + $0x84] sm:$0xf] }
 0x2f5   :  { %1249 = vmatpush.bf16.msrb.mxu2 %v4129_v25 }
 0x2f6   :  { %v5699_v54 = vpop.eup %5698 }
 0x2f7   :  { %v1131_v56 = vmul.f32 %v5699_v54, %v5683_v20  ;;  %v4138_v20 = vld [vmem:[%s8458_s4 + $0x18] sm:$0xf0] }
 0x2f8   :  { %v4141_v21 = vor.u32 %v5384_v18, %v4138_v20  ;;  %v4222_v54 = vld [vmem:[%s8458_s4 + $0xb8] sm:$0xf0]  ;;  %v4201_v18 = vor.u32 %v5398_v15, %v4198_v16 }
 0x2f9   :  { %v1136_v57 = vpack.c.bf16 %v1131_v56, %v1130_v55  ;;  %1337 = vmatpush.bf16.msra.mxu2 %v4187_v31  ;;  %v4212_v55 = vld [vmem:[%s8458_s4 + $0xa0] sm:$0xf]  ;;  %v4256_v31 = vld [vmem:[%s8458_s4 + $0xf8] sm:$0xf0] }
 0x2fa   :  { %1262 = vmatpush.bf16.msrb.mxu3 %v4141_v21  ;;  %v4259_v32 = vor.u32 %v5412_v29, %v4256_v31 }
 0x2fb   :  { %4124 = vmatmul.msk.bf16.gmra.mxu1 %vm838_vm0, %v1136_v57 }
 0x2fd   :  { %1338 = vmatpush.bf16.msra.mxu2 %v4179_v39  ;;  %v4248_v39 = vld [vmem:[%s8458_s4 + $0xe8] sm:$0xf0] }
 0x2fe   :  { %1263 = vmatpush.bf16.msrb.mxu3 %v4133_v27  ;;  %v4254_v27 = vld [vmem:[%s8458_s4 + $0xf0] sm:$0xf] }
 0x2ff   :  { %v4255_v30 = vor.u32 %v5413_v28, %v4254_v27 }
 0x301   :  { %1339 = vmatpush.bf16.msra.mxu2 %v4171_v45  ;;  %v4240_v45 = vld [vmem:[%s8458_s4 + $0xd8] sm:$0xf0] }
 0x302   :  { %1351 = vmatpush.bf16.msra.mxu3 %v4191_v33  ;;  %v4246_v33 = vld [vmem:[%s8458_s4 + $0xe0] sm:$0xf]  ;;  %v4243_v14 = vor.u32 %v5408_v43, %v4240_v45 }
 0x303   :  { %v4488_v43 = vld [vmem:[%s8460_s8 + $0x1c0] sm:$0xf] }
 0x304   :  { %v4744_v45 = vld [vmem:[%s8460_s8 + $0x3c0] sm:$0xf] }
 0x305   :  { %1340 = vmatpush.bf16.msra.mxu2 %v4163_v48 }
 0x327   :  { %v1117_v58 = vpop.xlane.xlu0 %1116 }
 0x328   :  { %5700 = vrcp.f32 %v1117_v58 }
 0x32c   :  { %v1114_v59 = vpop.xlane.xlu1 %1113 }
 0x32d   :  { %5702 = vrcp.f32 %v1114_v59  ;;  %v4221_v59 = vor.u32 %v5405_v52, %v4220_v53 }
 0x32e   :  { %v5701_v60 = vpop.eup %5700 }
 0x32f   :  { %v1133_v63 = vmul.f32 %v5701_v60, %v5685_v37  ;;  %v5394_v37 = vld [vmem:[%s8458_s4 + $0x64] sm:$0xf]  ;;  %v4225_v60 = vor.u32 %v5404_v38, %v4222_v54 }
 0x333   :  { %v5703_v61 = vpop.eup %5702 }
 0x334   :  { %v1132_v62 = vmul.f32 %v5703_v61, %v5687_v40  ;;  %v4180_v40 = vld [vmem:[%s8458_s4 + $0x68] sm:$0xf0]  ;;  %v5403_v61 = vld [vmem:[%s8458_s4 + $0xa4] sm:$0xf0] }
 0x335   :  { %v4183_v41 = vor.u32 %v5394_v37, %v4180_v40  ;;  %v4213_v2 = vor.u32 %v5403_v61, %v4212_v55  ;;  %v4247_v37 = vor.u32 %v5411_v35, %v4246_v33  ;;  %v4251_v40 = vor.u32 %v5410_v36, %v4248_v39  ;;  %v5717_v35 = vld [vmem:[%s8455_s0 + $0x18] sm:$0xff] }
 0x336   :  { %v1137_v0 = vpack.c.bf16 %v1133_v63, %v1132_v62  ;;  %v5402_v63 = vld [vmem:[%s8458_s4 + $0xa4] sm:$0xf]  ;;  %v5719_v39 = vmov 256.0  }
 0x337   :  { %1352 = vmatpush.bf16.msra.mxu3 %v4183_v41  ;;  %v4238_v41 = vld [vmem:[%s8458_s4 + $0xd0] sm:$0xf]  ;;  %5704 = vrcp.f32 %v5719_v39  ;;  %v4362_v39 = vld [vmem:[%s8460_s8 + $0xe0] sm:$0xf0] }
 0x338   :  { %4125 = vmatmul.msk.bf16.gmra.mxu1 %vm838_vm0, %v1137_v0  ;;  %v4214_v0 = vld [vmem:[%s8458_s4 + $0xa8] sm:$0xf0]  ;;  %v4239_v44 = vor.u32 %v5409_v42, %v4238_v41 }
 0x339   :  { %v4217_v3 = vor.u32 %v5402_v63, %v4214_v0  ;;  %v1187_v63 = vld [vmem:[%s8459_s5] sm:$0x3] }
 0x33a   :  { %v1271_v0 = vperm.slane %v1187_v63, 0 }
 0x33b   :  { %1353 = vmatpush.bf16.msra.mxu3 %v4175_v7  ;;  %v5407_v7 = vld [vmem:[%s8458_s4 + $0xc4] sm:$0xf0] }
 0x33c   :  { %v4231_v48 = vor.u32 %v5407_v7, %v4230_v46  ;;  %v5538_v7 = vld [vmem:[%s8460_s8 + $0x3dc] sm:$0xf0] }
 0x33d   :  { %v4745_v1 = vor.u32 %v5538_v7, %v4744_v45 }
 0x33f   :  { %1354 = vmatpush.bf16.msra.mxu3 %v4167_v51  ;;  %2420 = vmatpush.bf16.msra.mxu0 %v4745_v1 }
 0x357   :  { %v1159_v50 = vpop.f32.mrf.mxu1 }
 0x358   :  { %1179 = vst.msk [vmem:[#allocation6] sm:$0xff] %vm838_vm0, %v1159_v50 }
 0x35f   :  { %v1161_v34 = vpop.f32.mrf.mxu1  ;;  %v1188_v57 = vld [vmem:[#allocation6] sm:$0xff] }
 0x360   :  { %1180 = vst.msk [vmem:[#allocation6 + $0x8] sm:$0xff] %vm838_vm0, %v1161_v34 }
 0x367   :  { %v1164_v56 = vpop.f32.mrf.mxu1  ;;  %v1189_v58 = vld [vmem:[#allocation6 + $0x8] sm:$0xff] }
 0x368   :  { %1181 = vst.msk [vmem:[#allocation6 + $0x10] sm:$0xff] %vm838_vm0, %v1164_v56  ;;  %v1190_v62 = vpack.c.bf16 %v1189_v58, %v1188_v57 }
 0x36a   :  { %4158 = vmatmul.msk.bf16.vlgmr.msrb.gmra.mxu2 %vm838_vm0, %v1190_v62  ;;  %4159 = vmatmul.msk.bf16.vlgmr.msrb.gmra.mxu3 %vm838_vm0, %v1190_v62 }
 0x36b   :  { %1423 = vmatpush.bf16.msrb.mxu2 %v4221_v59  ;;  %1437 = vmatpush.bf16.msrb.mxu3 %v4225_v60 }
 0x36f   :  { %v1166_v9 = vpop.f32.mrf.mxu1  ;;  %1424 = vmatpush.bf16.msrb.mxu2 %v4213_v2  ;;  %1438 = vmatpush.bf16.msrb.mxu3 %v4217_v3  ;;  %v1279_v19 = vld [vmem:[#allocation6 + $0x10] sm:$0xff]  ;;  %v1272_v2 = vperm.slane %v1187_v63, 1  ;;  %v5458_v63 = vld [vmem:[%s8460_s8 + $0x15c] sm:$0xf0] }
 0x370   :  { %1182 = vst.msk [vmem:[#allocation6 + $0x18] sm:$0xff] %vm838_vm0, %v1166_v9 }
 0x373   :  { %1425 = vmatpush.bf16.msrb.mxu2 %v4205_v10  ;;  %1439 = vmatpush.bf16.msrb.mxu3 %v4209_v11 }
 0x377   :  { %v1280_v20 = vld [vmem:[#allocation6 + $0x18] sm:$0xff]  ;;  %1426 = vmatpush.bf16.msrb.mxu2 %v4197_v17  ;;  %1440 = vmatpush.bf16.msrb.mxu3 %v4201_v18 }
 0x378   :  { %v1169_v21 = vpop.f32.mrf.mxu1  ;;  %v1281_v22 = vpack.c.bf16 %v1280_v20, %v1279_v19  ;;  %v5714_v19 = vld [vmem:[%s8455_s0] sm:$0xff] }
 0x379   :  { %1183 = vst.msk [vmem:[#allocation6 + $0x20] sm:$0xff] %vm838_vm0, %v1169_v21  ;;  %v5715_v21 = vld [vmem:[%s8455_s0 + $0x8] sm:$0xff] }
 0x37a   :  { %4192 = vmatmul.msk.bf16.vlgmr.msra.gmra.mxu2 %vm838_vm0, %v1281_v22  ;;  %4193 = vmatmul.msk.bf16.vlgmr.msra.gmra.mxu3 %vm838_vm0, %v1281_v22 }
 0x37b   :  { %1509 = vmatpush.bf16.msra.mxu2 %v4255_v30  ;;  %1523 = vmatpush.bf16.msra.mxu3 %v4259_v32  ;;  %v5716_v32 = vld [vmem:[%s8455_s0 + $0x10] sm:$0xff] }
 0x37f   :  { %1510 = vmatpush.bf16.msra.mxu2 %v4247_v37  ;;  %1524 = vmatpush.bf16.msra.mxu3 %v4251_v40  ;;  %v6773_v40 = vpop.eup %5704 }
 0x380   :  { %v1171_v23 = vpop.f32.mrf.mxu1  ;;  %v1365_v24 = vld [vmem:[#allocation6 + $0x20] sm:$0xff]  ;;  %v1548_v41 = vmul.f32 256.0, %v6773_v40  ;;  %vm1552_vm1 = vweird.f32 %v6773_v40 }
 0x381   :  { %1184 = vst.msk [vmem:[#allocation6 + $0x28] sm:$0xff] %vm838_vm0, %v1171_v23 }
 0x382   :  { %v1549_v42 = vsub.f32 1.0, %v1548_v41  ;;  %v5502_v41 = vld [vmem:[%s8460_s8 + $0x2c4] sm:$0xf] }
 0x383   :  { %1511 = vmatpush.bf16.msra.mxu2 %v4239_v44  ;;  %1525 = vmatpush.bf16.msra.mxu3 %v4243_v14  ;;  %v5474_v44 = vld [vmem:[%s8460_s8 + $0x1dc] sm:$0xf0]  ;;  %v5470_v14 = vld [vmem:[%s8460_s8 + $0x1c4] sm:$0xf] }
 0x384   :  { %v4489_v46 = vor.u32 %v5474_v44, %v4488_v43 }
 0x386   :  { %2406 = vmatpush.bf16.msra.mxu1 %v4489_v46 }
 0x387   :  { %1512 = vmatpush.bf16.msra.mxu2 %v4231_v48  ;;  %1526 = vmatpush.bf16.msra.mxu3 %v4235_v49  ;;  %v4493_v48 = vor.u32 %v5470_v14, %v4490_v47  ;;  %v5534_v49 = vld [vmem:[%s8460_s8 + $0x3c4] sm:$0xf] }
 0x388   :  { %v1366_v25 = vld [vmem:[#allocation6 + $0x28] sm:$0xff] }
 0x389   :  { %v1367_v26 = vpack.c.bf16 %v1366_v25, %v1365_v24 }
 0x38b   :  { %4226 = vmatmul.msk.bf16.vlgmr.msrb.gmra.mxu2 %vm838_vm0, %v1367_v26  ;;  %4227 = vmatmul.msk.bf16.vlgmr.msrb.gmra.mxu3 %vm838_vm0, %v1367_v26 }
 0x38c   :  { %2434 = vmatpush.bf16.msrb.mxu2 %v4493_v48 }
 0x3b5   :  { %v1174_v50 = vpop.f32.mrf.mxu1 }
 0x3b6   :  { %1185 = vst.msk [vmem:[#allocation6 + $0x30] sm:$0xff] %vm838_vm0, %v1174_v50  ;;  %v4746_v50 = vld [vmem:[%s8460_s8 + $0x3e0] sm:$0xf0] }
 0x3bd   :  { %v1176_v51 = vpop.f32.mrf.mxu1  ;;  %v1451_v34 = vld [vmem:[#allocation6 + $0x30] sm:$0xff] }
 0x3be   :  { %1186 = vst.msk [vmem:[#allocation6 + $0x38] sm:$0xff] %vm838_vm0, %v1176_v51  ;;  %v4456_v51 = vld [vmem:[%s8460_s8 + $0x180] sm:$0xf] }
 0x3c5   :  { %v1452_v53 = vld [vmem:[#allocation6 + $0x38] sm:$0xff] }
 0x3c6   :  { %v1453_v52 = vpack.c.bf16 %v1452_v53, %v1451_v34  ;;  %v4749_v34 = vor.u32 %v5534_v49, %v4746_v50  ;;  %v5466_v53 = vld [vmem:[%s8460_s8 + $0x19c] sm:$0xf0] }
 0x3c8   :  { %4260 = vmatmul.msk.bf16.vlgmr.msra.gmra.mxu2 %vm838_vm0, %v1453_v52  ;;  %4261 = vmatmul.msk.bf16.vlgmr.msra.gmra.mxu3 %vm838_vm0, %v1453_v52  ;;  %v4712_v52 = vld [vmem:[%s8460_s8 + $0x380] sm:$0xf] }
 0x3c9   :  { %2448 = vmatpush.bf16.msrb.mxu3 %v4749_v34 }
 0x3ed   :  { %v1251_v38 = vpop.f32.mrf.mxu2  ;;  %v1265_v54 = vpop.f32.mrf.mxu3 }
 0x3ee   :  { %v1275_v5 = vadd.f32 %v1271_v0, %v1251_v38  ;;  %v1276_v6 = vadd.f32 %v1272_v2, %v1265_v54  ;;  %v5530_v38 = vld [vmem:[%s8460_s8 + $0x39c] sm:$0xf0]  ;;  %v4457_v54 = vor.u32 %v5466_v53, %v4456_v51 }
 0x3f0   :  { %2407 = vmatpush.bf16.msra.mxu1 %v4457_v54 }
 0x3f5   :  { %v1253_v55 = vpop.f32.mrf.mxu2  ;;  %v1267_v56 = vpop.f32.mrf.mxu3 }
 0x3f6   :  { %v1277_v17 = vadd.f32 %v1271_v0, %v1253_v55  ;;  %v1278_v18 = vadd.f32 %v1272_v2, %v1267_v56  ;;  %v4713_v55 = vor.u32 %v5530_v38, %v4712_v52  ;;  %v5462_v56 = vld [vmem:[%s8460_s8 + $0x184] sm:$0xf]  ;;  %v4680_v2 = vld [vmem:[%s8460_s8 + $0x340] sm:$0xf] }
 0x3f7   :  { %v4328_v38 = vld [vmem:[%s8460_s8 + $0x80] sm:$0xf] }
 0x3f8   :  { %2421 = vmatpush.bf16.msra.mxu0 %v4713_v55  ;;  %v5498_v55 = vld [vmem:[%s8460_s8 + $0x29c] sm:$0xf0] }
 0x3fd   :  { %v1342_v57 = vpop.f32.mrf.mxu2  ;;  %v1356_v58 = vpop.f32.mrf.mxu3 }
 0x3fe   :  { %v1361_v8 = vadd.f32 %v1342_v57, %v1275_v5  ;;  %v1362_v9 = vadd.f32 %v1356_v58, %v1276_v6  ;;  %v4458_v57 = vld [vmem:[%s8460_s8 + $0x1a0] sm:$0xf0] }
 0x3ff   :  { %v5526_v58 = vld [vmem:[%s8460_s8 + $0x384] sm:$0xf] }
 0x400   :  { %v4426_v6 = vld [vmem:[%s8460_s8 + $0x160] sm:$0xf0] }
 0x405   :  { %v1344_v59 = vpop.f32.mrf.mxu2  ;;  %v1358_v60 = vpop.f32.mrf.mxu3 }
 0x406   :  { %v1363_v23 = vadd.f32 %v1344_v59, %v1277_v17  ;;  %v1364_v24 = vadd.f32 %v1358_v60, %v1278_v18  ;;  %v1550_v59 = vmul.f32 %v6773_v40, %v1549_v42  ;;  %v4461_v60 = vor.u32 %v5462_v56, %v4458_v57  ;;  %v5514_v18 = vld [vmem:[%s8460_s8 + $0x31c] sm:$0xf0]  ;;  %v5430_v56 = vld [vmem:[%s8460_s8 + $0x84] sm:$0xf] }
 0x407   :  { %v4330_v57 = vld [vmem:[%s8460_s8 + $0xa0] sm:$0xf0] }
 0x408   :  { %2435 = vmatpush.bf16.msrb.mxu2 %v4461_v60  ;;  %v5494_v60 = vld [vmem:[%s8460_s8 + $0x284] sm:$0xf] }
 0x40e   :  { %v1428_v61 = vpop.f32.mrf.mxu2  ;;  %v1442_v62 = vpop.f32.mrf.mxu3 }
 0x40f   :  { %v1447_v10 = vadd.f32 %v1428_v61, %v1361_v8  ;;  %v1448_v11 = vadd.f32 %v1442_v62, %v1362_v9  ;;  %v4714_v61 = vld [vmem:[%s8460_s8 + $0x3a0] sm:$0xf0]  ;;  %v4424_v62 = vld [vmem:[%s8460_s8 + $0x140] sm:$0xf] }
 0x410   :  { %v4717_v0 = vor.u32 %v5526_v58, %v4714_v61  ;;  %v4425_v5 = vor.u32 %v5458_v63, %v4424_v62  ;;  %v5518_v8 = vld [vmem:[%s8460_s8 + $0x344] sm:$0xf]  ;;  %v4296_v63 = vld [vmem:[%s8460_s8 + $0x40] sm:$0xf] }
 0x411   :  { %v4682_v9 = vld [vmem:[%s8460_s8 + $0x360] sm:$0xf0] }
 0x412   :  { %2449 = vmatpush.bf16.msrb.mxu3 %v4717_v0  ;;  %v4685_v17 = vor.u32 %v5518_v8, %v4682_v9  ;;  %2408 = vmatpush.bf16.msra.mxu1 %v4425_v5  ;;  %v4586_v61 = vld [vmem:[%s8460_s8 + $0x2a0] sm:$0xf0]  ;;  %v5426_v0 = vld [vmem:[%s8460_s8 + $0x5c] sm:$0xf0] }
 0x413   :  { %v4589_v62 = vor.u32 %v5494_v60, %v4586_v61  ;;  %v5422_v5 = vld [vmem:[%s8460_s8 + $0x44] sm:$0xf]  ;;  %v5519_v61 = vld [vmem:[%s8460_s8 + $0x34c] sm:$0xf] }
 0x416   :  { %v1430_v3 = vpop.f32.mrf.mxu2  ;;  %v1444_v4 = vpop.f32.mrf.mxu3  ;;  %2450 = vmatpush.bf16.msrb.mxu3 %v4685_v17 }
 0x417   :  { %v1449_v26 = vadd.f32 %v1430_v3, %v1363_v23  ;;  %v1450_v27 = vadd.f32 %v1444_v4, %v1364_v24  ;;  %v5522_v3 = vld [vmem:[%s8460_s8 + $0x35c] sm:$0xf0]  ;;  %v5454_v4 = vld [vmem:[%s8460_s8 + $0x144] sm:$0xf] }
 0x418   :  { %v5510_v23 = vld [vmem:[%s8460_s8 + $0x304] sm:$0xf] }
 0x419   :  { %v4650_v24 = vld [vmem:[%s8460_s8 + $0x320] sm:$0xf0] }
 0x44b   :  { %v1514_v12 = vpop.f32.mrf.mxu2  ;;  %v1528_v13 = vpop.f32.mrf.mxu3 }
 0x44c   :  { %v1533_v15 = vadd.f32 %v1514_v12, %v1447_v10  ;;  %v1534_v16 = vadd.f32 %v1528_v13, %v1448_v11  ;;  %v4681_v10 = vor.u32 %v5522_v3, %v4680_v2  ;;  %v4429_v11 = vor.u32 %v5454_v4, %v4426_v6  ;;  %v4392_v12 = vld [vmem:[%s8460_s8 + $0x100] sm:$0xf]  ;;  %v4298_v6 = vld [vmem:[%s8460_s8 + $0x60] sm:$0xf0] }
 0x44d   :  { %v5450_v13 = vld [vmem:[%s8460_s8 + $0x11c] sm:$0xf0]  ;;  %v4297_v3 = vor.u32 %v5426_v0, %v4296_v63  ;;  %v4301_v9 = vor.u32 %v5422_v5, %v4298_v6  ;;  %v4400_v0 = vld [vmem:[%s8460_s8 + $0x108] sm:$0xf]  ;;  %v5447_v6 = vld [vmem:[%s8460_s8 + $0x10c] sm:$0xf] }
 0x44e   :  { %v6752_v20 = vadd.f32 %v5714_v19, %v1533_v15  ;;  %v6757_v22 = vadd.f32 %v5715_v21, %v1534_v16  ;;  %v4648_v15 = vld [vmem:[%s8460_s8 + $0x300] sm:$0xf]  ;;  %v1551_v16 = vadd.f32 %v6773_v40, %v1550_v59  ;;  %v5446_v19 = vld [vmem:[%s8460_s8 + $0x104] sm:$0xf]  ;;  %2422 = vmatpush.bf16.msra.mxu0 %v4681_v10  ;;  %2436 = vmatpush.bf16.msrb.mxu2 %v4429_v11  ;;  %v5515_v5 = vld [vmem:[%s8460_s8 + $0x324] sm:$0xf0] }
 0x44f   :  { %v4394_v21 = vld [vmem:[%s8460_s8 + $0x120] sm:$0xf0]  ;;  %v4333_v59 = vor.u32 %v5430_v56, %v4330_v57  ;;  %v4552_v2 = vld [vmem:[%s8460_s8 + $0x240] sm:$0xf]  ;;  %v5523_v56 = vld [vmem:[%s8460_s8 + $0x364] sm:$0xf0] }
 0x450   :  { %v1541_v25 = vadd.f32 %v6757_v22, %v6752_v20  ;;  %v5490_v4 = vld [vmem:[%s8460_s8 + $0x25c] sm:$0xf0]  ;;  %v5486_v10 = vld [vmem:[%s8460_s8 + $0x244] sm:$0xf]  ;;  %v5455_v57 = vld [vmem:[%s8460_s8 + $0x14c] sm:$0xf] }
 0x451   :  { %v4553_v8 = vor.u32 %v5490_v4, %v4552_v2  ;;  %v4554_v11 = vld [vmem:[%s8460_s8 + $0x260] sm:$0xf0]  ;;  %v5451_v2 = vld [vmem:[%s8460_s8 + $0x124] sm:$0xf0] }
 0x452   :  { %1542 = vadd.xlane.f32.xlu2 %v1541_v25  ;;  %v4393_v25 = vor.u32 %v5450_v13, %v4392_v12  ;;  %v4557_v12 = vor.u32 %v5486_v10, %v4554_v11  ;;  %v4264_v13 = vld [vmem:[%s8460_s8] sm:$0xf]  ;;  %v4401_v4 = vor.u32 %v5451_v2, %v4400_v0  ;;  %v5511_v11 = vld [vmem:[%s8460_s8 + $0x30c] sm:$0xf] }
 0x453   :  { %v1516_v28 = vpop.f32.mrf.mxu2  ;;  %v1530_v29 = vpop.f32.mrf.mxu3  ;;  %v5479_v2 = vld [vmem:[%s8460_s8 + $0x20c] sm:$0xf] }
 0x454   :  { %v1535_v30 = vadd.f32 %v1516_v28, %v1449_v26  ;;  %v1536_v31 = vadd.f32 %v1530_v29, %v1450_v27  ;;  %v4649_v26 = vor.u32 %v5514_v18, %v4648_v15  ;;  %v4397_v27 = vor.u32 %v5446_v19, %v4394_v21  ;;  %v4360_v28 = vld [vmem:[%s8460_s8 + $0xc0] sm:$0xf]  ;;  %2409 = vmatpush.bf16.msra.mxu1 %v4393_v25  ;;  %v5414_v19 = vld [vmem:[%s8460_s8 + $0x4] sm:$0xf] }
 0x455   :  { %v5442_v29 = vld [vmem:[%s8460_s8 + $0xdc] sm:$0xf0]  ;;  %v4266_v21 = vld [vmem:[%s8460_s8 + $0x20] sm:$0xf0] }
 0x456   :  { %v6764_v33 = vadd.f32 %v5716_v32, %v1535_v30  ;;  %v6769_v36 = vadd.f32 %v5717_v35, %v1536_v31  ;;  %v4616_v30 = vld [vmem:[%s8460_s8 + $0x2c0] sm:$0xf]  ;;  %v6885_v31 = vsel %vm1552_vm1, %v6773_v40, %v1551_v16  ;;  %v4653_v32 = vor.u32 %v5510_v23, %v4650_v24  ;;  %v4618_v40 = vld [vmem:[%s8460_s8 + $0x2e0] sm:$0xf0]  ;;  %2423 = vmatpush.bf16.msra.mxu0 %v4649_v26 }
 0x457   :  { %v5506_v35 = vld [vmem:[%s8460_s8 + $0x2dc] sm:$0xf0]  ;;  %v4361_v43 = vor.u32 %v5442_v29, %v4360_v28  ;;  %2437 = vmatpush.bf16.msrb.mxu2 %v4397_v27  ;;  %v4621_v7 = vor.u32 %v5502_v41, %v4618_v40  ;;  %v4269_v24 = vor.u32 %v5414_v19, %v4266_v21  ;;  %v5478_v25 = vld [vmem:[%s8460_s8 + $0x204] sm:$0xf]  ;;  %v4496_v27 = vld [vmem:[%s8460_s8 + $0x1c8] sm:$0xf] }
 0x458   :  { %v1544_v37 = vadd.f32 %v6769_v36, %v6764_v33  ;;  %v4617_v45 = vor.u32 %v5506_v35, %v4616_v30  ;;  %2451 = vmatpush.bf16.msrb.mxu3 %v4653_v32  ;;  %v5418_v15 = vld [vmem:[%s8460_s8 + $0x1c] sm:$0xf0]  ;;  %v4522_v26 = vld [vmem:[%s8460_s8 + $0x220] sm:$0xf0]  ;;  %v5475_v29 = vld [vmem:[%s8460_s8 + $0x1e4] sm:$0xf0] }
 0x459   :  { %2410 = vmatpush.bf16.msra.mxu1 %v4361_v43  ;;  %v4520_v16 = vld [vmem:[%s8460_s8 + $0x200] sm:$0xf]  ;;  %v4265_v17 = vor.u32 %v5418_v15, %v4264_v13  ;;  %v4525_v28 = vor.u32 %v5478_v25, %v4522_v26  ;;  %v4752_v30 = vld [vmem:[%s8460_s8 + $0x3c8] sm:$0xf]  ;;  %v4497_v35 = vor.u32 %v5475_v29, %v4496_v27  ;;  %v4498_v41 = vld [vmem:[%s8460_s8 + $0x1e8] sm:$0xf0] }
 0x45a   :  { %1545 = vadd.xlane.f32.xlu1 %v1544_v37  ;;  %v5438_v37 = vld [vmem:[%s8460_s8 + $0xc4] sm:$0xf]  ;;  %2424 = vmatpush.bf16.msra.mxu0 %v4617_v45  ;;  %v5482_v18 = vld [vmem:[%s8460_s8 + $0x21c] sm:$0xf0]  ;;  %v5539_v32 = vld [vmem:[%s8460_s8 + $0x3e4] sm:$0xf0] }
 0x45b   :  { %v4365_v46 = vor.u32 %v5438_v37, %v4362_v39  ;;  %v4521_v23 = vor.u32 %v5482_v18, %v4520_v16  ;;  %v4753_v37 = vor.u32 %v5539_v32, %v4752_v30  ;;  %v5471_v39 = vld [vmem:[%s8460_s8 + $0x1cc] sm:$0xf]  ;;  %v5467_v45 = vld [vmem:[%s8460_s8 + $0x1a4] sm:$0xf0] }
 0x45c   :  { %2452 = vmatpush.bf16.msrb.mxu3 %v4621_v7  ;;  %v5535_v40 = vld [vmem:[%s8460_s8 + $0x3cc] sm:$0xf]  ;;  %v4368_v15 = vld [vmem:[%s8460_s8 + $0xc8] sm:$0xf] }
 0x45d   :  { %2438 = vmatpush.bf16.msrb.mxu2 %v4365_v46  ;;  %v4754_v43 = vld [vmem:[%s8460_s8 + $0x3e8] sm:$0xf0]  ;;  %v5443_v16 = vld [vmem:[%s8460_s8 + $0xe4] sm:$0xf0] }
 0x45e   :  { %v4757_v46 = vor.u32 %v5535_v40, %v4754_v43  ;;  %v4369_v18 = vor.u32 %v5443_v16, %v4368_v15  ;;  %v5507_v19 = vld [vmem:[%s8460_s8 + $0x2e4] sm:$0xf0]  ;;  %v5439_v21 = vld [vmem:[%s8460_s8 + $0xcc] sm:$0xf] }
 0x45f   :  { %v5503_v26 = vld [vmem:[%s8460_s8 + $0x2cc] sm:$0xf]  ;;  %v4336_v29 = vld [vmem:[%s8460_s8 + $0x88] sm:$0xf] }
 0x460   :  { %2453 = vmatpush.bf16.msrb.mxu3 %v4589_v62  ;;  %v4690_v62 = vld [vmem:[%s8460_s8 + $0x368] sm:$0xf0]  ;;  %v5435_v30 = vld [vmem:[%s8460_s8 + $0xa4] sm:$0xf0] }
 0x461   :  { %2439 = vmatpush.bf16.msrb.mxu2 %v4333_v59  ;;  %v4693_v63 = vor.u32 %v5519_v61, %v4690_v62  ;;  %v4626_v27 = vld [vmem:[%s8460_s8 + $0x2e8] sm:$0xf0]  ;;  %v4592_v32 = vld [vmem:[%s8460_s8 + $0x288] sm:$0xf] }
 0x462   :  { %v5495_v43 = vld [vmem:[%s8460_s8 + $0x28c] sm:$0xf] }
 0x463   :  { %v5415_v61 = vld [vmem:[%s8460_s8 + $0xc] sm:$0xf] }
 0x464   :  { %2454 = vmatpush.bf16.msrb.mxu3 %v4557_v12  ;;  %v4658_v12 = vld [vmem:[%s8460_s8 + $0x328] sm:$0xf0] }
 0x465   :  { %2440 = vmatpush.bf16.msrb.mxu2 %v4301_v9  ;;  %v4661_v13 = vor.u32 %v5511_v11, %v4658_v12  ;;  %v4274_v62 = vld [vmem:[%s8460_s8 + $0x28] sm:$0xf0] }
 0x466   :  { %v4277_v0 = vor.u32 %v5415_v61, %v4274_v62  ;;  %v4730_v61 = vld [vmem:[%s8460_s8 + $0x3b0] sm:$0xf0] }
 0x468   :  { %2455 = vmatpush.bf16.msrb.mxu3 %v4525_v28  ;;  %v4629_v28 = vor.u32 %v5503_v26, %v4626_v27  ;;  %v1608_v27 = vld [vmem:[%s8462_s7] sm:$0x3] }
 0x469   :  { %2441 = vmatpush.bf16.msrb.mxu2 %v4269_v24 }
 0x46c   :  { %2504 = vmatpush.bf16.msra.mxu3 %v4757_v46 }
 0x4c5   :  { %v1543_v42 = vpop.xlane.xlu2 %1542 }
 0x4c6   :  { %v1554_v44 = vmul.f32 %v6885_v31, %v1543_v42  ;;  %v4501_v42 = vor.u32 %v5471_v39, %v4498_v41  ;;  %v5431_v39 = vld [vmem:[%s8460_s8 + $0x8c] sm:$0xf] }
 0x4c7   :  { %v4338_v41 = vld [vmem:[%s8460_s8 + $0xa8] sm:$0xf0] }
 0x4c8   :  { %v6904_v14 = vsub.f32 %v6752_v20, %v1554_v44  ;;  %v6907_v47 = vsub.f32 %v6757_v22, %v1554_v44  ;;  %v4464_v44 = vld [vmem:[%s8460_s8 + $0x188] sm:$0xf]  ;;  %2490 = vmatpush.bf16.msra.mxu2 %v4501_v42  ;;  %v4341_v42 = vor.u32 %v5431_v39, %v4338_v41 }
 0x4c9   :  { %v4465_v7 = vor.u32 %v5467_v45, %v4464_v44  ;;  %v4594_v44 = vld [vmem:[%s8460_s8 + $0x2a8] sm:$0xf0] }
 0x4ca   :  { %v1560_v1 = vmul.f32 %v6904_v14, %v6904_v14  ;;  %v1561_v48 = vmul.f32 %v6907_v47, %v6907_v47  ;;  %v4597_v45 = vor.u32 %v5495_v43, %v4594_v44 }
 0x4cc   :  { %v1564_v49 = vadd.f32 %v1561_v48, %v1560_v1  ;;  %v4720_v1 = vld [vmem:[%s8460_s8 + $0x388] sm:$0xf] }
 0x4cd   :  { %v1546_v50 = vpop.xlane.xlu1 %1545  ;;  %v5531_v48 = vld [vmem:[%s8460_s8 + $0x3a4] sm:$0xf0] }
 0x4ce   :  { %v1555_v51 = vmul.f32 %v6885_v31, %v1546_v50  ;;  %1565 = vadd.xlane.f32.xlu0 %v1564_v49  ;;  %v5463_v49 = vld [vmem:[%s8460_s8 + $0x18c] sm:$0xf]  ;;  %v4721_v50 = vor.u32 %v5531_v48, %v4720_v1  ;;  %v5427_v1 = vld [vmem:[%s8460_s8 + $0x64] sm:$0xf0] }
 0x4cf   :  { %v4560_v48 = vld [vmem:[%s8460_s8 + $0x248] sm:$0xf] }
 0x4d0   :  { %v6915_v20 = vsub.f32 %v6764_v33, %v1555_v51  ;;  %v6918_v22 = vsub.f32 %v6769_v36, %v1555_v51  ;;  %v5434_v33 = vld [vmem:[%s8460_s8 + $0x9c] sm:$0xf0]  ;;  %v4466_v51 = vld [vmem:[%s8460_s8 + $0x1a8] sm:$0xf0] }
 0x4d1   :  { %v4584_v36 = vld [vmem:[%s8460_s8 + $0x280] sm:$0xf]  ;;  %v4329_v54 = vor.u32 %v5434_v33, %v4328_v38  ;;  %v4432_v33 = vld [vmem:[%s8460_s8 + $0x148] sm:$0xf] }
 0x4d2   :  { %v1562_v34 = vmul.f32 %v6915_v20, %v6915_v20  ;;  %v1563_v53 = vmul.f32 %v6918_v22, %v6918_v22  ;;  %v4585_v58 = vor.u32 %v5498_v55, %v4584_v36  ;;  %v5459_v36 = vld [vmem:[%s8460_s8 + $0x164] sm:$0xf0] }
 0x4d3   :  { %2411 = vmatpush.bf16.msra.mxu1 %v4329_v54  ;;  %v4688_v54 = vld [vmem:[%s8460_s8 + $0x348] sm:$0xf]  ;;  %v4433_v55 = vor.u32 %v5459_v36, %v4432_v33  ;;  %v5487_v33 = vld [vmem:[%s8460_s8 + $0x24c] sm:$0xf] }
 0x4d4   :  { %v1567_v52 = vadd.f32 %v1563_v53, %v1562_v34  ;;  %2425 = vmatpush.bf16.msra.mxu0 %v4585_v58  ;;  %v5527_v34 = vld [vmem:[%s8460_s8 + $0x38c] sm:$0xf]  ;;  %v4689_v59 = vor.u32 %v5523_v56, %v4688_v54  ;;  %v4272_v56 = vld [vmem:[%s8460_s8 + $0x8] sm:$0xf] }
 0x4d5   :  { %v4722_v53 = vld [vmem:[%s8460_s8 + $0x3a8] sm:$0xf0] }
 0x4d6   :  { %1568 = vadd.xlane.f32.xlu2 %v1567_v52  ;;  %v4469_v52 = vor.u32 %v5463_v49, %v4466_v51  ;;  %v4725_v38 = vor.u32 %v5527_v34, %v4722_v53  ;;  %v4434_v58 = vld [vmem:[%s8460_s8 + $0x168] sm:$0xf0]  ;;  %v5491_v51 = vld [vmem:[%s8460_s8 + $0x264] sm:$0xf0] }
 0x4d7   :  { %2412 = vmatpush.bf16.msra.mxu1 %v4297_v3  ;;  %v4437_v60 = vor.u32 %v5455_v57, %v4434_v58  ;;  %v4656_v3 = vld [vmem:[%s8460_s8 + $0x308] sm:$0xf]  ;;  %v5423_v34 = vld [vmem:[%s8460_s8 + $0x4c] sm:$0xf] }
 0x4d8   :  { %2426 = vmatpush.bf16.msra.mxu0 %v4553_v8  ;;  %2491 = vmatpush.bf16.msra.mxu2 %v4469_v52  ;;  %v4402_v8 = vld [vmem:[%s8460_s8 + $0x128] sm:$0xf0]  ;;  %v4657_v9 = vor.u32 %v5515_v5, %v4656_v3  ;;  %v4561_v52 = vor.u32 %v5491_v51, %v4560_v48  ;;  %v5419_v57 = vld [vmem:[%s8460_s8 + $0x24] sm:$0xf0]  ;;  %v4762_v51 = vld [vmem:[%s8460_s8 + $0x3f0] sm:$0xf0] }
 0x4d9   :  { %2505 = vmatpush.bf16.msra.mxu3 %v4725_v38  ;;  %v4405_v10 = vor.u32 %v5447_v6, %v4402_v8  ;;  %v4306_v53 = vld [vmem:[%s8460_s8 + $0x68] sm:$0xf0]  ;;  %v4528_v58 = vld [vmem:[%s8460_s8 + $0x208] sm:$0xf] }
 0x4da   :  { %v4309_v38 = vor.u32 %v5423_v34, %v4306_v53  ;;  %v4562_v36 = vld [vmem:[%s8460_s8 + $0x268] sm:$0xf0] }
 0x4db   :  { %2413 = vmatpush.bf16.msra.mxu1 %v4265_v17  ;;  %v4624_v17 = vld [vmem:[%s8460_s8 + $0x2c8] sm:$0xf]  ;;  %v4530_v3 = vld [vmem:[%s8460_s8 + $0x228] sm:$0xf0] }
 0x4dc   :  { %2427 = vmatpush.bf16.msra.mxu0 %v4521_v23  ;;  %2492 = vmatpush.bf16.msra.mxu2 %v4437_v60  ;;  %v4370_v23 = vld [vmem:[%s8460_s8 + $0xe8] sm:$0xf0]  ;;  %v4625_v24 = vor.u32 %v5507_v19, %v4624_v17  ;;  %v5483_v60 = vld [vmem:[%s8460_s8 + $0x224] sm:$0xf0]  ;;  %v1598_v19 = vld [vmem:[%s8461_s6] sm:$0x3] }
 0x4dd   :  { %2506 = vmatpush.bf16.msra.mxu3 %v4693_v63  ;;  %v4373_v25 = vor.u32 %v5439_v21, %v4370_v23  ;;  %v4529_v63 = vor.u32 %v5483_v60, %v4528_v58  ;;  %v1601_v26 = vperm.slane %v1598_v19, 1  ;;  %v5464_v58 = vld [vmem:[%s8460_s8 + $0x194] sm:$0xf] }
 0x4de   :  { %v5528_v60 = vld [vmem:[%s8460_s8 + $0x394] sm:$0xf] }
 0x4df   :  { %2462 = vmatpush.bf16.msrb.mxu1 %v4497_v35  ;;  %v4337_v35 = vor.u32 %v5435_v30, %v4336_v29 }
 0x4e0   :  { %2476 = vmatpush.bf16.msrb.mxu0 %v4753_v37  ;;  %2493 = vmatpush.bf16.msra.mxu2 %v4405_v10  ;;  %v5499_v37 = vld [vmem:[%s8460_s8 + $0x2a4] sm:$0xf0] }
 0x4e1   :  { %2507 = vmatpush.bf16.msra.mxu3 %v4661_v13  ;;  %v4593_v40 = vor.u32 %v5499_v37, %v4592_v32  ;;  %v1610_v32 = vperm.slane %v1608_v27, 0 }
 0x4e3   :  { %2463 = vmatpush.bf16.msrb.mxu1 %v4465_v7  ;;  %v4304_v7 = vld [vmem:[%s8460_s8 + $0x48] sm:$0xf] }
 0x4e4   :  { %2477 = vmatpush.bf16.msrb.mxu0 %v4721_v50  ;;  %2494 = vmatpush.bf16.msra.mxu2 %v4373_v25  ;;  %v4305_v50 = vor.u32 %v5427_v1, %v4304_v7  ;;  %v1600_v25 = vperm.slane %v1598_v19, 0  ;;  %v4664_v19 = vld [vmem:[%s8460_s8 + $0x310] sm:$0xf] }
 0x4e5   :  { %2508 = vmatpush.bf16.msra.mxu3 %v4629_v28 }
 0x4e7   :  { %2464 = vmatpush.bf16.msrb.mxu1 %v4433_v55  ;;  %v4565_v55 = vor.u32 %v5487_v33, %v4562_v36  ;;  %v4472_v33 = vld [vmem:[%s8460_s8 + $0x190] sm:$0xf] }
 0x4e8   :  { %2478 = vmatpush.bf16.msrb.mxu0 %v4689_v59  ;;  %2495 = vmatpush.bf16.msra.mxu2 %v4341_v42  ;;  %v4273_v59 = vor.u32 %v5419_v57, %v4272_v56  ;;  %v5468_v36 = vld [vmem:[%s8460_s8 + $0x1ac] sm:$0xf0] }
 0x4e9   :  { %2509 = vmatpush.bf16.msra.mxu3 %v4597_v45  ;;  %v4760_v45 = vld [vmem:[%s8460_s8 + $0x3d0] sm:$0xf]  ;;  %v4473_v62 = vor.u32 %v5468_v36, %v4472_v33  ;;  %v4602_v33 = vld [vmem:[%s8460_s8 + $0x2b0] sm:$0xf0] }
 0x4ea   :  { %v4728_v56 = vld [vmem:[%s8460_s8 + $0x390] sm:$0xf] }
 0x4eb   :  { %2465 = vmatpush.bf16.msrb.mxu1 %v4401_v4  ;;  %v4533_v4 = vor.u32 %v5479_v2, %v4530_v3  ;;  %v5532_v57 = vld [vmem:[%s8460_s8 + $0x3ac] sm:$0xf0] }
 0x4ec   :  { %2479 = vmatpush.bf16.msrb.mxu0 %v4657_v9  ;;  %2496 = vmatpush.bf16.msra.mxu2 %v4309_v38  ;;  %v5460_v2 = vld [vmem:[%s8460_s8 + $0x16c] sm:$0xf0] }
 0x4ed   :  { %2510 = vmatpush.bf16.msra.mxu3 %v4565_v55 }
 0x4ef   :  { %2466 = vmatpush.bf16.msrb.mxu1 %v4369_v18 }
 0x4f0   :  { %2480 = vmatpush.bf16.msrb.mxu0 %v4625_v24  ;;  %2497 = vmatpush.bf16.msra.mxu2 %v4277_v0  ;;  %v4440_v0 = vld [vmem:[%s8460_s8 + $0x150] sm:$0xf] }
 0x4f1   :  { %2511 = vmatpush.bf16.msra.mxu3 %v4533_v4  ;;  %v4733_v4 = vor.u32 %v5528_v60, %v4730_v61  ;;  %v5492_v60 = vld [vmem:[%s8460_s8 + $0x26c] sm:$0xf0]  ;;  %v5424_v61 = vld [vmem:[%s8460_s8 + $0x54] sm:$0xf] }
 0x4f3   :  { %2467 = vmatpush.bf16.msrb.mxu1 %v4337_v35  ;;  %v1611_v35 = vperm.slane %v1608_v27, 1 }
 0x4f4   :  { %2481 = vmatpush.bf16.msrb.mxu0 %v4593_v40 }
 0x4f7   :  { %2468 = vmatpush.bf16.msrb.mxu1 %v4305_v50  ;;  %v5536_v50 = vld [vmem:[%s8460_s8 + $0x3d4] sm:$0xf] }
 0x4f8   :  { %2482 = vmatpush.bf16.msrb.mxu0 %v4561_v52  ;;  %v4765_v55 = vor.u32 %v5536_v50, %v4762_v51  ;;  %v5500_v50 = vld [vmem:[%s8460_s8 + $0x2ac] sm:$0xf0]  ;;  %v5432_v51 = vld [vmem:[%s8460_s8 + $0x94] sm:$0xf] }
 0x4fb   :  { %2469 = vmatpush.bf16.msrb.mxu1 %v4273_v59  ;;  %v4474_v59 = vld [vmem:[%s8460_s8 + $0x1b0] sm:$0xf0] }
 0x4fc   :  { %2483 = vmatpush.bf16.msrb.mxu0 %v4529_v63  ;;  %v4729_v63 = vor.u32 %v5532_v57, %v4728_v56  ;;  %v4477_v3 = vor.u32 %v5464_v58, %v4474_v59  ;;  %v5428_v56 = vld [vmem:[%s8460_s8 + $0x6c] sm:$0xf0] }
 0x4fd   :  { %v4568_v59 = vld [vmem:[%s8460_s8 + $0x250] sm:$0xf] }
 0x541   :  { %v1566_v46 = vpop.xlane.xlu0 %1565 }
 0x542   :  { %v1570_v49 = vmul.f32 %v1566_v46, %v6885_v31 }
 0x544   :  { %v1572_v54 = vadd.f32 1e-05, %v1570_v49  ;;  %v4506_v49 = vld [vmem:[%s8460_s8 + $0x1f0] sm:$0xf0] }
 0x546   :  { %5706 = vrsqrt.f32 %v1572_v54  ;;  %vm1580_vm3 = vweird.f32 %v1572_v54 }
 0x549   :  { %v1569_v5 = vpop.xlane.xlu2 %1568 }
 0x54a   :  { %v1571_v6 = vmul.f32 %v1569_v5, %v6885_v31  ;;  %v4696_v5 = vld [vmem:[%s8460_s8 + $0x350] sm:$0xf] }
 0x54c   :  { %v5707_v8 = vpop.eup %5706  ;;  %v1573_v9 = vadd.f32 1e-05, %v1571_v6  ;;  %v5524_v6 = vld [vmem:[%s8460_s8 + $0x36c] sm:$0xf0] }
 0x54d   :  { %v1575_v10 = vmul.f32 %v5707_v8, %v1572_v54  ;;  %vm1581_vm2 = vweird.f32 %v5707_v8 }
 0x54e   :  { %5708 = vrsqrt.f32 %v1573_v9  ;;  %vm1582_vm4 = vmor %vm1580_vm3, %vm1581_vm2  ;;  %vm1590_vm6 = vweird.f32 %v1573_v9 }
 0x54f   :  { %v1576_v11 = vmul.f32 %v5707_v8, %v1575_v10  ;;  %v5520_v10 = vld [vmem:[%s8460_s8 + $0x354] sm:$0xf] }
 0x551   :  { %v1577_v12 = vmul.f32 0.5, %v1576_v11  ;;  %v4698_v11 = vld [vmem:[%s8460_s8 + $0x370] sm:$0xf0] }
 0x553   :  { %v1578_v13 = vsub.f32 1.5, %v1577_v12  ;;  %v4441_v12 = vor.u32 %v5460_v2, %v4440_v0  ;;  %v4570_v0 = vld [vmem:[%s8460_s8 + $0x270] sm:$0xf0]  ;;  %v4280_v2 = vld [vmem:[%s8460_s8 + $0x10] sm:$0xf] }
 0x554   :  { %v5709_v15 = vpop.eup %5708 }
 0x555   :  { %v1579_v16 = vmul.f32 %v5707_v8, %v1578_v13  ;;  %v1585_v17 = vmul.f32 %v5709_v15, %v1573_v9  ;;  %vm1591_vm5 = vweird.f32 %v5709_v15  ;;  %v4442_v9 = vld [vmem:[%s8460_s8 + $0x170] sm:$0xf0]  ;;  %v4697_v13 = vor.u32 %v5524_v6, %v4696_v5  ;;  %v5420_v5 = vld [vmem:[%s8460_s8 + $0x2c] sm:$0xf0] }
 0x556   :  { %vm1592_vm7 = vmor %vm1590_vm6, %vm1591_vm5  ;;  %v4536_v6 = vld [vmem:[%s8460_s8 + $0x210] sm:$0xf] }
 0x557   :  { %v1586_v18 = vmul.f32 %v5709_v15, %v1585_v17  ;;  %v1583_v21 = vsel %vm1582_vm4, %v5707_v8, %v1579_v16  ;;  %v5456_v8 = vld [vmem:[%s8460_s8 + $0x154] sm:$0xf]  ;;  %v5452_v16 = vld [vmem:[%s8460_s8 + $0x12c] sm:$0xf0] }
 0x558   :  { %v1594_v28 = vmul.f32 %v1583_v21, %v6904_v14  ;;  %v1595_v29 = vmul.f32 %v1583_v21, %v6907_v47  ;;  %v4504_v14 = vld [vmem:[%s8460_s8 + $0x1d0] sm:$0xf]  ;;  %v4445_v17 = vor.u32 %v5456_v8, %v4442_v9 }
 0x559   :  { %v1587_v23 = vmul.f32 0.5, %v1586_v18  ;;  %v5476_v47 = vld [vmem:[%s8460_s8 + $0x1ec] sm:$0xf0]  ;;  %v4701_v18 = vor.u32 %v5520_v10, %v4698_v11  ;;  %v5416_v11 = vld [vmem:[%s8460_s8 + $0x14] sm:$0xf] }
 0x55a   :  { %v1604_v39 = vmul.f32 %v1600_v25, %v1594_v28  ;;  %v1605_v41 = vmul.f32 %v1601_v26, %v1595_v29  ;;  %v4505_v52 = vor.u32 %v5476_v47, %v4504_v14  ;;  %v5516_v21 = vld [vmem:[%s8460_s8 + $0x32c] sm:$0xf0] }
 0x55b   :  { %v1588_v24 = vsub.f32 1.5, %v1587_v23  ;;  %v5448_v23 = vld [vmem:[%s8460_s8 + $0x114] sm:$0xf]  ;;  %v4665_v28 = vor.u32 %v5516_v21, %v4664_v19  ;;  %v4376_v29 = vld [vmem:[%s8460_s8 + $0xd0] sm:$0xf] }
 0x55c   :  { %v7215_v46 = vadd.f32 %v1610_v32, %v1604_v39  ;;  %v7217_v7 = vadd.f32 %v1611_v35, %v1605_v41  ;;  %v5508_v39 = vld [vmem:[%s8460_s8 + $0x2ec] sm:$0xf0]  ;;  %v5440_v41 = vld [vmem:[%s8460_s8 + $0xd4] sm:$0xf]  ;;  %v5541_v19 = vld [vmem:[%s8460_s8 + $0x3f4] sm:$0xf0] }
 0x55d   :  { %v1589_v30 = vmul.f32 %v5709_v15, %v1588_v24  ;;  %v4410_v24 = vld [vmem:[%s8460_s8 + $0x130] sm:$0xf0]  ;;  %v4344_v47 = vld [vmem:[%s8460_s8 + $0x90] sm:$0xf]  ;;  %v5473_v21 = vld [vmem:[%s8460_s8 + $0x1dc] sm:$0xf] }
 0x55e   :  { %v5484_v8 = vld [vmem:[%s8460_s8 + $0x22c] sm:$0xf0] }
 0x55f   :  { %v1593_v37 = vsel %vm1592_vm7, %v5709_v15, %v1589_v30  ;;  %v4408_v15 = vld [vmem:[%s8460_s8 + $0x110] sm:$0xf] }
 0x560   :  { %v1596_v40 = vmul.f32 %v1593_v37, %v6915_v20  ;;  %v1597_v42 = vmul.f32 %v1593_v37, %v6918_v22  ;;  %v5540_v20 = vld [vmem:[%s8460_s8 + $0x3ec] sm:$0xf0]  ;;  %v5472_v22 = vld [vmem:[%s8460_s8 + $0x1d4] sm:$0xf]  ;;  %v4409_v27 = vor.u32 %v5452_v16, %v4408_v15  ;;  %v4512_v16 = vld [vmem:[%s8460_s8 + $0x1d8] sm:$0xf] }
 0x561   :  { %v4761_v38 = vor.u32 %v5540_v20, %v4760_v45  ;;  %v4509_v54 = vor.u32 %v5472_v22, %v4506_v49  ;;  %v5444_v30 = vld [vmem:[%s8460_s8 + $0xec] sm:$0xf0]  ;;  %v4538_v15 = vld [vmem:[%s8460_s8 + $0x230] sm:$0xf0] }
 0x562   :  { %v1606_v43 = vmul.f32 %v1600_v25, %v1596_v40  ;;  %v1607_v44 = vmul.f32 %v1601_v26, %v1597_v42  ;;  %v5512_v25 = vld [vmem:[%s8460_s8 + $0x314] sm:$0xf]  ;;  %v4632_v37 = vld [vmem:[%s8460_s8 + $0x2d0] sm:$0xf] }
 0x563   :  { %v4666_v26 = vld [vmem:[%s8460_s8 + $0x330] sm:$0xf0]  ;;  %v4633_v14 = vor.u32 %v5508_v39, %v4632_v37  ;;  %v5436_v45 = vld [vmem:[%s8460_s8 + $0xac] sm:$0xf0]  ;;  %v5469_v37 = vld [vmem:[%s8460_s8 + $0x1b4] sm:$0xf0] }
 0x564   :  { %v7219_v1 = vadd.f32 %v1610_v32, %v1606_v43  ;;  %v7221_v48 = vadd.f32 %v1611_v35, %v1607_v44  ;;  %v4413_v32 = vor.u32 %v5448_v23, %v4410_v24  ;;  %v4669_v35 = vor.u32 %v5512_v25, %v4666_v26  ;;  %v4378_v40 = vld [vmem:[%s8460_s8 + $0xf0] sm:$0xf0]  ;;  %v4600_v49 = vld [vmem:[%s8460_s8 + $0x290] sm:$0xf]  ;;  %v4514_v25 = vld [vmem:[%s8460_s8 + $0x1f8] sm:$0xf0] }
 0x565   :  { %v5504_v42 = vld [vmem:[%s8460_s8 + $0x2d4] sm:$0xf]  ;;  %v4377_v44 = vor.u32 %v5444_v30, %v4376_v29  ;;  %v4381_v20 = vor.u32 %v5440_v41, %v4378_v40  ;;  %v4345_v36 = vor.u32 %v5436_v45, %v4344_v47  ;;  %v4281_v23 = vor.u32 %v5420_v5, %v4280_v2  ;;  %v5537_v26 = vld [vmem:[%s8460_s8 + $0x3dc] sm:$0xf]  ;;  %v4736_v40 = vld [vmem:[%s8460_s8 + $0x398] sm:$0xf] }
 0x566   :  { %v7234_v34 = vpack.c.bf16 %v7219_v1, %v7215_v46  ;;  %v7238_v53 = vpack.c.bf16 %v7221_v48, %v7217_v7  ;;  %v4634_v43 = vld [vmem:[%s8460_s8 + $0x2f0] sm:$0xf0]  ;;  %v4537_v24 = vor.u32 %v5484_v8, %v4536_v6  ;;  %v4517_v39 = vor.u32 %v5473_v21, %v4514_v25  ;;  %v4738_v47 = vld [vmem:[%s8460_s8 + $0x3b8] sm:$0xf0]  ;;  %v4384_v8 = vld [vmem:[%s8460_s8 + $0xd8] sm:$0xf] }
 0x567   :  { %v4637_v22 = vor.u32 %v5504_v42, %v4634_v43  ;;  %v5533_v42 = vld [vmem:[%s8460_s8 + $0x3b4] sm:$0xf0]  ;;  %v5465_v43 = vld [vmem:[%s8460_s8 + $0x19c] sm:$0xf] }
 0x568   :  { %2414 = vmatmul.bf16.vlgmr.msra.gmra.mxu1 %v7234_v34  ;;  %2428 = vmatmul.bf16.vlgmr.msra.gmra.mxu0 %v7238_v53  ;;  %v4418_v2 = vld [vmem:[%s8460_s8 + $0x138] sm:$0xf0] }
 0x569   :  { %2442 = vmatmul.bf16.vlgmr.msrb.gmra.mxu2 %v7234_v34  ;;  %2456 = vmatmul.bf16.vlgmr.msrb.gmra.mxu3 %v7238_v53 }
 0x56a   :  { %2518 = vmatpush.bf16.msra.mxu1 %v4505_v52  ;;  %2532 = vmatpush.bf16.msra.mxu0 %v4761_v38  ;;  %v4346_v52 = vld [vmem:[%s8460_s8 + $0xb0] sm:$0xf0] }
 0x56b   :  { %2546 = vmatpush.bf16.msrb.mxu2 %v4509_v54  ;;  %2560 = vmatpush.bf16.msrb.mxu3 %v4765_v55  ;;  %v5496_v38 = vld [vmem:[%s8460_s8 + $0x294] sm:$0xf]  ;;  %v4601_v54 = vor.u32 %v5500_v50, %v4600_v49  ;;  %v4312_v55 = vld [vmem:[%s8460_s8 + $0x50] sm:$0xf]  ;;  %v4349_v57 = vor.u32 %v5432_v51, %v4346_v52  ;;  %v5461_v49 = vld [vmem:[%s8460_s8 + $0x174] sm:$0xf0] }
 0x56c   :  { %v4605_v58 = vor.u32 %v5496_v38, %v4602_v33  ;;  %v4704_v52 = vld [vmem:[%s8460_s8 + $0x358] sm:$0xf]  ;;  %v5457_v33 = vld [vmem:[%s8460_s8 + $0x15c] sm:$0xf] }
 0x56d   :  { %v5525_v38 = vld [vmem:[%s8460_s8 + $0x374] sm:$0xf0] }
 0x56e   :  { %2519 = vmatpush.bf16.msra.mxu1 %v4473_v62  ;;  %2533 = vmatpush.bf16.msra.mxu0 %v4729_v63  ;;  %v4314_v62 = vld [vmem:[%s8460_s8 + $0x70] sm:$0xf0] }
 0x56f   :  { %2547 = vmatpush.bf16.msrb.mxu2 %v4477_v3  ;;  %2561 = vmatpush.bf16.msrb.mxu3 %v4733_v4  ;;  %v5488_v63 = vld [vmem:[%s8460_s8 + $0x254] sm:$0xf]  ;;  %v4313_v3 = vor.u32 %v5428_v56, %v4312_v55  ;;  %v4569_v4 = vor.u32 %v5492_v60, %v4568_v59  ;;  %v4317_v9 = vor.u32 %v5424_v61, %v4314_v62  ;;  %v4706_v55 = vld [vmem:[%s8460_s8 + $0x378] sm:$0xf0]  ;;  %v5453_v59 = vld [vmem:[%s8460_s8 + $0x134] sm:$0xf0] }
 0x570   :  { %v4573_v10 = vor.u32 %v5488_v63, %v4570_v0  ;;  %v4672_v62 = vld [vmem:[%s8460_s8 + $0x318] sm:$0xf]  ;;  %v5449_v0 = vld [vmem:[%s8460_s8 + $0x11c] sm:$0xf] }
 0x571   :  { %v5517_v63 = vld [vmem:[%s8460_s8 + $0x334] sm:$0xf0] }
 0x572   :  { %2520 = vmatpush.bf16.msra.mxu1 %v4441_v12  ;;  %2534 = vmatpush.bf16.msra.mxu0 %v4697_v13  ;;  %v4282_v12 = vld [vmem:[%s8460_s8 + $0x30] sm:$0xf0]  ;;  %v4673_v6 = vor.u32 %v5517_v63, %v4672_v62  ;;  %v5573_v62 = vld [vmem:[%s8463_s10 + $0xf4] sm:$0xf0] }
 0x573   :  { %2548 = vmatpush.bf16.msrb.mxu2 %v4445_v17  ;;  %2562 = vmatpush.bf16.msrb.mxu3 %v4701_v18  ;;  %v5480_v13 = vld [vmem:[%s8460_s8 + $0x214] sm:$0xf]  ;;  %v5477_v17 = vld [vmem:[%s8460_s8 + $0x1f4] sm:$0xf0] }
 0x574   :  { %v4768_v18 = vld [vmem:[%s8460_s8 + $0x3d8] sm:$0xf]  ;;  %v4541_v29 = vor.u32 %v5480_v13, %v4538_v15  ;;  %v4513_v30 = vor.u32 %v5477_v17, %v4512_v16  ;;  %v5441_v15 = vld [vmem:[%s8460_s8 + $0xdc] sm:$0xf] }
 0x575   :  { %v5509_v13 = vld [vmem:[%s8460_s8 + $0x2f4] sm:$0xf0]  ;;  %v4386_v16 = vld [vmem:[%s8460_s8 + $0xf8] sm:$0xf0] }
 0x576   :  { %2521 = vmatpush.bf16.msra.mxu1 %v4409_v27  ;;  %2535 = vmatpush.bf16.msra.mxu0 %v4665_v28  ;;  %v4770_v27 = vld [vmem:[%s8460_s8 + $0x3f8] sm:$0xf0]  ;;  %v4285_v28 = vor.u32 %v5416_v11, %v4282_v12  ;;  %v4640_v12 = vld [vmem:[%s8460_s8 + $0x2d8] sm:$0xf]  ;;  %v4389_v25 = vor.u32 %v5441_v15, %v4386_v16 }
 0x577   :  { %2549 = vmatpush.bf16.msrb.mxu2 %v4413_v32  ;;  %2563 = vmatpush.bf16.msrb.mxu3 %v4669_v35  ;;  %v4769_v32 = vor.u32 %v5541_v19, %v4768_v18  ;;  %v4480_v35 = vld [vmem:[%s8460_s8 + $0x198] sm:$0xf]  ;;  %v4773_v41 = vor.u32 %v5537_v26, %v4770_v27  ;;  %v5505_v17 = vld [vmem:[%s8460_s8 + $0x2dc] sm:$0xf]  ;;  %v4641_v21 = vor.u32 %v5509_v13, %v4640_v12  ;;  %v5571_v12 = vld [vmem:[%s8463_s10 + $0xe4] sm:$0xf0] }
 0x578   :  { %2470 = vmatmul.bf16.vlgmr.msrb.gmra.mxu1 %v7234_v34  ;;  %2484 = vmatmul.bf16.vlgmr.msrb.gmra.mxu0 %v7238_v53  ;;  %v4481_v45 = vor.u32 %v5469_v37, %v4480_v35  ;;  %v4642_v18 = vld [vmem:[%s8460_s8 + $0x2f8] sm:$0xf0]  ;;  %v4608_v27 = vld [vmem:[%s8460_s8 + $0x298] sm:$0xf]  ;;  %v4816_v13 = vld [vmem:[%s8463_s10 + $0x50] sm:$0xf] }
 0x579   :  { %2498 = vmatmul.bf16.vlgmr.msra.gmra.mxu2 %v7234_v34  ;;  %2512 = vmatmul.bf16.vlgmr.msra.gmra.mxu3 %v7238_v53  ;;  %v4645_v26 = vor.u32 %v5505_v17, %v4642_v18  ;;  %v4610_v35 = vld [vmem:[%s8460_s8 + $0x2b8] sm:$0xf0]  ;;  %v5553_v17 = vld [vmem:[%s8463_s10 + $0x54] sm:$0xf0] }
 0x57a   :  { %2522 = vmatpush.bf16.msra.mxu1 %v4377_v44  ;;  %2536 = vmatpush.bf16.msra.mxu0 %v4633_v14  ;;  %v4482_v44 = vld [vmem:[%s8460_s8 + $0x1b8] sm:$0xf0] }
 0x57b   :  { %2550 = vmatpush.bf16.msrb.mxu2 %v4381_v20  ;;  %2564 = vmatpush.bf16.msrb.mxu3 %v4637_v22  ;;  %v5529_v14 = vld [vmem:[%s8460_s8 + $0x39c] sm:$0xf]  ;;  %v4737_v20 = vor.u32 %v5533_v42, %v4736_v40  ;;  %v4448_v22 = vld [vmem:[%s8460_s8 + $0x158] sm:$0xf]  ;;  %v4485_v50 = vor.u32 %v5465_v43, %v4482_v44 }
 0x57c   :  { %v4741_v51 = vor.u32 %v5529_v14, %v4738_v47  ;;  %v4449_v56 = vor.u32 %v5461_v49, %v4448_v22  ;;  %v5429_v40 = vld [vmem:[%s8460_s8 + $0x74] sm:$0xf0]  ;;  %v5425_v47 = vld [vmem:[%s8460_s8 + $0x5c] sm:$0xf] }
 0x57d   :  { %v4576_v44 = vld [vmem:[%s8460_s8 + $0x258] sm:$0xf]  ;;  %v4578_v22 = vld [vmem:[%s8460_s8 + $0x278] sm:$0xf0] }
 0x57e   :  { %2523 = vmatpush.bf16.msra.mxu1 %v4345_v36  ;;  %2537 = vmatpush.bf16.msra.mxu0 %v4601_v54  ;;  %v4450_v36 = vld [vmem:[%s8460_s8 + $0x178] sm:$0xf0]  ;;  %v5493_v14 = vld [vmem:[%s8460_s8 + $0x274] sm:$0xf0] }
 0x57f   :  { %2551 = vmatpush.bf16.msrb.mxu2 %v4349_v57  ;;  %2565 = vmatpush.bf16.msrb.mxu3 %v4605_v58  ;;  %v5521_v54 = vld [vmem:[%s8460_s8 + $0x35c] sm:$0xf]  ;;  %v4705_v57 = vor.u32 %v5525_v38, %v4704_v52  ;;  %v4416_v58 = vld [vmem:[%s8460_s8 + $0x118] sm:$0xf]  ;;  %v4453_v60 = vor.u32 %v5457_v33, %v4450_v36 }
 0x580   :  { %v4709_v61 = vor.u32 %v5521_v54, %v4706_v55  ;;  %v4417_v5 = vor.u32 %v5453_v59, %v4416_v58  ;;  %v5421_v52 = vld [vmem:[%s8460_s8 + $0x34] sm:$0xf0]  ;;  %v5417_v55 = vld [vmem:[%s8460_s8 + $0x1c] sm:$0xf]  ;;  %v4832_v59 = vld [vmem:[%s8463_s10 + $0x70] sm:$0xf] }
 0x581   :  { %v4544_v38 = vld [vmem:[%s8460_s8 + $0x218] sm:$0xf]  ;;  %v4546_v58 = vld [vmem:[%s8460_s8 + $0x238] sm:$0xf0] }
 0x582   :  { %2524 = vmatpush.bf16.msra.mxu1 %v4313_v3  ;;  %2538 = vmatpush.bf16.msra.mxu0 %v4569_v4  ;;  %v5513_v3 = vld [vmem:[%s8460_s8 + $0x31c] sm:$0xf]  ;;  %v5485_v54 = vld [vmem:[%s8460_s8 + $0x234] sm:$0xf0] }
 0x583   :  { %2552 = vmatpush.bf16.msrb.mxu2 %v4317_v9  ;;  %2566 = vmatpush.bf16.msrb.mxu3 %v4573_v10  ;;  %v4674_v4 = vld [vmem:[%s8460_s8 + $0x338] sm:$0xf0]  ;;  %v5445_v9 = vld [vmem:[%s8460_s8 + $0xf4] sm:$0xf0]  ;;  %v4421_v10 = vor.u32 %v5449_v0, %v4418_v2  ;;  %v4545_v0 = vor.u32 %v5485_v54, %v4544_v38  ;;  %v4784_v38 = vld [vmem:[%s8463_s10 + $0x10] sm:$0xf] }
 0x584   :  { %v4677_v11 = vor.u32 %v5513_v3, %v4674_v4  ;;  %v4385_v19 = vor.u32 %v5445_v9, %v4384_v8  ;;  %v4960_v8 = vld [vmem:[%s8463_s10 + $0x170] sm:$0xf]  ;;  %v5589_v9 = vld [vmem:[%s8463_s10 + $0x174] sm:$0xf0] }
 0x585   :  { %v4961_v15 = vor.u32 %v5589_v9, %v4960_v8  ;;  %v4848_v54 = vld [vmem:[%s8463_s10 + $0x90] sm:$0xf]  ;;  %v5080_v8 = vld [vmem:[%s8463_s10 + $0x260] sm:$0xf]  ;;  %v5619_v9 = vld [vmem:[%s8463_s10 + $0x264] sm:$0xf0] }
 0x586   :  { %2525 = vmatpush.bf16.msra.mxu1 %v4281_v23  ;;  %2539 = vmatpush.bf16.msra.mxu0 %v4537_v24  ;;  %v4352_v23 = vld [vmem:[%s8460_s8 + $0x98] sm:$0xf] }
 0x587   :  { %2553 = vmatpush.bf16.msrb.mxu2 %v4285_v28  ;;  %2567 = vmatpush.bf16.msrb.mxu3 %v4541_v29  ;;  %v5437_v24 = vld [vmem:[%s8460_s8 + $0xb4] sm:$0xf0]  ;;  %v5433_v29 = vld [vmem:[%s8460_s8 + $0x9c] sm:$0xf] }
 0x588   :  { %v5501_v28 = vld [vmem:[%s8460_s8 + $0x2b4] sm:$0xf0]  ;;  %v4353_v37 = vor.u32 %v5437_v24, %v4352_v23  ;;  %v4880_v23 = vld [vmem:[%s8463_s10 + $0xd0] sm:$0xf] }
 0x589   :  { %2526 = vmatmul.bf16.vlgmr.msra.gmra.mxu1 %v7234_v34  ;;  %2540 = vmatmul.bf16.vlgmr.msra.gmra.mxu0 %v7238_v53  ;;  %v5569_v24 = vld [vmem:[%s8463_s10 + $0xd4] sm:$0xf0] }
 0x58a   :  { %2574 = vmatpush.bf16.msrb.mxu1 %v4513_v30  ;;  %2588 = vmatpush.bf16.msrb.mxu0 %v4769_v32  ;;  %v4354_v30 = vld [vmem:[%s8460_s8 + $0xb8] sm:$0xf0] }
 0x58b   :  { %2602 = vmatpush.bf16.msra.mxu2 %v4517_v39  ;;  %2616 = vmatpush.bf16.msra.mxu3 %v4773_v41  ;;  %v5497_v32 = vld [vmem:[%s8460_s8 + $0x29c] sm:$0xf]  ;;  %v4609_v39 = vor.u32 %v5501_v28, %v4608_v27  ;;  %v4320_v41 = vld [vmem:[%s8460_s8 + $0x58] sm:$0xf]  ;;  %v4357_v42 = vor.u32 %v5433_v29, %v4354_v30  ;;  %v4817_v29 = vor.u32 %v5553_v17, %v4816_v13  ;;  %v4808_v30 = vld [vmem:[%s8463_s10 + $0x40] sm:$0xf] }
 0x58c   :  { %2554 = vmatmul.bf16.vlgmr.msrb.gmra.mxu2 %v7234_v34  ;;  %2568 = vmatmul.bf16.vlgmr.msrb.gmra.mxu3 %v7238_v53  ;;  %v4613_v43 = vor.u32 %v5497_v32, %v4610_v35  ;;  %v4321_v49 = vor.u32 %v5429_v40, %v4320_v41  ;;  %v4881_v32 = vor.u32 %v5569_v24, %v4880_v23  ;;  %v5551_v35 = vld [vmem:[%s8463_s10 + $0x44] sm:$0xf0]  ;;  %v4936_v23 = vld [vmem:[%s8463_s10 + $0x140] sm:$0xf] }
 0x58d   :  { %v4809_v40 = vor.u32 %v5551_v35, %v4808_v30  ;;  %v5583_v24 = vld [vmem:[%s8463_s10 + $0x144] sm:$0xf0]  ;;  %v5601_v30 = vld [vmem:[%s8463_s10 + $0x1d4] sm:$0xf0] }
 0x58e   :  { %2575 = vmatpush.bf16.msrb.mxu1 %v4481_v45  ;;  %2589 = vmatpush.bf16.msrb.mxu0 %v4737_v20  ;;  %v4322_v45 = vld [vmem:[%s8460_s8 + $0x78] sm:$0xf0] }
 0x58f   :  { %2603 = vmatpush.bf16.msra.mxu2 %v4485_v50  ;;  %2617 = vmatpush.bf16.msra.mxu3 %v4741_v51  ;;  %v5489_v20 = vld [vmem:[%s8460_s8 + $0x25c] sm:$0xf]  ;;  %v4577_v50 = vor.u32 %v5493_v14, %v4576_v44  ;;  %v4288_v51 = vld [vmem:[%s8460_s8 + $0x18] sm:$0xf]  ;;  %v4325_v33 = vor.u32 %v5425_v47, %v4322_v45  ;;  %v4864_v14 = vld [vmem:[%s8463_s10 + $0xb0] sm:$0xf] }
 0x590   :  { %v4581_v36 = vor.u32 %v5489_v20, %v4578_v22  ;;  %v4289_v63 = vor.u32 %v5421_v52, %v4288_v51  ;;  %v5549_v44 = vld [vmem:[%s8463_s10 + $0x34] sm:$0xf0]  ;;  %v4792_v20 = vld [vmem:[%s8463_s10 + $0x20] sm:$0xf]  ;;  %v5563_v51 = vld [vmem:[%s8463_s10 + $0xa4] sm:$0xf0] }
 0x591   :  { %v5565_v47 = vld [vmem:[%s8463_s10 + $0xb4] sm:$0xf0] }
 0x592   :  { %2576 = vmatpush.bf16.msrb.mxu1 %v4449_v56  ;;  %2590 = vmatpush.bf16.msrb.mxu0 %v4705_v57  ;;  %v4290_v56 = vld [vmem:[%s8460_s8 + $0x38] sm:$0xf0]  ;;  %v4865_v22 = vor.u32 %v5565_v47, %v4864_v14  ;;  %v5599_v14 = vld [vmem:[%s8463_s10 + $0x1c4] sm:$0xf0] }
 0x593   :  { %2604 = vmatpush.bf16.msra.mxu2 %v4453_v60  ;;  %2618 = vmatpush.bf16.msra.mxu3 %v4709_v61  ;;  %v5481_v57 = vld [vmem:[%s8460_s8 + $0x21c] sm:$0xf]  ;;  %v5557_v60 = vld [vmem:[%s8463_s10 + $0x74] sm:$0xf0]  ;;  %v4896_v61 = vld [vmem:[%s8463_s10 + $0xf0] sm:$0xf]  ;;  %v4293_v2 = vor.u32 %v5417_v55, %v4290_v56 }
 0x594   :  { %v4549_v3 = vor.u32 %v5481_v57, %v4546_v58  ;;  %v4833_v4 = vor.u32 %v5557_v60, %v4832_v59  ;;  %v5561_v55 = vld [vmem:[%s8463_s10 + $0x94] sm:$0xf0]  ;;  %v4776_v57 = vld [vmem:[%s8463_s10] sm:$0xf]  ;;  %v5543_v58 = vld [vmem:[%s8463_s10 + $0x4] sm:$0xf0] }
 0x595   :  { %v4849_v59 = vor.u32 %v5561_v55, %v4848_v54  ;;  %v5088_v60 = vld [vmem:[%s8463_s10 + $0x270] sm:$0xf]  ;;  %v5597_v54 = vld [vmem:[%s8463_s10 + $0x1b4] sm:$0xf0] }
 0x596   :  { %2577 = vmatpush.bf16.msrb.mxu1 %v4417_v5  ;;  %2591 = vmatpush.bf16.msrb.mxu0 %v4673_v6  ;;  %v4824_v5 = vld [vmem:[%s8463_s10 + $0x60] sm:$0xf]  ;;  %v4897_v6 = vor.u32 %v5573_v62, %v4896_v61  ;;  %v5559_v62 = vld [vmem:[%s8463_s10 + $0x84] sm:$0xf0] }
 0x597   :  { %2605 = vmatpush.bf16.msra.mxu2 %v4421_v10  ;;  %2619 = vmatpush.bf16.msra.mxu3 %v4677_v11  ;;  %v5555_v10 = vld [vmem:[%s8463_s10 + $0x64] sm:$0xf0]  ;;  %v4888_v11 = vld [vmem:[%s8463_s10 + $0xe0] sm:$0xf] }
 0x598   :  { %v4825_v16 = vor.u32 %v5555_v10, %v4824_v5  ;;  %v4889_v18 = vor.u32 %v5571_v12, %v4888_v11  ;;  %v4840_v61 = vld [vmem:[%s8463_s10 + $0x80] sm:$0xf]  ;;  %v5081_v10 = vor.u32 %v5619_v9, %v5080_v8  ;;  %v5072_v11 = vld [vmem:[%s8463_s10 + $0x250] sm:$0xf]  ;;  %v5617_v12 = vld [vmem:[%s8463_s10 + $0x254] sm:$0xf0] }
 0x599   :  { %v5073_v13 = vor.u32 %v5617_v12, %v5072_v11  ;;  %v4904_v9 = vld [vmem:[%s8463_s10 + $0x100] sm:$0xf] }
 0x59a   :  { %2578 = vmatpush.bf16.msrb.mxu1 %v4385_v19  ;;  %2592 = vmatpush.bf16.msrb.mxu0 %v4641_v21  ;;  %v4952_v19 = vld [vmem:[%s8463_s10 + $0x160] sm:$0xf]  ;;  %v5587_v21 = vld [vmem:[%s8463_s10 + $0x164] sm:$0xf0] }
 0x59b   :  { %2606 = vmatpush.bf16.msra.mxu2 %v4389_v25  ;;  %2620 = vmatpush.bf16.msra.mxu3 %v4645_v26  ;;  %v5024_v25 = vld [vmem:[%s8463_s10 + $0x1f0] sm:$0xf]  ;;  %v5605_v26 = vld [vmem:[%s8463_s10 + $0x1f4] sm:$0xf0]  ;;  %v4953_v27 = vor.u32 %v5587_v21, %v4952_v19  ;;  %v5635_v19 = vld [vmem:[%s8463_s10 + $0x2e4] sm:$0xf0] }
 0x59c   :  { %v5025_v28 = vor.u32 %v5605_v26, %v5024_v25  ;;  %v4937_v25 = vor.u32 %v5583_v24, %v4936_v23  ;;  %v5064_v26 = vld [vmem:[%s8463_s10 + $0x240] sm:$0xf]  ;;  %v5104_v24 = vld [vmem:[%s8463_s10 + $0x290] sm:$0xf] }
 0x59d   :  { %v5032_v12 = vld [vmem:[%s8463_s10 + $0x200] sm:$0xf] }
 0x59e   :  { %2579 = vmatpush.bf16.msrb.mxu1 %v4353_v37  ;;  %2593 = vmatpush.bf16.msrb.mxu0 %v4609_v39  ;;  %v4872_v37 = vld [vmem:[%s8463_s10 + $0xc0] sm:$0xf]  ;;  %v5567_v39 = vld [vmem:[%s8463_s10 + $0xc4] sm:$0xf0] }
 0x59f   :  { %2607 = vmatpush.bf16.msra.mxu2 %v4357_v42  ;;  %2621 = vmatpush.bf16.msra.mxu3 %v4613_v43  ;;  %v4800_v42 = vld [vmem:[%s8463_s10 + $0x30] sm:$0xf]  ;;  %v4873_v43 = vor.u32 %v5567_v39, %v4872_v37  ;;  %v5581_v39 = vld [vmem:[%s8463_s10 + $0x134] sm:$0xf0] }
 0x5a0   :  { %v4801_v45 = vor.u32 %v5549_v44, %v4800_v42  ;;  %v4928_v37 = vld [vmem:[%s8463_s10 + $0x130] sm:$0xf]  ;;  %v5613_v42 = vld [vmem:[%s8463_s10 + $0x234] sm:$0xf0]  ;;  %v5000_v44 = vld [vmem:[%s8463_s10 + $0x1c0] sm:$0xf] }
 0x5a1   :  { %v5001_v47 = vor.u32 %v5599_v14, %v5000_v44  ;;  %v7931_v44 = vld [vmem:[%s8464_s9] sm:$0xff] }
 0x5a2   :  { %2580 = vmatpush.bf16.msrb.mxu1 %v4321_v49  ;;  %2594 = vmatpush.bf16.msrb.mxu0 %v4577_v50  ;;  %v5547_v49 = vld [vmem:[%s8463_s10 + $0x24] sm:$0xf0]  ;;  %v4856_v50 = vld [vmem:[%s8463_s10 + $0xa0] sm:$0xf] }
 0x5a3   :  { %2608 = vmatpush.bf16.msra.mxu2 %v4325_v33  ;;  %2622 = vmatpush.bf16.msra.mxu3 %v4581_v36  ;;  %v4793_v52 = vor.u32 %v5547_v49, %v4792_v20  ;;  %v4857_v33 = vor.u32 %v5563_v51, %v4856_v50  ;;  %v5545_v36 = vld [vmem:[%s8463_s10 + $0x14] sm:$0xf0]  ;;  %v5631_v20 = vld [vmem:[%s8463_s10 + $0x2c4] sm:$0xf0]  ;;  %v4920_v49 = vld [vmem:[%s8463_s10 + $0x120] sm:$0xf] }
 0x5a4   :  { %v4785_v56 = vor.u32 %v5545_v36, %v4784_v38  ;;  %v5579_v50 = vld [vmem:[%s8463_s10 + $0x124] sm:$0xf0]  ;;  %v4992_v36 = vld [vmem:[%s8463_s10 + $0x1b0] sm:$0xf] }
 0x5a5   :  { %v4921_v51 = vor.u32 %v5579_v50, %v4920_v49  ;;  %v5611_v38 = vld [vmem:[%s8463_s10 + $0x224] sm:$0xf0]  ;;  %v4993_v55 = vor.u32 %v5597_v54, %v4992_v36  ;;  %v1750_v50 = vperm.slane %v7931_v44, 0  ;;  %v5665_v36 = vld [vmem:[%s8463_s10 + $0x3d4] sm:$0xf0] }
 0x5a6   :  { %2581 = vmatpush.bf16.msrb.mxu1 %v4289_v63  ;;  %2595 = vmatpush.bf16.msrb.mxu0 %v4545_v0  ;;  %v5621_v63 = vld [vmem:[%s8463_s10 + $0x274] sm:$0xf0]  ;;  %v5152_v0 = vld [vmem:[%s8463_s10 + $0x2f0] sm:$0xf] }
 0x5a7   :  { %2609 = vmatpush.bf16.msra.mxu2 %v4293_v2  ;;  %2623 = vmatpush.bf16.msra.mxu3 %v4549_v3  ;;  %v5637_v2 = vld [vmem:[%s8463_s10 + $0x2f4] sm:$0xf0]  ;;  %v4777_v3 = vor.u32 %v5543_v58, %v4776_v57  ;;  %v5089_v5 = vor.u32 %v5621_v63, %v5088_v60 }
 0x5a8   :  { %v5629_v57 = vld [vmem:[%s8463_s10 + $0x2b4] sm:$0xf0] }
 0x5a9   :  { %2582 = vmatmul.bf16.vlgmr.msrb.gmra.mxu1 %v7234_v34  ;;  %2596 = vmatmul.bf16.vlgmr.msrb.gmra.mxu0 %v7238_v53  ;;  %v5577_v60 = vld [vmem:[%s8463_s10 + $0x114] sm:$0xf0] }
 0x5aa   :  { %3428 = vmatpush.bf16.msra.mxu1 %v4833_v4  ;;  %3442 = vmatpush.bf16.msra.mxu0 %v4897_v6  ;;  %v4841_v4 = vor.u32 %v5559_v62, %v4840_v61  ;;  %v5153_v6 = vor.u32 %v5637_v2, %v5152_v0  ;;  %v5040_v62 = vld [vmem:[%s8463_s10 + $0x210] sm:$0xf]  ;;  %v5609_v63 = vld [vmem:[%s8463_s10 + $0x214] sm:$0xf0]  ;;  %v4984_v2 = vld [vmem:[%s8463_s10 + $0x1a0] sm:$0xf] }
 0x5ab   :  { %2610 = vmatmul.bf16.vlgmr.msra.gmra.mxu2 %v7234_v34  ;;  %2624 = vmatmul.bf16.vlgmr.msra.gmra.mxu3 %v7238_v53  ;;  %v4944_v34 = vld [vmem:[%s8463_s10 + $0x150] sm:$0xf]  ;;  %v5585_v53 = vld [vmem:[%s8463_s10 + $0x154] sm:$0xf0]  ;;  %v5041_v0 = vor.u32 %v5609_v63, %v5040_v62  ;;  %v5663_v62 = vld [vmem:[%s8463_s10 + $0x3c4] sm:$0xf0] }
 0x5ac   :  { %3456 = vmatpush.bf16.msrb.mxu2 %v4961_v15  ;;  %3470 = vmatpush.bf16.msrb.mxu3 %v5025_v28  ;;  %v4945_v41 = vor.u32 %v5585_v53, %v4944_v34  ;;  %v5016_v15 = vld [vmem:[%s8463_s10 + $0x1e0] sm:$0xf]  ;;  %v5008_v28 = vld [vmem:[%s8463_s10 + $0x1d0] sm:$0xf]  ;;  %v5633_v53 = vld [vmem:[%s8463_s10 + $0x2d4] sm:$0xf0] }
 0x5ad   :  { %v5136_v34 = vld [vmem:[%s8463_s10 + $0x2d0] sm:$0xf]  ;;  %v1751_v63 = vperm.slane %v7931_v44, 1 }
 0x5ae   :  { %3429 = vmatpush.bf16.msra.mxu1 %v4825_v16  ;;  %3443 = vmatpush.bf16.msra.mxu0 %v4889_v18  ;;  %v5603_v16 = vld [vmem:[%s8463_s10 + $0x1e4] sm:$0xf0]  ;;  %v5144_v18 = vld [vmem:[%s8463_s10 + $0x2e0] sm:$0xf]  ;;  %v5137_v35 = vor.u32 %v5633_v53, %v5136_v34 }
 0x5af   :  { %v5017_v17 = vor.u32 %v5603_v16, %v5016_v15  ;;  %v5145_v21 = vor.u32 %v5635_v19, %v5144_v18  ;;  %v5216_v15 = vld [vmem:[%s8463_s10 + $0x370] sm:$0xf]  ;;  %v5593_v19 = vld [vmem:[%s8463_s10 + $0x194] sm:$0xf0]  ;;  %v5096_v53 = vld [vmem:[%s8463_s10 + $0x280] sm:$0xf] }
 0x5b0   :  { %3457 = vmatpush.bf16.msrb.mxu2 %v4953_v27  ;;  %v5615_v27 = vld [vmem:[%s8463_s10 + $0x244] sm:$0xf0]  ;;  %v4976_v18 = vld [vmem:[%s8463_s10 + $0x190] sm:$0xf] }
 0x5b1   :  { %3471 = vmatpush.bf16.msrb.mxu3 %v5017_v17  ;;  %v5653_v17 = vld [vmem:[%s8463_s10 + $0x374] sm:$0xf0]  ;;  %v4977_v23 = vor.u32 %v5593_v19, %v4976_v18 }
 0x5b2   :  { %3430 = vmatpush.bf16.msra.mxu1 %v4817_v29  ;;  %3444 = vmatpush.bf16.msra.mxu0 %v4881_v32  ;;  %v5065_v29 = vor.u32 %v5615_v27, %v5064_v26  ;;  %v5009_v32 = vor.u32 %v5601_v30, %v5008_v28  ;;  %v5208_v27 = vld [vmem:[%s8463_s10 + $0x360] sm:$0xf]  ;;  %v5651_v28 = vld [vmem:[%s8463_s10 + $0x364] sm:$0xf0] }
 0x5b3   :  { %v4968_v30 = vld [vmem:[%s8463_s10 + $0x180] sm:$0xf] }
 0x5b4   :  { %3458 = vmatpush.bf16.msrb.mxu2 %v4945_v41  ;;  %v4929_v41 = vor.u32 %v5581_v39, %v4928_v37  ;;  %v5280_v39 = vld [vmem:[%s8463_s10 + $0x3f0] sm:$0xf] }
 0x5b5   :  { %3472 = vmatpush.bf16.msrb.mxu3 %v5009_v32  ;;  %v5591_v32 = vld [vmem:[%s8463_s10 + $0x184] sm:$0xf0] }
 0x5b6   :  { %3431 = vmatpush.bf16.msra.mxu1 %v4809_v40  ;;  %3445 = vmatpush.bf16.msra.mxu0 %v4873_v43  ;;  %v5056_v40 = vld [vmem:[%s8463_s10 + $0x230] sm:$0xf]  ;;  %v4969_v34 = vor.u32 %v5591_v32, %v4968_v30  ;;  %v4826_v30 = vld [vmem:[%s8463_s10 + $0x68] sm:$0xf0]  ;;  %v5240_v32 = vld [vmem:[%s8463_s10 + $0x3a0] sm:$0xf] }
 0x5b7   :  { %v5057_v43 = vor.u32 %v5613_v42, %v5056_v40  ;;  %v5200_v42 = vld [vmem:[%s8463_s10 + $0x350] sm:$0xf] }
 0x5b8   :  { %3459 = vmatpush.bf16.msrb.mxu2 %v4937_v25  ;;  %v5625_v25 = vld [vmem:[%s8463_s10 + $0x294] sm:$0xf0] }
 0x5b9   :  { %3473 = vmatpush.bf16.msrb.mxu3 %v5001_v47  ;;  %v5105_v26 = vor.u32 %v5625_v25, %v5104_v24  ;;  %v5272_v47 = vld [vmem:[%s8463_s10 + $0x3e0] sm:$0xf]  ;;  %v5554_v25 = vld [vmem:[%s8463_s10 + $0x64] sm:$0xf] }
 0x5ba   :  { %3432 = vmatpush.bf16.msra.mxu1 %v4801_v45  ;;  %3446 = vmatpush.bf16.msra.mxu0 %v4865_v22  ;;  %v5128_v45 = vld [vmem:[%s8463_s10 + $0x2c0] sm:$0xf] }
 0x5bb   :  { %v5129_v22 = vor.u32 %v5631_v20, %v5128_v45  ;;  %v5667_v45 = vld [vmem:[%s8463_s10 + $0x3e4] sm:$0xf0] }
 0x5bc   :  { %3460 = vmatpush.bf16.msrb.mxu2 %v4929_v41  ;;  %v5669_v41 = vld [vmem:[%s8463_s10 + $0x3f4] sm:$0xf0]  ;;  %v5273_v49 = vor.u32 %v5667_v45, %v5272_v47  ;;  %v4829_v47 = vor.u32 %v5554_v25, %v4826_v30  ;;  %v5572_v45 = vld [vmem:[%s8463_s10 + $0xf4] sm:$0xf]  ;;  %v5546_v30 = vld [vmem:[%s8463_s10 + $0x24] sm:$0xf] }
 0x5bd   :  { %3474 = vmatpush.bf16.msrb.mxu3 %v4993_v55  ;;  %v5281_v40 = vor.u32 %v5669_v41, %v5280_v39 }
 0x5be   :  { %3433 = vmatpush.bf16.msra.mxu1 %v4793_v52  ;;  %3447 = vmatpush.bf16.msra.mxu0 %v4857_v33  ;;  %v5048_v52 = vld [vmem:[%s8463_s10 + $0x220] sm:$0xf] }
 0x5bf   :  { %v5049_v33 = vor.u32 %v5611_v38, %v5048_v52  ;;  %v5647_v52 = vld [vmem:[%s8463_s10 + $0x344] sm:$0xf0] }
 0x5c0   :  { %3461 = vmatpush.bf16.msrb.mxu2 %v4921_v51  ;;  %v5192_v51 = vld [vmem:[%s8463_s10 + $0x340] sm:$0xf] }
 0x5c1   :  { %v5193_v38 = vor.u32 %v5647_v52, %v5192_v51  ;;  %v5232_v51 = vld [vmem:[%s8463_s10 + $0x390] sm:$0xf]  ;;  %v5657_v52 = vld [vmem:[%s8463_s10 + $0x394] sm:$0xf0] }
 0x5c2   :  { %3434 = vmatpush.bf16.msra.mxu1 %v4785_v56  ;;  %3448 = vmatpush.bf16.msra.mxu0 %v4849_v59  ;;  %v5120_v56 = vld [vmem:[%s8463_s10 + $0x2b0] sm:$0xf] }
 0x5c3   :  { %v5121_v58 = vor.u32 %v5629_v57, %v5120_v56  ;;  %v4912_v59 = vld [vmem:[%s8463_s10 + $0x110] sm:$0xf]  ;;  %v5645_v57 = vld [vmem:[%s8463_s10 + $0x334] sm:$0xf0] }
 0x5c4   :  { %v4913_v61 = vor.u32 %v5577_v60, %v4912_v59  ;;  %v5184_v56 = vld [vmem:[%s8463_s10 + $0x330] sm:$0xf] }
 0x5c6   :  { %3435 = vmatpush.bf16.msra.mxu1 %v4777_v3  ;;  %3449 = vmatpush.bf16.msra.mxu0 %v4841_v4  ;;  %v5595_v3 = vld [vmem:[%s8463_s10 + $0x1a4] sm:$0xf0] }
 0x5c7   :  { %3462 = vmatpush.bf16.msrb.mxu2 %v4913_v61  ;;  %v4985_v4 = vor.u32 %v5595_v3, %v4984_v2  ;;  %v5256_v61 = vld [vmem:[%s8463_s10 + $0x3c0] sm:$0xf] }
 0x5c8   :  { %v5257_v3 = vor.u32 %v5663_v62, %v5256_v61 }
 0x5c9   :  { %3475 = vmatpush.bf16.msrb.mxu3 %v4985_v4 }
 0x5ca   :  { %3484 = vmatpush.bf16.msrb.mxu1 %v5089_v5  ;;  %3498 = vmatpush.bf16.msrb.mxu0 %v5153_v6  ;;  %v5112_v5 = vld [vmem:[%s8463_s10 + $0x2a0] sm:$0xf]  ;;  %v5627_v6 = vld [vmem:[%s8463_s10 + $0x2a4] sm:$0xf0] }
 0x5cb   :  { %v5113_v8 = vor.u32 %v5627_v6, %v5112_v5  ;;  %v5176_v6 = vld [vmem:[%s8463_s10 + $0x320] sm:$0xf] }
 0x5cd   :  { %3476 = vmatpush.bf16.msrb.mxu3 %v4977_v23  ;;  %v5641_v23 = vld [vmem:[%s8463_s10 + $0x314] sm:$0xf0] }
 0x5ce   :  { %3485 = vmatpush.bf16.msrb.mxu1 %v5081_v10  ;;  %3499 = vmatpush.bf16.msrb.mxu0 %v5145_v21  ;;  %v5575_v10 = vld [vmem:[%s8463_s10 + $0x104] sm:$0xf0]  ;;  %v5217_v21 = vor.u32 %v5653_v17, %v5216_v15  ;;  %v5661_v15 = vld [vmem:[%s8463_s10 + $0x3b4] sm:$0xf0] }
 0x5cf   :  { %v4905_v11 = vor.u32 %v5575_v10, %v4904_v9  ;;  %v5556_v9 = vld [vmem:[%s8463_s10 + $0x74] sm:$0xf] }
 0x5d1   :  { %3463 = vmatpush.bf16.msrb.mxu2 %v4905_v11  ;;  %3477 = vmatpush.bf16.msrb.mxu3 %v4969_v34  ;;  %v5659_v34 = vld [vmem:[%s8463_s10 + $0x3a4] sm:$0xf0] }
 0x5d2   :  { %3486 = vmatpush.bf16.msrb.mxu1 %v5073_v13  ;;  %3500 = vmatpush.bf16.msrb.mxu0 %v5137_v35  ;;  %v5607_v13 = vld [vmem:[%s8463_s10 + $0x204] sm:$0xf0]  ;;  %v5241_v41 = vor.u32 %v5659_v34, %v5240_v32 }
 0x5d3   :  { %v5033_v16 = vor.u32 %v5607_v13, %v5032_v12  ;;  %v5623_v35 = vld [vmem:[%s8463_s10 + $0x284] sm:$0xf0]  ;;  %v4834_v12 = vld [vmem:[%s8463_s10 + $0x78] sm:$0xf0]  ;;  %v5248_v13 = vld [vmem:[%s8463_s10 + $0x3b0] sm:$0xf] }
 0x5d4   :  { %v5097_v37 = vor.u32 %v5623_v35, %v5096_v53  ;;  %v5249_v17 = vor.u32 %v5661_v15, %v5248_v13  ;;  %v4837_v24 = vor.u32 %v5556_v9, %v4834_v12  ;;  %v5568_v12 = vld [vmem:[%s8463_s10 + $0xd4] sm:$0xf]  ;;  %v4882_v13 = vld [vmem:[%s8463_s10 + $0xd8] sm:$0xf0] }
 0x5d5   :  { %3512 = vmatpush.bf16.msra.mxu2 %v5217_v21  ;;  %3526 = vmatpush.bf16.msra.mxu3 %v5281_v40  ;;  %v5168_v21 = vld [vmem:[%s8463_s10 + $0x310] sm:$0xf]  ;;  %v1752_v40 = vperm.slane %v7931_v44, 2  ;;  %v5548_v15 = vld [vmem:[%s8463_s10 + $0x34] sm:$0xf]  ;;  %v4885_v25 = vor.u32 %v5568_v12, %v4882_v13 }
 0x5d6   :  { %3487 = vmatpush.bf16.msrb.mxu1 %v5065_v29  ;;  %3501 = vmatpush.bf16.msrb.mxu0 %v5129_v22  ;;  %v5209_v29 = vor.u32 %v5651_v28, %v5208_v27 }
 0x5d9   :  { %3513 = vmatpush.bf16.msra.mxu2 %v5209_v29  ;;  %3527 = vmatpush.bf16.msra.mxu3 %v5273_v49 }
 0x5da   :  { %3488 = vmatpush.bf16.msrb.mxu1 %v5057_v43  ;;  %3502 = vmatpush.bf16.msrb.mxu0 %v5121_v58  ;;  %v5649_v43 = vld [vmem:[%s8463_s10 + $0x354] sm:$0xf0]  ;;  %v5185_v58 = vor.u32 %v5645_v57, %v5184_v56 }
 0x5db   :  { %v5201_v14 = vor.u32 %v5649_v43, %v5200_v42  ;;  %v5160_v42 = vld [vmem:[%s8463_s10 + $0x300] sm:$0xf]  ;;  %v5639_v43 = vld [vmem:[%s8463_s10 + $0x304] sm:$0xf0] }
 0x5dc   :  { %v5161_v49 = vor.u32 %v5639_v43, %v5160_v42  ;;  %v1754_v43 = vperm.slane %v7931_v44, 4 }
 0x5dd   :  { %3514 = vmatpush.bf16.msra.mxu2 %v5201_v14 }
 0x5de   :  { %3489 = vmatpush.bf16.msrb.mxu1 %v5049_v33  ;;  %3503 = vmatpush.bf16.msrb.mxu0 %v5113_v8  ;;  %v5264_v33 = vld [vmem:[%s8463_s10 + $0x3d0] sm:$0xf]  ;;  %v5643_v8 = vld [vmem:[%s8463_s10 + $0x324] sm:$0xf0] }
 0x5df   :  { %v5265_v54 = vor.u32 %v5665_v36, %v5264_v33  ;;  %v5177_v10 = vor.u32 %v5643_v8, %v5176_v6  ;;  %v5233_v36 = vor.u32 %v5657_v52, %v5232_v51  ;;  %v5544_v51 = vld [vmem:[%s8463_s10 + $0x14] sm:$0xf] }
 0x5e1   :  { %3515 = vmatpush.bf16.msra.mxu2 %v5193_v38  ;;  %3528 = vmatpush.bf16.msra.mxu3 %v5265_v54 }
 0x5e2   :  { %3490 = vmatpush.bf16.msrb.mxu1 %v5041_v0  ;;  %3504 = vmatpush.bf16.msrb.mxu0 %v5105_v26  ;;  %v5169_v26 = vor.u32 %v5641_v23, %v5168_v21 }
 0x5e5   :  { %v2415_v20 = vpop.f32.mrf.mxu1  ;;  %v2429_v22 = vpop.f32.mrf.mxu0  ;;  %3516 = vmatpush.bf16.msra.mxu2 %v5185_v58  ;;  %3529 = vmatpush.bf16.msra.mxu3 %v5257_v3  ;;  %v5570_v58 = vld [vmem:[%s8463_s10 + $0xe4] sm:$0xf]  ;;  %v1753_v3 = vperm.slane %v7931_v44, 3 }
 0x5e6   :  { %3491 = vmatpush.bf16.msrb.mxu1 %v5033_v16  ;;  %3505 = vmatpush.bf16.msrb.mxu0 %v5097_v37  ;;  %v2416_v55 = vadd.f32 %v2415_v20, %v1750_v50  ;;  %v4898_v20 = vld [vmem:[%s8463_s10 + $0xf8] sm:$0xf0] }
 0x5e8   :  { %v2430_v4 = vadd.f32 %v2429_v22, %v2416_v55  ;;  %v5552_v22 = vld [vmem:[%s8463_s10 + $0x54] sm:$0xf]  ;;  %v4901_v55 = vor.u32 %v5572_v45, %v4898_v20  ;;  %v4866_v45 = vld [vmem:[%s8463_s10 + $0xb8] sm:$0xf0] }
 0x5e9   :  { %3517 = vmatpush.bf16.msra.mxu2 %v5177_v10  ;;  %3530 = vmatpush.bf16.msra.mxu3 %v5249_v17  ;;  %v4802_v17 = vld [vmem:[%s8463_s10 + $0x38] sm:$0xf0] }
 0x5ea   :  { %v2630_v18 = vmax.f32 %v2430_v4, 0.0 }
 0x5ec   :  { %v2443_v59 = vpop.f32.mrf.mxu2  ;;  %v2457_v60 = vpop.f32.mrf.mxu3 }
 0x5ed   :  { %v2417_v0 = vpop.f32.mrf.mxu1  ;;  %v2431_v2 = vpop.f32.mrf.mxu0  ;;  %v2444_v16 = vadd.f32 %v2443_v59, %v1751_v63  ;;  %3518 = vmatpush.bf16.msra.mxu2 %v5169_v26  ;;  %3531 = vmatpush.bf16.msra.mxu3 %v5241_v41  ;;  %v4890_v59 = vld [vmem:[%s8463_s10 + $0xe8] sm:$0xf0]  ;;  %v4805_v26 = vor.u32 %v5548_v15, %v4802_v17 }
 0x5ee   :  { %v2418_v5 = vadd.f32 %v2417_v0, %v1750_v50  ;;  %v4818_v50 = vld [vmem:[%s8463_s10 + $0x58] sm:$0xf0]  ;;  %v5224_v0 = vld [vmem:[%s8463_s10 + $0x380] sm:$0xf]  ;;  %v4893_v10 = vor.u32 %v5570_v58, %v4890_v59  ;;  %v4954_v41 = vld [vmem:[%s8463_s10 + $0x168] sm:$0xf0] }
 0x5ef   :  { %v2458_v53 = vadd.f32 %v2457_v60, %v2444_v16  ;;  %v4821_v57 = vor.u32 %v5552_v22, %v4818_v50  ;;  %v5550_v60 = vld [vmem:[%s8463_s10 + $0x44] sm:$0xf] }
 0x5f0   :  { %v2432_v11 = vadd.f32 %v2431_v2, %v2418_v5  ;;  %v5655_v2 = vld [vmem:[%s8463_s10 + $0x384] sm:$0xf0] }
 0x5f1   :  { %v2631_v38 = vmax.f32 %v2458_v53, 0.0  ;;  %3519 = vmatpush.bf16.msra.mxu2 %v5161_v49  ;;  %3532 = vmatpush.bf16.msra.mxu3 %v5233_v36  ;;  %v5225_v6 = vor.u32 %v5655_v2, %v5224_v0  ;;  %v4786_v36 = vld [vmem:[%s8463_s10 + $0x18] sm:$0xf0]  ;;  %v5542_v2 = vld [vmem:[%s8463_s10 + $0x4] sm:$0xf] }
 0x5f2   :  { %v2638_v19 = vmax.f32 %v2432_v11, 0.0  ;;  %v4789_v0 = vor.u32 %v5544_v51, %v4786_v36  ;;  %v5082_v36 = vld [vmem:[%s8463_s10 + $0x268] sm:$0xf0] }
 0x5f4   :  { %v7992_v27 = vpack.c.bf16 %v2638_v19, %v2630_v18  ;;  %v2445_v28 = vpop.f32.mrf.mxu2  ;;  %v2459_v29 = vpop.f32.mrf.mxu3  ;;  %v5588_v18 = vld [vmem:[%s8463_s10 + $0x174] sm:$0xf]  ;;  %v4962_v19 = vld [vmem:[%s8463_s10 + $0x178] sm:$0xf0] }
 0x5f5   :  { %v2446_v35 = vadd.f32 %v2445_v28, %v1751_v63  ;;  %v2471_v37 = vpop.f32.mrf.mxu1  ;;  %v2485_v39 = vpop.f32.mrf.mxu0  ;;  %v4810_v63 = vld [vmem:[%s8463_s10 + $0x48] sm:$0xf0]  ;;  %3533 = vmatpush.bf16.msra.mxu3 %v5225_v6  ;;  %v5566_v28 = vld [vmem:[%s8463_s10 + $0xc4] sm:$0xf]  ;;  %v4965_v32 = vor.u32 %v5588_v18, %v4962_v19 }
 0x5f6   :  { %3436 = vmatmul.bf16.vlgmr.msra.gmra.mxu1 %v7992_v27  ;;  %v2472_v54 = vadd.f32 %v2471_v37, %v1752_v40  ;;  %v4813_v11 = vor.u32 %v5550_v60, %v4810_v63  ;;  %v4794_v37 = vld [vmem:[%s8463_s10 + $0x28] sm:$0xf0]  ;;  %v5562_v60 = vld [vmem:[%s8463_s10 + $0xa4] sm:$0xf] }
 0x5f7   :  { %v2460_v14 = vadd.f32 %v2459_v29, %v2446_v35  ;;  %3540 = vmatpush.bf16.msra.mxu1 %v4837_v24  ;;  %v4874_v29 = vld [vmem:[%s8463_s10 + $0xc8] sm:$0xf0]  ;;  %v4797_v50 = vor.u32 %v5546_v30, %v4794_v37  ;;  %v4930_v30 = vld [vmem:[%s8463_s10 + $0x138] sm:$0xf0] }
 0x5f8   :  { %v2486_v8 = vadd.f32 %v2485_v39, %v2472_v54  ;;  %v5586_v39 = vld [vmem:[%s8463_s10 + $0x164] sm:$0xf]  ;;  %v5584_v54 = vld [vmem:[%s8463_s10 + $0x154] sm:$0xf]  ;;  %v5090_v37 = vld [vmem:[%s8463_s10 + $0x278] sm:$0xf0] }
 0x5f9   :  { %v2639_v33 = vmax.f32 %v2460_v14, 0.0  ;;  %v4877_v14 = vor.u32 %v5566_v28, %v4874_v29  ;;  %v4957_v52 = vor.u32 %v5586_v39, %v4954_v41  ;;  %v5580_v29 = vld [vmem:[%s8463_s10 + $0x134] sm:$0xf]  ;;  %v5558_v41 = vld [vmem:[%s8463_s10 + $0x84] sm:$0xf] }
 0x5fa   :  { %v2632_v23 = vmax.f32 %v2486_v8, 0.0  ;;  %v4778_v8 = vld [vmem:[%s8463_s10 + $0x8] sm:$0xf0] }
 0x5fb   :  { %v8029_v56 = vpack.c.bf16 %v2639_v33, %v2631_v38  ;;  %3541 = vmatpush.bf16.msra.mxu1 %v4829_v47  ;;  %v5564_v47 = vld [vmem:[%s8463_s10 + $0xb4] sm:$0xf]  ;;  %v5026_v33 = vld [vmem:[%s8463_s10 + $0x1f8] sm:$0xf0]  ;;  %v4781_v19 = vor.u32 %v5542_v2, %v4778_v8 }
 0x5fc   :  { %v2499_v61 = vpop.f32.mrf.mxu2  ;;  %v2513_v62 = vpop.f32.mrf.mxu3  ;;  %v5604_v38 = vld [vmem:[%s8463_s10 + $0x1f4] sm:$0xf]  ;;  %v4869_v59 = vor.u32 %v5564_v47, %v4866_v45  ;;  %v5598_v47 = vld [vmem:[%s8463_s10 + $0x1c4] sm:$0xf]  ;;  %v5002_v45 = vld [vmem:[%s8463_s10 + $0x1c8] sm:$0xf0] }
 0x5fd   :  { %3450 = vmatmul.bf16.vlgmr.msra.gmra.mxu0 %v8029_v56  ;;  %v2473_v4 = vpop.f32.mrf.mxu1  ;;  %v2487_v5 = vpop.f32.mrf.mxu0  ;;  %v2500_v21 = vadd.f32 %v2499_v61, %v1753_v3  ;;  %v4858_v61 = vld [vmem:[%s8463_s10 + $0xa8] sm:$0xf0]  ;;  %v4914_v2 = vld [vmem:[%s8463_s10 + $0x118] sm:$0xf0]  ;;  %v5616_v8 = vld [vmem:[%s8463_s10 + $0x254] sm:$0xf] }
 0x5fe   :  { %v2474_v9 = vadd.f32 %v2473_v4, %v1752_v40  ;;  %3554 = vmatpush.bf16.msra.mxu0 %v4901_v55  ;;  %v4946_v55 = vld [vmem:[%s8463_s10 + $0x158] sm:$0xf0]  ;;  %v5602_v4 = vld [vmem:[%s8463_s10 + $0x1e4] sm:$0xf]  ;;  %v4861_v15 = vor.u32 %v5562_v60, %v4858_v61  ;;  %v5596_v60 = vld [vmem:[%s8463_s10 + $0x1b4] sm:$0xf] }
 0x5ff   :  { %3542 = vmatpush.bf16.msra.mxu1 %v4821_v57  ;;  %v2514_v40 = vadd.f32 %v2513_v62, %v2500_v21  ;;  %v5029_v62 = vor.u32 %v5604_v38, %v5026_v33  ;;  %v4850_v21 = vld [vmem:[%s8463_s10 + $0x98] sm:$0xf0]  ;;  %v5618_v33 = vld [vmem:[%s8463_s10 + $0x264] sm:$0xf] }
 0x600   :  { %v2488_v16 = vadd.f32 %v2487_v5, %v2474_v9  ;;  %v5018_v5 = vld [vmem:[%s8463_s10 + $0x1e8] sm:$0xf0]  ;;  %v5582_v9 = vld [vmem:[%s8463_s10 + $0x144] sm:$0xf]  ;;  %v4994_v61 = vld [vmem:[%s8463_s10 + $0x1b8] sm:$0xf0] }
 0x601   :  { %v2633_v57 = vmax.f32 %v2514_v40, 0.0  ;;  %v5021_v17 = vor.u32 %v5602_v4, %v5018_v5  ;;  %v5085_v4 = vor.u32 %v5618_v33, %v5082_v36  ;;  %v5636_v5 = vld [vmem:[%s8463_s10 + $0x2f4] sm:$0xf]  ;;  %v5610_v33 = vld [vmem:[%s8463_s10 + $0x224] sm:$0xf] }
 0x602   :  { %v2640_v24 = vmax.f32 %v2488_v16, 0.0  ;;  %3555 = vmatpush.bf16.msra.mxu0 %v4893_v10  ;;  %v4938_v10 = vld [vmem:[%s8463_s10 + $0x148] sm:$0xf0]  ;;  %v5560_v16 = vld [vmem:[%s8463_s10 + $0x94] sm:$0xf] }
 0x603   :  { %3543 = vmatpush.bf16.msra.mxu1 %v4813_v11  ;;  %v1755_v11 = vperm.slane %v7931_v44, 5  ;;  %v4853_v39 = vor.u32 %v5560_v16, %v4850_v21  ;;  %v4986_v16 = vld [vmem:[%s8463_s10 + $0x1a8] sm:$0xf0] }
 0x604   :  { %v8078_v34 = vpack.c.bf16 %v2640_v24, %v2632_v23  ;;  %v2501_v53 = vpop.f32.mrf.mxu2  ;;  %v2515_v35 = vpop.f32.mrf.mxu3  ;;  %v4941_v23 = vor.u32 %v5582_v9, %v4938_v10  ;;  %v5600_v24 = vld [vmem:[%s8463_s10 + $0x1d4] sm:$0xf]  ;;  %v5074_v9 = vld [vmem:[%s8463_s10 + $0x258] sm:$0xf0]  ;;  %v4997_v10 = vor.u32 %v5596_v60, %v4994_v61  ;;  %v5050_v36 = vld [vmem:[%s8463_s10 + $0x228] sm:$0xf0] }
 0x605   :  { %v2502_v42 = vadd.f32 %v2501_v53, %v1753_v3  ;;  %v4949_v3 = vor.u32 %v5584_v54, %v4946_v55  ;;  %v5005_v55 = vor.u32 %v5598_v47, %v5002_v45  ;;  %v4970_v47 = vld [vmem:[%s8463_s10 + $0x188] sm:$0xf0]  ;;  %v5122_v60 = vld [vmem:[%s8463_s10 + $0x2b8] sm:$0xf0]  ;;  %v5608_v61 = vld [vmem:[%s8463_s10 + $0x214] sm:$0xf] }
 0x606   :  { %3464 = vmatmul.bf16.vlgmr.msrb.gmra.mxu2 %v8078_v34  ;;  %3556 = vmatpush.bf16.msra.mxu0 %v4885_v25  ;;  %v2527_v22 = vpop.f32.mrf.mxu1  ;;  %v2541_v49 = vpop.f32.mrf.mxu0  ;;  %v5010_v25 = vld [vmem:[%s8463_s10 + $0x1d8] sm:$0xf0] }
 0x607   :  { %v2516_v20 = vadd.f32 %v2515_v35, %v2502_v42  ;;  %3544 = vmatpush.bf16.msra.mxu1 %v4805_v26  ;;  %3568 = vmatpush.bf16.msrb.mxu2 %v4965_v32  ;;  %v2528_v6 = vadd.f32 %v2527_v22, %v1754_v43  ;;  %v5620_v35 = vld [vmem:[%s8463_s10 + $0x274] sm:$0xf]  ;;  %v5013_v40 = vor.u32 %v5600_v24, %v5010_v25  ;;  %v5634_v24 = vld [vmem:[%s8463_s10 + $0x2e4] sm:$0xf]  ;;  %v5146_v25 = vld [vmem:[%s8463_s10 + $0x2e8] sm:$0xf0] }
 0x608   :  { %v5093_v51 = vor.u32 %v5620_v35, %v5090_v37  ;;  %v5149_v35 = vor.u32 %v5634_v24, %v5146_v25  ;;  %v5624_v25 = vld [vmem:[%s8463_s10 + $0x294] sm:$0xf] }
 0x609   :  { %v2641_v58 = vmax.f32 %v2516_v20, 0.0  ;;  %v2542_v26 = vadd.f32 %v2541_v49, %v2528_v6  ;;  %v5578_v49 = vld [vmem:[%s8463_s10 + $0x124] sm:$0xf]  ;;  %v5154_v6 = vld [vmem:[%s8463_s10 + $0x2f8] sm:$0xf0] }
 0x60a   :  { %3557 = vmatpush.bf16.msra.mxu0 %v4877_v14  ;;  %v4933_v14 = vor.u32 %v5580_v29, %v4930_v30 }
 0x60b   :  { %v8121_v63 = vpack.c.bf16 %v2641_v58, %v2633_v57  ;;  %3545 = vmatpush.bf16.msra.mxu1 %v4797_v50  ;;  %3569 = vmatpush.bf16.msrb.mxu2 %v4957_v52  ;;  %v2634_v20 = vmax.f32 %v2542_v26, 0.0  ;;  %v4922_v50 = vld [vmem:[%s8463_s10 + $0x128] sm:$0xf0]  ;;  %v5614_v26 = vld [vmem:[%s8463_s10 + $0x244] sm:$0xf] }
 0x60d   :  { %3478 = vmatmul.bf16.vlgmr.msrb.gmra.mxu3 %v8121_v63 }
 0x60e   :  { %3558 = vmatpush.bf16.msra.mxu0 %v4869_v59  ;;  %3582 = vmatpush.bf16.msrb.mxu3 %v5029_v62  ;;  %v2529_v18 = vpop.f32.mrf.mxu1  ;;  %v2543_v32 = vpop.f32.mrf.mxu0  ;;  %v4925_v59 = vor.u32 %v5578_v49, %v4922_v50  ;;  %v1756_v49 = vperm.slane %v7931_v44, 6 }
 0x60f   :  { %v2555_v12 = vpop.f32.mrf.mxu2  ;;  %v2569_v13 = vpop.f32.mrf.mxu3  ;;  %3546 = vmatpush.bf16.msra.mxu1 %v4789_v0  ;;  %3570 = vmatpush.bf16.msrb.mxu2 %v4949_v3  ;;  %v2530_v28 = vadd.f32 %v2529_v18, %v1754_v43  ;;  %v4842_v43 = vld [vmem:[%s8463_s10 + $0x88] sm:$0xf0]  ;;  %v5576_v0 = vld [vmem:[%s8463_s10 + $0x114] sm:$0xf]  ;;  %v5574_v18 = vld [vmem:[%s8463_s10 + $0x104] sm:$0xf] }
 0x610   :  { %v2556_v42 = vadd.f32 %v2555_v12, %v1755_v11  ;;  %v4845_v54 = vor.u32 %v5558_v41, %v4842_v43  ;;  %v5138_v41 = vld [vmem:[%s8463_s10 + $0x2d8] sm:$0xf0] }
 0x611   :  { %v2544_v53 = vadd.f32 %v2543_v32, %v2530_v28  ;;  %v5066_v28 = vld [vmem:[%s8463_s10 + $0x248] sm:$0xf0]  ;;  %v5592_v32 = vld [vmem:[%s8463_s10 + $0x194] sm:$0xf] }
 0x612   :  { %3559 = vmatpush.bf16.msra.mxu0 %v4861_v15  ;;  %3583 = vmatpush.bf16.msrb.mxu3 %v5021_v17  ;;  %v2570_v57 = vadd.f32 %v2569_v13, %v2556_v42  ;;  %v4917_v13 = vor.u32 %v5576_v0, %v4914_v2  ;;  %v5594_v15 = vld [vmem:[%s8463_s10 + $0x1a4] sm:$0xf]  ;;  %v5157_v17 = vor.u32 %v5636_v5, %v5154_v6  ;;  %v5058_v42 = vld [vmem:[%s8463_s10 + $0x238] sm:$0xf0]  ;;  %v1757_v2 = vperm.slane %v7931_v44, 7 }
 0x613   :  { %3547 = vmatpush.bf16.msra.mxu1 %v4781_v19  ;;  %3571 = vmatpush.bf16.msrb.mxu2 %v4941_v23  ;;  %v2642_v22 = vmax.f32 %v2544_v53, 0.0  ;;  %v4906_v19 = vld [vmem:[%s8463_s10 + $0x108] sm:$0xf0]  ;;  %v5077_v23 = vor.u32 %v5616_v8, %v5074_v9  ;;  %v4989_v29 = vor.u32 %v5594_v15, %v4986_v16  ;;  %v4978_v53 = vld [vmem:[%s8463_s10 + $0x198] sm:$0xf0]  ;;  %v5069_v37 = vor.u32 %v5614_v26, %v5066_v28 }
 0x614   :  { %v4909_v30 = vor.u32 %v5574_v18, %v4906_v19  ;;  %v4981_v43 = vor.u32 %v5592_v32, %v4978_v53  ;;  %v5626_v9 = vld [vmem:[%s8463_s10 + $0x2a4] sm:$0xf]  ;;  %v5652_v15 = vld [vmem:[%s8463_s10 + $0x374] sm:$0xf]  ;;  %v5218_v16 = vld [vmem:[%s8463_s10 + $0x378] sm:$0xf0] }
 0x615   :  { %v8185_v52 = vpack.c.bf16 %v2642_v22, %v2634_v20  ;;  %v5606_v44 = vld [vmem:[%s8463_s10 + $0x204] sm:$0xf]  ;;  %v5221_v26 = vor.u32 %v5652_v15, %v5218_v16  ;;  %v5210_v32 = vld [vmem:[%s8463_s10 + $0x368] sm:$0xf0] }
 0x616   :  { %3560 = vmatpush.bf16.msra.mxu0 %v4853_v39  ;;  %3584 = vmatpush.bf16.msrb.mxu3 %v5013_v40  ;;  %v5632_v39 = vld [vmem:[%s8463_s10 + $0x2d4] sm:$0xf]  ;;  %v5638_v15 = vld [vmem:[%s8463_s10 + $0x304] sm:$0xf]  ;;  %v5162_v16 = vld [vmem:[%s8463_s10 + $0x308] sm:$0xf0] }
 0x617   :  { %v2557_v38 = vpop.f32.mrf.mxu2  ;;  %3572 = vmatpush.bf16.msrb.mxu2 %v4933_v14  ;;  %v2571_v62 = vpop.f32.mrf.mxu3  ;;  %3492 = vmatmul.bf16.vlgmr.msrb.gmra.mxu1 %v8185_v52  ;;  %v5612_v40 = vld [vmem:[%s8463_s10 + $0x234] sm:$0xf]  ;;  %v5590_v14 = vld [vmem:[%s8463_s10 + $0x184] sm:$0xf]  ;;  %v5141_v22 = vor.u32 %v5632_v39, %v5138_v41 }
 0x618   :  { %v2558_v58 = vadd.f32 %v2557_v38, %v1755_v11  ;;  %3596 = vmatpush.bf16.msrb.mxu1 %v5093_v51  ;;  %v2635_v11 = vmax.f32 %v2570_v57, 0.0  ;;  %v5061_v50 = vor.u32 %v5612_v40, %v5058_v42  ;;  %v5630_v51 = vld [vmem:[%s8463_s10 + $0x2c4] sm:$0xf]  ;;  %v5130_v38 = vld [vmem:[%s8463_s10 + $0x2c8] sm:$0xf0] }
 0x619   :  { %v5622_v41 = vld [vmem:[%s8463_s10 + $0x284] sm:$0xf]  ;;  %v5098_v40 = vld [vmem:[%s8463_s10 + $0x288] sm:$0xf0] }
 0x61a   :  { %v2572_v3 = vadd.f32 %v2571_v62, %v2558_v58  ;;  %3561 = vmatpush.bf16.msra.mxu0 %v4845_v54  ;;  %3585 = vmatpush.bf16.msrb.mxu3 %v5005_v55  ;;  %v4973_v54 = vor.u32 %v5590_v14, %v4970_v47  ;;  %v5133_v55 = vor.u32 %v5630_v51, %v5130_v38  ;;  %v5668_v14 = vld [vmem:[%s8463_s10 + $0x3f4] sm:$0xf]  ;;  %v5282_v47 = vld [vmem:[%s8463_s10 + $0x3f8] sm:$0xf0] }
 0x61b   :  { %3573 = vmatpush.bf16.msrb.mxu2 %v4925_v59  ;;  %v5053_v58 = vor.u32 %v5610_v33, %v5050_v36  ;;  %v5628_v59 = vld [vmem:[%s8463_s10 + $0x2b4] sm:$0xf]  ;;  %v5285_v51 = vor.u32 %v5668_v14, %v5282_v47  ;;  %v5666_v36 = vld [vmem:[%s8463_s10 + $0x3e4] sm:$0xf] }
 0x61c   :  { %v2643_v12 = vmax.f32 %v2572_v3, 0.0  ;;  %3597 = vmatpush.bf16.msrb.mxu1 %v5085_v4  ;;  %v5125_v4 = vor.u32 %v5628_v59, %v5122_v60  ;;  %v5664_v59 = vld [vmem:[%s8463_s10 + $0x3d4] sm:$0xf]  ;;  %v5266_v60 = vld [vmem:[%s8463_s10 + $0x3d8] sm:$0xf0] }
 0x61e   :  { %v8230_v21 = vpack.c.bf16 %v2643_v12, %v2635_v11  ;;  %3586 = vmatpush.bf16.msrb.mxu3 %v4997_v10  ;;  %v5114_v10 = vld [vmem:[%s8463_s10 + $0x2a8] sm:$0xf0] }
 0x61f   :  { %3574 = vmatpush.bf16.msrb.mxu2 %v4917_v13  ;;  %v5034_v12 = vld [vmem:[%s8463_s10 + $0x208] sm:$0xf0]  ;;  %v5117_v18 = vor.u32 %v5626_v9, %v5114_v10  ;;  %v5250_v9 = vld [vmem:[%s8463_s10 + $0x3b8] sm:$0xf0]  ;;  %v5640_v10 = vld [vmem:[%s8463_s10 + $0x314] sm:$0xf] }
 0x620   :  { %3506 = vmatmul.bf16.vlgmr.msrb.gmra.mxu0 %v8230_v21  ;;  %3598 = vmatpush.bf16.msrb.mxu1 %v5077_v23  ;;  %v5037_v24 = vor.u32 %v5606_v44, %v5034_v12  ;;  %v5658_v12 = vld [vmem:[%s8463_s10 + $0x3a4] sm:$0xf] }
 0x621   :  { %3610 = vmatpush.bf16.msrb.mxu0 %v5157_v17 }
 0x622   :  { %3587 = vmatpush.bf16.msrb.mxu3 %v4989_v29 }
 0x623   :  { %3575 = vmatpush.bf16.msrb.mxu2 %v4909_v30  ;;  %v5650_v30 = vld [vmem:[%s8463_s10 + $0x364] sm:$0xf] }
 0x624   :  { %3599 = vmatpush.bf16.msrb.mxu1 %v5069_v37 }
 0x625   :  { %3611 = vmatpush.bf16.msrb.mxu0 %v5149_v35 }
 0x626   :  { %v2583_v45 = vpop.f32.mrf.mxu1  ;;  %v2597_v20 = vpop.f32.mrf.mxu0  ;;  %3588 = vmatpush.bf16.msrb.mxu3 %v4981_v43  ;;  %v5213_v43 = vor.u32 %v5650_v30, %v5210_v32 }
 0x627   :  { %3548 = vmatmul.bf16.vlgmr.msra.gmra.mxu1 %v7992_v27  ;;  %v2584_v57 = vadd.f32 %v2583_v45, %v1756_v49  ;;  %v5042_v27 = vld [vmem:[%s8463_s10 + $0x218] sm:$0xf0]  ;;  %v5648_v45 = vld [vmem:[%s8463_s10 + $0x354] sm:$0xf] }
 0x628   :  { %3600 = vmatpush.bf16.msrb.mxu1 %v5061_v50  ;;  %v5045_v8 = vor.u32 %v5608_v61, %v5042_v27  ;;  %v5101_v50 = vor.u32 %v5622_v41, %v5098_v40  ;;  %v5644_v61 = vld [vmem:[%s8463_s10 + $0x334] sm:$0xf]  ;;  %v5186_v27 = vld [vmem:[%s8463_s10 + $0x338] sm:$0xf0] }
 0x629   :  { %3612 = vmatpush.bf16.msrb.mxu0 %v5141_v22  ;;  %v2598_v5 = vadd.f32 %v2597_v20, %v2584_v57  ;;  %v5202_v20 = vld [vmem:[%s8463_s10 + $0x358] sm:$0xf0] }
 0x62a   :  { %3589 = vmatpush.bf16.msrb.mxu3 %v4973_v54  ;;  %v5205_v33 = vor.u32 %v5648_v45, %v5202_v20  ;;  %v5274_v54 = vld [vmem:[%s8463_s10 + $0x3e8] sm:$0xf0] }
 0x62b   :  { %v2636_v19 = vmax.f32 %v2598_v5, 0.0  ;;  %v5277_v57 = vor.u32 %v5666_v36, %v5274_v54 }
 0x62c   :  { %3601 = vmatpush.bf16.msrb.mxu1 %v5053_v58 }
 0x62d   :  { %3613 = vmatpush.bf16.msrb.mxu0 %v5133_v55  ;;  %v5646_v55 = vld [vmem:[%s8463_s10 + $0x344] sm:$0xf] }
 0x62e   :  { %v2611_v62 = vpop.f32.mrf.mxu2  ;;  %v2625_v0 = vpop.f32.mrf.mxu3 }
 0x62f   :  { %v2585_v3 = vpop.f32.mrf.mxu1  ;;  %v2599_v11 = vpop.f32.mrf.mxu0  ;;  %v2612_v17 = vadd.f32 %v2611_v62, %v1757_v2  ;;  %v5269_v62 = vor.u32 %v5664_v59, %v5266_v60 }
 0x630   :  { %v2586_v6 = vadd.f32 %v2585_v3, %v1756_v49  ;;  %3562 = vmatmul.bf16.vlgmr.msra.gmra.mxu0 %v8029_v56  ;;  %3602 = vmatpush.bf16.msrb.mxu1 %v5045_v8  ;;  %v5106_v56 = vld [vmem:[%s8463_s10 + $0x298] sm:$0xf0]  ;;  %v5642_v3 = vld [vmem:[%s8463_s10 + $0x324] sm:$0xf]  ;;  %v5660_v8 = vld [vmem:[%s8463_s10 + $0x3b4] sm:$0xf] }
 0x631   :  { %3614 = vmatpush.bf16.msrb.mxu0 %v5125_v4  ;;  %v2626_v53 = vadd.f32 %v2625_v0, %v2612_v17  ;;  %v5109_v37 = vor.u32 %v5624_v25, %v5106_v56  ;;  %v5189_v0 = vor.u32 %v5644_v61, %v5186_v27  ;;  %v5178_v4 = vld [vmem:[%s8463_s10 + $0x328] sm:$0xf0]  ;;  %v5654_v25 = vld [vmem:[%s8463_s10 + $0x384] sm:$0xf] }
 0x632   :  { %v2600_v13 = vadd.f32 %v2599_v11, %v2586_v6  ;;  %v5181_v6 = vor.u32 %v5642_v3, %v5178_v4  ;;  %v5170_v11 = vld [vmem:[%s8463_s10 + $0x318] sm:$0xf0] }
 0x633   :  { %v2637_v22 = vmax.f32 %v2626_v53, 0.0  ;;  %v5173_v44 = vor.u32 %v5640_v10, %v5170_v11 }
 0x634   :  { %v2644_v23 = vmax.f32 %v2600_v13, 0.0  ;;  %3603 = vmatpush.bf16.msrb.mxu1 %v5037_v24  ;;  %v5242_v13 = vld [vmem:[%s8463_s10 + $0x3a8] sm:$0xf0] }
 0x635   :  { %3615 = vmatpush.bf16.msrb.mxu0 %v5117_v18  ;;  %v5245_v17 = vor.u32 %v5658_v12, %v5242_v13  ;;  %v5165_v18 = vor.u32 %v5638_v15, %v5162_v16 }
 0x636   :  { %v8321_v28 = vpack.c.bf16 %v2644_v23, %v2636_v19  ;;  %v2613_v29 = vpop.f32.mrf.mxu2  ;;  %v2627_v39 = vpop.f32.mrf.mxu3  ;;  %v5656_v19 = vld [vmem:[%s8463_s10 + $0x394] sm:$0xf]  ;;  %v5234_v23 = vld [vmem:[%s8463_s10 + $0x398] sm:$0xf0] }
 0x637   :  { %v2614_v35 = vadd.f32 %v2613_v29, %v1757_v2  ;;  %3604 = vmatmul.bf16.vlgmr.msrb.gmra.mxu1 %v8185_v52  ;;  %v5194_v52 = vld [vmem:[%s8463_s10 + $0x348] sm:$0xf0]  ;;  %v5662_v2 = vld [vmem:[%s8463_s10 + $0x3c4] sm:$0xf]  ;;  %v5237_v24 = vor.u32 %v5656_v19, %v5234_v23 }
 0x638   :  { %3520 = vmatmul.bf16.vlgmr.msra.gmra.mxu2 %v8321_v28  ;;  %v5197_v58 = vor.u32 %v5646_v55, %v5194_v52 }
 0x639   :  { %v2628_v42 = vadd.f32 %v2627_v39, %v2614_v35  ;;  %3624 = vmatpush.bf16.msra.mxu2 %v5221_v26  ;;  %3616 = vmatpush.bf16.msrb.mxu0 %v5109_v37 }
 0x63b   :  { %v2645_v49 = vmax.f32 %v2628_v42, 0.0 }
 0x63d   :  { %v2653_v38 = vpack.c.bf16 %v2645_v49, %v2637_v22  ;;  %3625 = vmatpush.bf16.msra.mxu2 %v5213_v43  ;;  %3617 = vmatpush.bf16.msrb.mxu0 %v5101_v50  ;;  %v2782_v50 = vld [vmem:[%s8465_s11] sm:$0x3] }
 0x63f   :  { %3534 = vmatmul.bf16.vlgmr.msra.gmra.mxu3 %v2653_v38 }
 0x640   :  { %3638 = vmatpush.bf16.msra.mxu3 %v5285_v51  ;;  %3618 = vmatmul.bf16.vlgmr.msrb.gmra.mxu0 %v8230_v21  ;;  %v5258_v21 = vld [vmem:[%s8463_s10 + $0x3c8] sm:$0xf0]  ;;  %v2785_v51 = vperm.slane %v2782_v50, 1 }
 0x641   :  { %3626 = vmatpush.bf16.msra.mxu2 %v5205_v33  ;;  %v5261_v5 = vor.u32 %v5662_v2, %v5258_v21  ;;  %v2784_v33 = vperm.slane %v2782_v50, 0 }
 0x644   :  { %3639 = vmatpush.bf16.msra.mxu3 %v5277_v57 }
 0x645   :  { %3627 = vmatpush.bf16.msra.mxu2 %v5197_v58 }
 0x648   :  { %3640 = vmatpush.bf16.msra.mxu3 %v5269_v62  ;;  %3576 = vmatmul.bf16.vlgmr.msrb.gmra.mxu2 %v8078_v34  ;;  %v5253_v34 = vor.u32 %v5660_v8, %v5250_v9 }
 0x649   :  { %3628 = vmatpush.bf16.msra.mxu2 %v5189_v0 }
 0x64c   :  { %3641 = vmatpush.bf16.msra.mxu3 %v5261_v5 }
 0x64d   :  { %3629 = vmatpush.bf16.msra.mxu2 %v5181_v6 }
 0x64f   :  { %3590 = vmatmul.bf16.vlgmr.msrb.gmra.mxu3 %v8121_v63  ;;  %v5226_v63 = vld [vmem:[%s8463_s10 + $0x388] sm:$0xf0] }
 0x650   :  { %3642 = vmatpush.bf16.msra.mxu3 %v5253_v34  ;;  %v5229_v56 = vor.u32 %v5654_v25, %v5226_v63 }
 0x651   :  { %3630 = vmatpush.bf16.msra.mxu2 %v5173_v44 }
 0x654   :  { %3643 = vmatpush.bf16.msra.mxu3 %v5245_v17 }
 0x655   :  { %3631 = vmatpush.bf16.msra.mxu2 %v5165_v18 }
 0x658   :  { %3644 = vmatpush.bf16.msra.mxu3 %v5237_v24  ;;  %3632 = vmatmul.bf16.vlgmr.msra.gmra.mxu2 %v8321_v28 }
 0x65c   :  { %3645 = vmatpush.bf16.msra.mxu3 %v5229_v56 }
 0x65f   :  { %3646 = vmatmul.bf16.vlgmr.msra.gmra.mxu3 %v2653_v38 }
 0x673   :  { %v3437_v26 = vpop.f32.mrf.mxu1 }
 0x674   :  { %v3438_v52 = vadd.f32 %v3437_v26, %v2784_v33 }
 0x67a   :  { %v3451_v29 = vpop.f32.mrf.mxu0 }
 0x67b   :  { %v3439_v30 = vpop.f32.mrf.mxu1  ;;  %v3452_v59 = vadd.f32 %v3451_v29, %v3438_v52 }
 0x67c   :  { %v3440_v3 = vadd.f32 %v3439_v30, %v2784_v33 }
 0x682   :  { %v3453_v53 = vpop.f32.mrf.mxu0 }
 0x683   :  { %v3454_v10 = vadd.f32 %v3453_v53, %v3440_v3  ;;  %v3716_v3 = vld [vmem:[%s8467_s13] sm:$0x3] }
 0x689   :  { %v3465_v32 = vpop.f32.mrf.mxu2 }
 0x68a   :  { %v3466_v61 = vadd.f32 %v3465_v32, %v3452_v59 }
 0x690   :  { %v3479_v35 = vpop.f32.mrf.mxu3 }
 0x691   :  { %v3467_v39 = vpop.f32.mrf.mxu2  ;;  %v3480_v0 = vadd.f32 %v3479_v35, %v3466_v61 }
 0x692   :  { %v3468_v44 = vadd.f32 %v3467_v39, %v3454_v10  ;;  %v3718_v10 = vperm.slane %v3716_v3, 0 }
 0x694   :  { %v3493_v37 = vpop.f32.mrf.mxu1 }
 0x695   :  { %v3494_v4 = vadd.f32 %v3493_v37, %v3480_v0  ;;  %v3706_v0 = vld [vmem:[%s8466_s12] sm:$0x3] }
 0x698   :  { %v3481_v40 = vpop.f32.mrf.mxu3 }
 0x699   :  { %v3482_v16 = vadd.f32 %v3481_v40, %v3468_v44 }
 0x69c   :  { %v3495_v42 = vpop.f32.mrf.mxu1 }
 0x69d   :  { %v3507_v41 = vpop.f32.mrf.mxu0  ;;  %v3496_v24 = vadd.f32 %v3495_v42, %v3482_v16 }
 0x69e   :  { %v3508_v11 = vadd.f32 %v3507_v41, %v3494_v4 }
 0x6a4   :  { %v3549_v20 = vpop.f32.mrf.mxu1 }
 0x6a5   :  { %v3509_v14 = vpop.f32.mrf.mxu0  ;;  %v3550_v36 = vadd.f32 %v3549_v20, %v2785_v51 }
 0x6a6   :  { %v3510_v56 = vadd.f32 %v3509_v14, %v3496_v24 }
 0x6ac   :  { %v3551_v38 = vpop.f32.mrf.mxu1 }
 0x6ad   :  { %v3563_v28 = vpop.f32.mrf.mxu0  ;;  %v3552_v2 = vadd.f32 %v3551_v38, %v2785_v51 }
 0x6ae   :  { %v3564_v57 = vadd.f32 %v3563_v28, %v3550_v36 }
 0x6b4   :  { %v3605_v62 = vpop.f32.mrf.mxu1 }
 0x6b5   :  { %v3565_v54 = vpop.f32.mrf.mxu0 }
 0x6b6   :  { %v3566_v5 = vadd.f32 %v3565_v54, %v3552_v2 }
 0x6bb   :  { %v3521_v43 = vpop.f32.mrf.mxu2 }
 0x6bc   :  { %v3522_v12 = vadd.f32 %v3521_v43, %v3508_v11  ;;  %v3607_v19 = vpop.f32.mrf.mxu1  ;;  %v3719_v11 = vperm.slane %v3716_v3, 1 }
 0x6bd   :  { %v3619_v8 = vpop.f32.mrf.mxu0 }
 0x6c2   :  { %v3535_v47 = vpop.f32.mrf.mxu3 }
 0x6c3   :  { %v3523_v45 = vpop.f32.mrf.mxu2  ;;  %v3536_v17 = vadd.f32 %v3535_v47, %v3522_v12 }
 0x6c4   :  { %v3524_v53 = vadd.f32 %v3523_v45, %v3510_v56 }
 0x6c5   :  { %v3652_v26 = vadd.f32 %v3536_v17, %v7215_v46  ;;  %v3621_v30 = vpop.f32.mrf.mxu0 }
 0x6ca   :  { %v3537_v22 = vpop.f32.mrf.mxu3 }
 0x6cb   :  { %v3577_v49 = vpop.f32.mrf.mxu2  ;;  %v3538_v39 = vadd.f32 %v3537_v22, %v3524_v53 }
 0x6cc   :  { %v3578_v60 = vadd.f32 %v3577_v49, %v3564_v57 }
 0x6cd   :  { %v3654_v47 = vadd.f32 %v3538_v39, %v7219_v1 }
 0x6d2   :  { %v3591_v55 = vpop.f32.mrf.mxu3 }
 0x6d3   :  { %v3579_v58 = vpop.f32.mrf.mxu2  ;;  %v3592_v27 = vadd.f32 %v3591_v55, %v3578_v60 }
 0x6d4   :  { %v3580_v34 = vadd.f32 %v3579_v58, %v3566_v5  ;;  %v3708_v5 = vperm.slane %v3706_v0, 0 }
 0x6d5   :  { %v3606_v6 = vadd.f32 %v3605_v62, %v3592_v27 }
 0x6d7   :  { %v3620_v15 = vadd.f32 %v3619_v8, %v3606_v6  ;;  %v3709_v6 = vperm.slane %v3706_v0, 1 }
 0x6da   :  { %v3593_v21 = vpop.f32.mrf.mxu3 }
 0x6db   :  { %v3633_v9 = vpop.f32.mrf.mxu2  ;;  %v3594_v13 = vadd.f32 %v3593_v21, %v3580_v34 }
 0x6dc   :  { %v3634_v18 = vadd.f32 %v3633_v9, %v3620_v15 }
 0x6dd   :  { %v3608_v25 = vadd.f32 %v3607_v19, %v3594_v13 }
 0x6df   :  { %v3622_v35 = vadd.f32 %v3621_v30, %v3608_v25 }
 0x6e2   :  { %v3647_v23 = vpop.f32.mrf.mxu3 }
 0x6e3   :  { %v3648_v63 = vadd.f32 %v3647_v23, %v3634_v18  ;;  %v3635_v32 = vpop.f32.mrf.mxu2 }
 0x6e4   :  { %v3636_v41 = vadd.f32 %v3635_v32, %v3622_v35 }
 0x6e5   :  { %v3653_v29 = vadd.f32 %v3648_v63, %v7217_v7 }
 0x6e7   :  { %v3656_v37 = vadd.f32 %v3653_v29, %v3652_v26 }
 0x6e9   :  { %3657 = vadd.xlane.f32.xlu1 %v3656_v37 }
 0x6ea   :  { %v3649_v40 = vpop.f32.mrf.mxu3 }
 0x6eb   :  { %v3650_v43 = vadd.f32 %v3649_v40, %v3636_v41 }
 0x6ed   :  { %v3655_v42 = vadd.f32 %v3650_v43, %v7221_v48 }
 0x6ef   :  { %v3659_v20 = vadd.f32 %v3655_v42, %v3654_v47 }
 0x6f1   :  { %3660 = vadd.xlane.f32.xlu0 %v3659_v20 }
 0x75c   :  { %v3658_v14 = vpop.xlane.xlu1 %3657 }
 0x75d   :  { %v3662_v46 = vmul.f32 %v3658_v14, %v6885_v31 }
 0x75f   :  { %v3664_v7 = vsub.f32 %v3652_v26, %v3662_v46  ;;  %v3665_v28 = vsub.f32 %v3653_v29, %v3662_v46 }
 0x761   :  { %v3668_v49 = vmul.f32 %v3664_v7, %v3664_v7  ;;  %v3669_v45 = vmul.f32 %v3665_v28, %v3665_v28 }
 0x763   :  { %v3672_v50 = vadd.f32 %v3669_v45, %v3668_v49 }
 0x764   :  { %v3661_v51 = vpop.xlane.xlu0 %3660 }
 0x765   :  { %v3663_v22 = vmul.f32 %v3661_v51, %v6885_v31  ;;  %3673 = vadd.xlane.f32.xlu2 %v3672_v50 }
 0x767   :  { %v3666_v38 = vsub.f32 %v3654_v47, %v3663_v22  ;;  %v3667_v33 = vsub.f32 %v3655_v42, %v3663_v22 }
 0x769   :  { %v3670_v36 = vmul.f32 %v3666_v38, %v3666_v38  ;;  %v3671_v1 = vmul.f32 %v3667_v33, %v3667_v33 }
 0x76b   :  { %v3675_v54 = vadd.f32 %v3671_v1, %v3670_v36 }
 0x76d   :  { %3676 = vadd.xlane.f32.xlu1 %v3675_v54 }
 0x7d8   :  { %v3674_v48 = vpop.xlane.xlu2 %3673 }
 0x7d9   :  { %v3678_v55 = vmul.f32 %v3674_v48, %v6885_v31 }
 0x7db   :  { %v3680_v52 = vadd.f32 1e-05, %v3678_v55 }
 0x7dd   :  { %5710 = vrsqrt.f32 %v3680_v52  ;;  %vm3688_vm9 = vweird.f32 %v3680_v52 }
 0x7e0   :  { %v3677_v57 = vpop.xlane.xlu1 %3676 }
 0x7e1   :  { %v3679_v58 = vmul.f32 %v3677_v57, %v6885_v31 }
 0x7e3   :  { %v5711_v59 = vpop.eup %5710  ;;  %v3681_v60 = vadd.f32 1e-05, %v3679_v58 }
 0x7e4   :  { %v3683_v61 = vmul.f32 %v5711_v59, %v3680_v52  ;;  %vm3689_vm8 = vweird.f32 %v5711_v59 }
 0x7e5   :  { %5712 = vrsqrt.f32 %v3681_v60  ;;  %vm3690_vm10 = vmor %vm3688_vm9, %vm3689_vm8  ;;  %vm3698_vm12 = vweird.f32 %v3681_v60 }
 0x7e6   :  { %v3684_v27 = vmul.f32 %v5711_v59, %v3683_v61 }
 0x7e8   :  { %v3685_v62 = vmul.f32 0.5, %v3684_v27 }
 0x7ea   :  { %v3686_v2 = vsub.f32 1.5, %v3685_v62 }
 0x7eb   :  { %v5713_v21 = vpop.eup %5712 }
 0x7ec   :  { %v3687_v4 = vmul.f32 %v5711_v59, %v3686_v2  ;;  %v3693_v31 = vmul.f32 %v5713_v21, %v3681_v60  ;;  %vm3699_vm11 = vweird.f32 %v5713_v21 }
 0x7ed   :  { %vm3700_vm13 = vmor %vm3698_vm12, %vm3699_vm11 }
 0x7ee   :  { %v3691_v8 = vsel %vm3690_vm10, %v5711_v59, %v3687_v4  ;;  %v3694_v9 = vmul.f32 %v5713_v21, %v3693_v31 }
 0x7ef   :  { %v3702_v34 = vmul.f32 %v3691_v8, %v3664_v7  ;;  %v3703_v44 = vmul.f32 %v3691_v8, %v3665_v28 }
 0x7f0   :  { %v3695_v12 = vmul.f32 0.5, %v3694_v9 }
 0x7f1   :  { %v3712_v13 = vmul.f32 %v3708_v5, %v3702_v34  ;;  %v3713_v15 = vmul.f32 %v3709_v6, %v3703_v44 }
 0x7f2   :  { %v3696_v16 = vsub.f32 1.5, %v3695_v12 }
 0x7f3   :  { %v3722_v17 = vadd.f32 %v3718_v10, %v3712_v13  ;;  %v3723_v18 = vadd.f32 %v3719_v11, %v3713_v15 }
 0x7f4   :  { %v3697_v19 = vmul.f32 %v5713_v21, %v3696_v16 }
 0x7f5   :  { %3726 = vst [vmem:[%s8468_s14] sm:$0xff] %v3722_v17 }
 0x7f6   :  { %3727 = vst [vmem:[%s8468_s14 + $0x8] sm:$0xff] %v3723_v18  ;;  %v3701_v23 = vsel %vm3700_vm13, %v5713_v21, %v3697_v19 }
 0x7f7   :  { %v3704_v24 = vmul.f32 %v3701_v23, %v3666_v38  ;;  %v3705_v25 = vmul.f32 %v3701_v23, %v3667_v33 }
 0x7f9   :  { %v3714_v63 = vmul.f32 %v3708_v5, %v3704_v24  ;;  %v3715_v56 = vmul.f32 %v3709_v6, %v3705_v25 }
 0x7fb   :  { %v3724_v26 = vadd.f32 %v3718_v10, %v3714_v63  ;;  %v3725_v29 = vadd.f32 %v3719_v11, %v3715_v56 }
 0x7fd   :  { %3728 = vst [vmem:[%s8468_s14 + $0x10] sm:$0xff] %v3724_v26 }
 0x7fe   :  { %3729 = vst [vmem:[%s8468_s14 + $0x18] sm:$0xff] %v3725_v29 }

</bundles_post_ra>
